<compile_context>
chip_gen: v7x
topology: tpu7x:2x2x1
jax: 0.10.0
libtpu: 0.0.40
codegen_flags: <defaults>
</compile_context>

<pallas_src>
import functools

import jax
import jax.numpy as jnp
from jax import lax
from jax.experimental import pallas as pl
from jax.experimental.pallas import tpu as pltpu


TILE_B = 8            # one sublane-full batch tile per grid step
_UNROLL_T_MAX = 16    # fully unroll the recurrence when T is small / static


def _round_up(x, m):
    return (x + m - 1) // m * m


# --------------------------------------------------------------------------
# Kernels
# --------------------------------------------------------------------------
def _gather_embedding_rows(ids_ref, emb_ref, x_emb, sem, *, T, Bp, tile_b):
    """DMA-gather the T*tile_b embedding rows this batch tile needs (HBM->VMEM)."""
    n_rows = T * tile_b
    b0 = pl.program_id(0) * tile_b
    copies = []
    for r in range(n_rows):
        t, j = divmod(r, tile_b)
        idx = ids_ref[t * Bp + b0 + j]          # scalar read from SMEM (prefetched)
        cp = pltpu.make_async_copy(emb_ref.at[idx], x_emb.at[r], sem.at[0])
        cp.start()
        copies.append(cp)
    for cp in copies:                            # all scalar reads done before waits
        cp.wait()


def encoder_rnn_kernel(ids_ref, emb_ref, wih_ref, whh_ref, h_out_ref, x_emb, sem):
    # ids_ref : SMEM [T*Bp] int32 (time-major, batch-padded)
    # emb_ref : HBM  [V, Ep]   (column E is a constant 1 -> bias row of W_ih)
    # wih_ref : VMEM [Ep, Hp]  (row E holds b_ih + b_hh)
    # whh_ref : VMEM [Hp, Hp]
    tile_b, Hp = h_out_ref.shape
    n_rows, _ = x_emb.shape
    T = n_rows // tile_b
    Bp = ids_ref.shape[0] // T

    _gather_embedding_rows(ids_ref, emb_ref, x_emb, sem, T=T, Bp=Bp, tile_b=tile_b)

    # Hoisted input projection for all timesteps of this batch tile.
    # Bias folds in via the constant-1 column (no broadcast-add).
    x_proj = jnp.dot(x_emb[...], wih_ref[...],
                     preferred_element_type=jnp.float32)         # [T*tile_b, Hp] f32
    whh = whh_ref[...]                                           # bf16 or f32

    def step(x_t, h):
        return jnp.tanh(x_t + jnp.dot(h.astype(whh.dtype), whh,
                                      preferred_element_type=jnp.float32))

    # Serial recurrence: only h @ W_hh + tanh on the critical path.
    h = jnp.zeros((tile_b, Hp), jnp.float32)
    if T <= _UNROLL_T_MAX:
        for t in range(T):                                       # fully unrolled
            h = step(x_proj[t * tile_b:(t + 1) * tile_b, :], h)
    else:
        def body(t, h):
            x_t = lax.dynamic_slice_in_dim(x_proj, t * tile_b, tile_b, 0)
            return step(x_t, h)
        h = lax.fori_loop(0, T, body, h, unroll=2)
    h_out_ref[...] = h


def encoder_lstm_kernel(ids_ref, emb_ref, wx_ref, wh_ref,
                        h_out_ref, c_out_ref, x_emb, sem):
    # wx_ref : VMEM [Ep, 4*Hp]  (row E holds the fused bias; gate order i,f,g,o,
    #                            each gate padded to a full 128-lane stripe)
    # wh_ref : VMEM [Hp, 4*Hp]
    tile_b, Hp = h_out_ref.shape
    n_rows, _ = x_emb.shape
    T = n_rows // tile_b
    Bp = ids_ref.shape[0] // T

    _gather_embedding_rows(ids_ref, emb_ref, x_emb, sem, T=T, Bp=Bp, tile_b=tile_b)

    x_proj = jnp.dot(x_emb[...], wx_ref[...],
                     preferred_element_type=jnp.float32)         # [T*tile_b, 4Hp] f32
    wh = wh_ref[...]

    def step(x_t, h, c):
        gates = x_t + jnp.dot(h.astype(wh.dtype), wh,
                              preferred_element_type=jnp.float32)
        i = jax.nn.sigmoid(gates[:, 0 * Hp:1 * Hp])              # lane-aligned stripes
        f = jax.nn.sigmoid(gates[:, 1 * Hp:2 * Hp])
        g = jnp.tanh(gates[:, 2 * Hp:3 * Hp])
        o = jax.nn.sigmoid(gates[:, 3 * Hp:4 * Hp])
        c = f * c + i * g
        h = o * jnp.tanh(c)
        return h, c

    h = jnp.zeros((tile_b, Hp), jnp.float32)
    c = jnp.zeros((tile_b, Hp), jnp.float32)
    if T <= _UNROLL_T_MAX:
        for t in range(T):                                       # fully unrolled
            h, c = step(x_proj[t * tile_b:(t + 1) * tile_b, :], h, c)
    else:
        def body(t, hc):
            x_t = lax.dynamic_slice_in_dim(x_proj, t * tile_b, tile_b, 0)
            return step(x_t, *hc)
        h, c = lax.fori_loop(0, T, body, (h, c), unroll=2)
    h_out_ref[...] = h
    c_out_ref[...] = c


# --------------------------------------------------------------------------
# Wrappers (padding to vreg-friendly tiles + bf16 weight emission happen here)
# --------------------------------------------------------------------------
def _compiler_params():
    return pltpu.CompilerParams(
        dimension_semantics=("parallel",),           # v7x: 2 TCs split the batch
        vmem_limit_bytes=48 * 1024 * 1024)           # explicit budget, headroom kept


def _pad_ids(source_bt, Bp):
    B, T = source_bt.shape
    ids_tb = jnp.zeros((T, Bp), jnp.int32).at[:, :B].set(source_bt.T)
    return ids_tb.reshape(T * Bp)                    # 1D for SMEM friendliness


def _pad_embedding(emb, Ep, dtype):
    V, E = emb.shape
    # Column E is a constant 1 so the bias (stored in weight row E) folds into
    # the projection matmul.
    emb_p = jnp.zeros((V, Ep), jnp.float32).at[:, :E].set(emb).at[:, E].set(1.0)
    return emb_p.astype(dtype)


@functools.partial(jax.jit, static_argnames=("use_bf16",))
def encoder_rnn_forward(source_bt, emb, w_ih, w_hh, b_ih, b_hh, use_bf16=True):
    """source_bt: [B, T] int32 (batch-major, like the PyTorch module)."""
    B, T = source_bt.shape
    V, E = emb.shape
    H = w_hh.shape[0]
    Bp = _round_up(B, TILE_B)
    Hp = _round_up(H, 128)
    Ep = _round_up(E + 1, 128)                       # +1: constant-1 bias column
    mxu_dtype = jnp.bfloat16 if use_bf16 else jnp.float32

    ids_flat = _pad_ids(source_bt, Bp)
    emb_p = _pad_embedding(emb, Ep, mxu_dtype)       # stays in HBM
    wih_p = (jnp.zeros((Ep, Hp), jnp.float32)
             .at[:E, :H].set(w_ih)
             .at[E, :H].set((b_ih + b_hh).reshape(H))).astype(mxu_dtype)
    whh_p = jnp.zeros((Hp, Hp), jnp.float32).at[:H, :H].set(w_hh).astype(mxu_dtype)

    h = pl.pallas_call(
        encoder_rnn_kernel,
        out_shape=jax.ShapeDtypeStruct((Bp, Hp), jnp.float32),
        grid_spec=pltpu.PrefetchScalarGridSpec(
            num_scalar_prefetch=1,                   # ids -> SMEM
            grid=(Bp // TILE_B,),
            in_specs=[
                pl.BlockSpec(memory_space=pl.ANY),                 # emb in HBM
                pl.BlockSpec((Ep, Hp), lambda b, ids: (0, 0)),     # W_ih (+bias row)
                pl.BlockSpec((Hp, Hp), lambda b, ids: (0, 0)),     # W_hh
            ],
            out_specs=pl.BlockSpec((TILE_B, Hp), lambda b, ids: (b, 0)),
            scratch_shapes=[
                pltpu.VMEM((T * TILE_B, Ep), mxu_dtype),           # gathered rows
                pltpu.SemaphoreType.DMA((1,)),
            ]),
        compiler_params=_compiler_params(),
    )(ids_flat, emb_p, wih_p, whh_p)
    return h[:B, :H]


@functools.partial(jax.jit, static_argnames=("use_bf16",))
def encoder_lstm_forward(source_bt, emb, w_x, w_h, b, use_bf16=True):
    """source_bt: [B, T] int32.  Gate order of w_x/w_h/b is (i, f, g, o)."""
    B, T = source_bt.shape
    V, E = emb.shape
    H = w_h.shape[0]
    Bp = _round_up(B, TILE_B)
    Hp = _round_up(H, 128)
    Ep = _round_up(E + 1, 128)
    mxu_dtype = jnp.bfloat16 if use_bf16 else jnp.float32

    ids_flat = _pad_ids(source_bt, Bp)
    emb_p = _pad_embedding(emb, Ep, mxu_dtype)

    # Per-gate lane padding so in-kernel gate slices are 128-lane aligned;
    # bias goes into weight row E (picked up by the constant-1 column).
    wx_p = (jnp.zeros((Ep, 4, Hp), jnp.float32)
            .at[:E, :, :H].set(w_x.reshape(E, 4, H))
            .at[E, :, :H].set(b.reshape(4, H))).reshape(Ep, 4 * Hp).astype(mxu_dtype)
    wh_p = (jnp.zeros((Hp, 4, Hp), jnp.float32)
            .at[:H, :, :H].set(w_h.reshape(H, 4, H))).reshape(Hp, 4 * Hp).astype(mxu_dtype)

    out_sd = jax.ShapeDtypeStruct((Bp, Hp), jnp.float32)
    h, c = pl.pallas_call(
        encoder_lstm_kernel,
        out_shape=(out_sd, out_sd),
        grid_spec=pltpu.PrefetchScalarGridSpec(
            num_scalar_prefetch=1,
            grid=(Bp // TILE_B,),
            in_specs=[
                pl.BlockSpec(memory_space=pl.ANY),                     # emb in HBM
                pl.BlockSpec((Ep, 4 * Hp), lambda b, ids: (0, 0)),     # W_x (+bias)
                pl.BlockSpec((Hp, 4 * Hp), lambda b, ids: (0, 0)),     # W_h
            ],
            out_specs=(pl.BlockSpec((TILE_B, Hp), lambda b, ids: (b, 0)),
                       pl.BlockSpec((TILE_B, Hp), lambda b, ids: (b, 0))),
            scratch_shapes=[
                pltpu.VMEM((T * TILE_B, Ep), mxu_dtype),
                pltpu.SemaphoreType.DMA((1,)),
            ]),
        compiler_params=_compiler_params(),
    )(ids_flat, emb_p, wx_p, wh_p)
    return h[:B, :H], c[:B, :H]


# --------------------------------------------------------------------------
# Pure-JAX references (semantics of the PyTorch Encoder.forward)
# --------------------------------------------------------------------------
_HI = jax.lax.Precision.HIGHEST   # keep the reference in true f32 on TPU


def ref_rnn(source_bt, emb, w_ih, w_hh, b_ih, b_hh):
    B, T = source_bt.shape
    H = w_hh.shape[0]
    x = emb[source_bt]                                   # [B, T, E] (nn.Embedding)
    h = jnp.zeros((B, H), jnp.float32)
    for t in range(T):
        h = jnp.tanh(jnp.dot(x[:, t, :], w_ih, precision=_HI)
                     + jnp.dot(h, w_hh, precision=_HI) + b_ih + b_hh)
    return h


def ref_lstm(source_bt, emb, w_x, w_h, b):
    B, T = source_bt.shape
    H = w_h.shape[0]
    x = emb[source_bt]
    h = jnp.zeros((B, H), jnp.float32)
    c = jnp.zeros((B, H), jnp.float32)
    for t in range(T):
        g = (jnp.dot(x[:, t, :], w_x, precision=_HI)
             + jnp.dot(h, w_h, precision=_HI) + b)
        i = jax.nn.sigmoid(g[:, 0 * H:1 * H])
        f = jax.nn.sigmoid(g[:, 1 * H:2 * H])
        gg = jnp.tanh(g[:, 2 * H:3 * H])
        o = jax.nn.sigmoid(g[:, 3 * H:4 * H])
        c = f * c + i * gg
        h = o * jnp.tanh(c)
    return h, c


# --------------------------------------------------------------------------
# Main
# --------------------------------------------------------------------------
if __name__ == "__main__":
    VOCAB, EMB, HID = 16, 8, 32
    BATCH, SEQ = 2, 8

    key = jax.random.PRNGKey(0)
    ks = jax.random.split(key, 8)

    # Deterministic synthetic parameters (shapes from Encoder.__init__).
    embedding = jax.random.normal(ks[0], (VOCAB, EMB), jnp.float32) * 0.5
    # RNNCellManual parameters
    w_ih = jax.random.normal(ks[1], (EMB, HID), jnp.float32) * 0.2
    w_hh = jax.random.normal(ks[2], (HID, HID), jnp.float32) * 0.2
    b_ih = jax.random.normal(ks[3], (1, HID), jnp.float32) * 0.1
    b_hh = jax.random.normal(ks[4], (1, HID), jnp.float32) * 0.1
    # LSTMCellManual parameters (fused gates: i, f, g, o)
    w_x = jax.random.normal(ks[5], (EMB, 4 * HID), jnp.float32) * 0.2
    w_h = jax.random.normal(ks[6], (HID, 4 * HID), jnp.float32) * 0.2
    b_l = jax.random.normal(ks[7], (1, 4 * HID), jnp.float32) * 0.1

    source = jax.random.randint(key, (BATCH, SEQ), 0, VOCAB, jnp.int32)  # [B, T]

    # ---- model_type == RNNCellManual ------------------------------------
    h_ref = ref_rnn(source, embedding, w_ih, w_hh, b_ih, b_hh)

    h_f32 = encoder_rnn_forward(source, embedding, w_ih, w_hh, b_ih, b_hh,
                                use_bf16=False)
    jax.block_until_ready(h_f32)
    assert jnp.allclose(h_f32, h_ref, atol=1e-4), "RNN encoder (f32 MXU) mismatch"

    h_bf16 = encoder_rnn_forward(source, embedding, w_ih, w_hh, b_ih, b_hh,
                                 use_bf16=True)
    jax.block_until_ready(h_bf16)
    assert jnp.allclose(h_bf16, h_ref, atol=5e-2), "RNN encoder (bf16 MXU) mismatch"

    # ---- model_type == LSTMCellManual ------------------------------------
    h_ref2, c_ref2 = ref_lstm(source, embedding, w_x, w_h, b_l)

    h_f, c_f = encoder_lstm_forward(source, embedding, w_x, w_h, b_l,
                                    use_bf16=False)
    jax.block_until_ready((h_f, c_f))
    assert jnp.allclose(h_f, h_ref2, atol=1e-4), "LSTM encoder h (f32 MXU) mismatch"
    assert jnp.allclose(c_f, c_ref2, atol=1e-4), "LSTM encoder c (f32 MXU) mismatch"

    h_b, c_b = encoder_lstm_forward(source, embedding, w_x, w_h, b_l,
                                    use_bf16=True)
    jax.block_until_ready((h_b, c_b))
    assert jnp.allclose(h_b, h_ref2, atol=5e-2), "LSTM encoder h (bf16 MXU) mismatch"
    assert jnp.allclose(c_b, c_ref2, atol=5e-2), "LSTM encoder c (bf16 MXU) mismatch"

    print("KERNEL_OK")
</pallas_src>

<mosaic_0001>
module attributes {stable_mosaic.version = 11 : i64} {
  func.func @encoder_rnn_kernel(%arg0: i32, %arg1: memref<64xi32, #tpu.memory_space<smem>>, %arg2: memref<16x128xf32, #tpu.memory_space<any>>, %arg3: memref<128x128xf32, #tpu.memory_space<vmem>>, %arg4: memref<128x128xf32, #tpu.memory_space<vmem>>, %arg5: memref<8x128xf32, #tpu.memory_space<vmem>>, %arg6: memref<64x128xf32, #tpu.memory_space<vmem>>, %arg7: memref<1x!tpu.dma_semaphore, #tpu.memory_space<semaphore_mem>>) attributes {dimension_semantics = [#tpu.dimension_semantics<parallel>], iteration_bounds = array<i64: 1>, scalar_prefetch = 1 : i64, scratch_operands = 2 : i64, tpu.core_type = #tpu.core_type<tc>, window_params = [{}, {pipeline_mode = #tpu.pipeline_mode<synchronous>, transform_indices = @transform_1, window_bounds = array<i64: 128, 128>}, {pipeline_mode = #tpu.pipeline_mode<synchronous>, transform_indices = @transform_2, window_bounds = array<i64: 128, 128>}, {transform_indices = @transform_3, window_bounds = array<i64: 8, 128>}]} {
    %c8_i32 = arith.constant 8 : i32
    %0 = arith.muli %arg0, %c8_i32 : i32
    %c0_i32 = arith.constant 0 : i32
    %1 = arith.addi %c0_i32, %0 : i32
    %c0_i32_0 = arith.constant 0 : i32
    %2 = arith.addi %1, %c0_i32_0 : i32
    %3 = arith.index_cast %2 : i32 to index
    %4 = memref.load %arg1[%3] : memref<64xi32, #tpu.memory_space<smem>>
    %c0_i32_1 = arith.constant 0 : i32
    %c0_i32_2 = arith.constant 0 : i32
    %c0_i32_3 = arith.constant 0 : i32
    %5 = tpu.memref_slice %arg2[%4, %c0_i32_3] : memref<16x128xf32, #tpu.memory_space<any>> -> memref<1x128xf32, #tpu.memory_space<any>>
    %6 = tpu.memref_squeeze %5 : memref<1x128xf32, #tpu.memory_space<any>> -> memref<128xf32, #tpu.memory_space<any>>
    %c0_i32_4 = arith.constant 0 : i32
    %7 = tpu.memref_slice %arg6[%c0_i32_1, %c0_i32_4] : memref<64x128xf32, #tpu.memory_space<vmem>> -> memref<1x128xf32, #tpu.memory_space<vmem>>
    %8 = tpu.memref_squeeze %7 : memref<1x128xf32, #tpu.memory_space<vmem>> -> memref<128xf32, #tpu.memory_space<vmem>>
    %9 = tpu.memref_slice %arg7[%c0_i32_2] : memref<1x!tpu.dma_semaphore, #tpu.memory_space<semaphore_mem>> -> memref<1x!tpu.dma_semaphore, #tpu.memory_space<semaphore_mem>>
    %10 = tpu.memref_squeeze %9 : memref<1x!tpu.dma_semaphore, #tpu.memory_space<semaphore_mem>> -> memref<!tpu.dma_semaphore, #tpu.memory_space<semaphore_mem>>
    tpu.enqueue_dma source(%6 : memref<128xf32, #tpu.memory_space<any>>) target(%8 : memref<128xf32, #tpu.memory_space<vmem>>) target_semaphore(%10 : memref<!tpu.dma_semaphore, #tpu.memory_space<semaphore_mem>>)
    %c0_i32_5 = arith.constant 0 : i32
    %11 = arith.addi %c0_i32_5, %0 : i32
    %c1_i32 = arith.constant 1 : i32
    %12 = arith.addi %11, %c1_i32 : i32
    %13 = arith.index_cast %12 : i32 to index
    %14 = memref.load %arg1[%13] : memref<64xi32, #tpu.memory_space<smem>>
    %c1_i32_6 = arith.constant 1 : i32
    %c0_i32_7 = arith.constant 0 : i32
    %c0_i32_8 = arith.constant 0 : i32
    %15 = tpu.memref_slice %arg2[%14, %c0_i32_8] : memref<16x128xf32, #tpu.memory_space<any>> -> memref<1x128xf32, #tpu.memory_space<any>>
    %16 = tpu.memref_squeeze %15 : memref<1x128xf32, #tpu.memory_space<any>> -> memref<128xf32, #tpu.memory_space<any>>
    %c0_i32_9 = arith.constant 0 : i32
    %17 = tpu.memref_slice %arg6[%c1_i32_6, %c0_i32_9] : memref<64x128xf32, #tpu.memory_space<vmem>> -> memref<1x128xf32, #tpu.memory_space<vmem>>
    %18 = tpu.memref_squeeze %17 : memref<1x128xf32, #tpu.memory_space<vmem>> -> memref<128xf32, #tpu.memory_space<vmem>>
    %19 = tpu.memref_slice %arg7[%c0_i32_7] : memref<1x!tpu.dma_semaphore, #tpu.memory_space<semaphore_mem>> -> memref<1x!tpu.dma_semaphore, #tpu.memory_space<semaphore_mem>>
    %20 = tpu.memref_squeeze %19 : memref<1x!tpu.dma_semaphore, #tpu.memory_space<semaphore_mem>> -> memref<!tpu.dma_semaphore, #tpu.memory_space<semaphore_mem>>
    tpu.enqueue_dma source(%16 : memref<128xf32, #tpu.memory_space<any>>) target(%18 : memref<128xf32, #tpu.memory_space<vmem>>) target_semaphore(%20 : memref<!tpu.dma_semaphore, #tpu.memory_space<semaphore_mem>>)
    %c0_i32_10 = arith.constant 0 : i32
    %21 = arith.addi %c0_i32_10, %0 : i32
    %c2_i32 = arith.constant 2 : i32
    %22 = arith.addi %21, %c2_i32 : i32
    %23 = arith.index_cast %22 : i32 to index
    %24 = memref.load %arg1[%23] : memref<64xi32, #tpu.memory_space<smem>>
    %c2_i32_11 = arith.constant 2 : i32
    %c0_i32_12 = arith.constant 0 : i32
    %c0_i32_13 = arith.constant 0 : i32
    %25 = tpu.memref_slice %arg2[%24, %c0_i32_13] : memref<16x128xf32, #tpu.memory_space<any>> -> memref<1x128xf32, #tpu.memory_space<any>>
    %26 = tpu.memref_squeeze %25 : memref<1x128xf32, #tpu.memory_space<any>> -> memref<128xf32, #tpu.memory_space<any>>
    %c0_i32_14 = arith.constant 0 : i32
    %27 = tpu.memref_slice %arg6[%c2_i32_11, %c0_i32_14] : memref<64x128xf32, #tpu.memory_space<vmem>> -> memref<1x128xf32, #tpu.memory_space<vmem>>
    %28 = tpu.memref_squeeze %27 : memref<1x128xf32, #tpu.memory_space<vmem>> -> memref<128xf32, #tpu.memory_space<vmem>>
    %29 = tpu.memref_slice %arg7[%c0_i32_12] : memref<1x!tpu.dma_semaphore, #tpu.memory_space<semaphore_mem>> -> memref<1x!tpu.dma_semaphore, #tpu.memory_space<semaphore_mem>>
    %30 = tpu.memref_squeeze %29 : memref<1x!tpu.dma_semaphore, #tpu.memory_space<semaphore_mem>> -> memref<!tpu.dma_semaphore, #tpu.memory_space<semaphore_mem>>
    tpu.enqueue_dma source(%26 : memref<128xf32, #tpu.memory_space<any>>) target(%28 : memref<128xf32, #tpu.memory_space<vmem>>) target_semaphore(%30 : memref<!tpu.dma_semaphore, #tpu.memory_space<semaphore_mem>>)
    %c0_i32_15 = arith.constant 0 : i32
    %31 = arith.addi %c0_i32_15, %0 : i32
    %c3_i32 = arith.constant 3 : i32
    %32 = arith.addi %31, %c3_i32 : i32
    %33 = arith.index_cast %32 : i32 to index
    %34 = memref.load %arg1[%33] : memref<64xi32, #tpu.memory_space<smem>>
    %c3_i32_16 = arith.constant 3 : i32
    %c0_i32_17 = arith.constant 0 : i32
    %c0_i32_18 = arith.constant 0 : i32
    %35 = tpu.memref_slice %arg2[%34, %c0_i32_18] : memref<16x128xf32, #tpu.memory_space<any>> -> memref<1x128xf32, #tpu.memory_space<any>>
    %36 = tpu.memref_squeeze %35 : memref<1x128xf32, #tpu.memory_space<any>> -> memref<128xf32, #tpu.memory_space<any>>
    %c0_i32_19 = arith.constant 0 : i32
    %37 = tpu.memref_slice %arg6[%c3_i32_16, %c0_i32_19] : memref<64x128xf32, #tpu.memory_space<vmem>> -> memref<1x128xf32, #tpu.memory_space<vmem>>
    %38 = tpu.memref_squeeze %37 : memref<1x128xf32, #tpu.memory_space<vmem>> -> memref<128xf32, #tpu.memory_space<vmem>>
    %39 = tpu.memref_slice %arg7[%c0_i32_17] : memref<1x!tpu.dma_semaphore, #tpu.memory_space<semaphore_mem>> -> memref<1x!tpu.dma_semaphore, #tpu.memory_space<semaphore_mem>>
    %40 = tpu.memref_squeeze %39 : memref<1x!tpu.dma_semaphore, #tpu.memory_space<semaphore_mem>> -> memref<!tpu.dma_semaphore, #tpu.memory_space<semaphore_mem>>
    tpu.enqueue_dma source(%36 : memref<128xf32, #tpu.memory_space<any>>) target(%38 : memref<128xf32, #tpu.memory_space<vmem>>) target_semaphore(%40 : memref<!tpu.dma_semaphore, #tpu.memory_space<semaphore_mem>>)
    %c0_i32_20 = arith.constant 0 : i32
    %41 = arith.addi %c0_i32_20, %0 : i32
    %c4_i32 = arith.constant 4 : i32
    %42 = arith.addi %41, %c4_i32 : i32
    %43 = arith.index_cast %42 : i32 to index
    %44 = memref.load %arg1[%43] : memref<64xi32, #tpu.memory_space<smem>>
    %c4_i32_21 = arith.constant 4 : i32
    %c0_i32_22 = arith.constant 0 : i32
    %c0_i32_23 = arith.constant 0 : i32
    %45 = tpu.memref_slice %arg2[%44, %c0_i32_23] : memref<16x128xf32, #tpu.memory_space<any>> -> memref<1x128xf32, #tpu.memory_space<any>>
    %46 = tpu.memref_squeeze %45 : memref<1x128xf32, #tpu.memory_space<any>> -> memref<128xf32, #tpu.memory_space<any>>
    %c0_i32_24 = arith.constant 0 : i32
    %47 = tpu.memref_slice %arg6[%c4_i32_21, %c0_i32_24] : memref<64x128xf32, #tpu.memory_space<vmem>> -> memref<1x128xf32, #tpu.memory_space<vmem>>
    %48 = tpu.memref_squeeze %47 : memref<1x128xf32, #tpu.memory_space<vmem>> -> memref<128xf32, #tpu.memory_space<vmem>>
    %49 = tpu.memref_slice %arg7[%c0_i32_22] : memref<1x!tpu.dma_semaphore, #tpu.memory_space<semaphore_mem>> -> memref<1x!tpu.dma_semaphore, #tpu.memory_space<semaphore_mem>>
    %50 = tpu.memref_squeeze %49 : memref<1x!tpu.dma_semaphore, #tpu.memory_space<semaphore_mem>> -> memref<!tpu.dma_semaphore, #tpu.memory_space<semaphore_mem>>
    tpu.enqueue_dma source(%46 : memref<128xf32, #tpu.memory_space<any>>) target(%48 : memref<128xf32, #tpu.memory_space<vmem>>) target_semaphore(%50 : memref<!tpu.dma_semaphore, #tpu.memory_space<semaphore_mem>>)
    %c0_i32_25 = arith.constant 0 : i32
    %51 = arith.addi %c0_i32_25, %0 : i32
    %c5_i32 = arith.constant 5 : i32
    %52 = arith.addi %51, %c5_i32 : i32
    %53 = arith.index_cast %52 : i32 to index
    %54 = memref.load %arg1[%53] : memref<64xi32, #tpu.memory_space<smem>>
    %c5_i32_26 = arith.constant 5 : i32
    %c0_i32_27 = arith.constant 0 : i32
    %c0_i32_28 = arith.constant 0 : i32
    %55 = tpu.memref_slice %arg2[%54, %c0_i32_28] : memref<16x128xf32, #tpu.memory_space<any>> -> memref<1x128xf32, #tpu.memory_space<any>>
    %56 = tpu.memref_squeeze %55 : memref<1x128xf32, #tpu.memory_space<any>> -> memref<128xf32, #tpu.memory_space<any>>
    %c0_i32_29 = arith.constant 0 : i32
    %57 = tpu.memref_slice %arg6[%c5_i32_26, %c0_i32_29] : memref<64x128xf32, #tpu.memory_space<vmem>> -> memref<1x128xf32, #tpu.memory_space<vmem>>
    %58 = tpu.memref_squeeze %57 : memref<1x128xf32, #tpu.memory_space<vmem>> -> memref<128xf32, #tpu.memory_space<vmem>>
    %59 = tpu.memref_slice %arg7[%c0_i32_27] : memref<1x!tpu.dma_semaphore, #tpu.memory_space<semaphore_mem>> -> memref<1x!tpu.dma_semaphore, #tpu.memory_space<semaphore_mem>>
    %60 = tpu.memref_squeeze %59 : memref<1x!tpu.dma_semaphore, #tpu.memory_space<semaphore_mem>> -> memref<!tpu.dma_semaphore, #tpu.memory_space<semaphore_mem>>
    tpu.enqueue_dma source(%56 : memref<128xf32, #tpu.memory_space<any>>) target(%58 : memref<128xf32, #tpu.memory_space<vmem>>) target_semaphore(%60 : memref<!tpu.dma_semaphore, #tpu.memory_space<semaphore_mem>>)
    %c0_i32_30 = arith.constant 0 : i32
    %61 = arith.addi %c0_i32_30, %0 : i32
    %c6_i32 = arith.constant 6 : i32
    %62 = arith.addi %61, %c6_i32 : i32
    %63 = arith.index_cast %62 : i32 to index
    %64 = memref.load %arg1[%63] : memref<64xi32, #tpu.memory_space<smem>>
    %c6_i32_31 = arith.constant 6 : i32
    %c0_i32_32 = arith.constant 0 : i32
    %c0_i32_33 = arith.constant 0 : i32
    %65 = tpu.memref_slice %arg2[%64, %c0_i32_33] : memref<16x128xf32, #tpu.memory_space<any>> -> memref<1x128xf32, #tpu.memory_space<any>>
    %66 = tpu.memref_squeeze %65 : memref<1x128xf32, #tpu.memory_space<any>> -> memref<128xf32, #tpu.memory_space<any>>
    %c0_i32_34 = arith.constant 0 : i32
    %67 = tpu.memref_slice %arg6[%c6_i32_31, %c0_i32_34] : memref<64x128xf32, #tpu.memory_space<vmem>> -> memref<1x128xf32, #tpu.memory_space<vmem>>
    %68 = tpu.memref_squeeze %67 : memref<1x128xf32, #tpu.memory_space<vmem>> -> memref<128xf32, #tpu.memory_space<vmem>>
    %69 = tpu.memref_slice %arg7[%c0_i32_32] : memref<1x!tpu.dma_semaphore, #tpu.memory_space<semaphore_mem>> -> memref<1x!tpu.dma_semaphore, #tpu.memory_space<semaphore_mem>>
    %70 = tpu.memref_squeeze %69 : memref<1x!tpu.dma_semaphore, #tpu.memory_space<semaphore_mem>> -> memref<!tpu.dma_semaphore, #tpu.memory_space<semaphore_mem>>
    tpu.enqueue_dma source(%66 : memref<128xf32, #tpu.memory_space<any>>) target(%68 : memref<128xf32, #tpu.memory_space<vmem>>) target_semaphore(%70 : memref<!tpu.dma_semaphore, #tpu.memory_space<semaphore_mem>>)
    %c0_i32_35 = arith.constant 0 : i32
    %71 = arith.addi %c0_i32_35, %0 : i32
    %c7_i32 = arith.constant 7 : i32
    %72 = arith.addi %71, %c7_i32 : i32
    %73 = arith.index_cast %72 : i32 to index
    %74 = memref.load %arg1[%73] : memref<64xi32, #tpu.memory_space<smem>>
    %c7_i32_36 = arith.constant 7 : i32
    %c0_i32_37 = arith.constant 0 : i32
    %c0_i32_38 = arith.constant 0 : i32
    %75 = tpu.memref_slice %arg2[%74, %c0_i32_38] : memref<16x128xf32, #tpu.memory_space<any>> -> memref<1x128xf32, #tpu.memory_space<any>>
    %76 = tpu.memref_squeeze %75 : memref<1x128xf32, #tpu.memory_space<any>> -> memref<128xf32, #tpu.memory_space<any>>
    %c0_i32_39 = arith.constant 0 : i32
    %77 = tpu.memref_slice %arg6[%c7_i32_36, %c0_i32_39] : memref<64x128xf32, #tpu.memory_space<vmem>> -> memref<1x128xf32, #tpu.memory_space<vmem>>
    %78 = tpu.memref_squeeze %77 : memref<1x128xf32, #tpu.memory_space<vmem>> -> memref<128xf32, #tpu.memory_space<vmem>>
    %79 = tpu.memref_slice %arg7[%c0_i32_37] : memref<1x!tpu.dma_semaphore, #tpu.memory_space<semaphore_mem>> -> memref<1x!tpu.dma_semaphore, #tpu.memory_space<semaphore_mem>>
    %80 = tpu.memref_squeeze %79 : memref<1x!tpu.dma_semaphore, #tpu.memory_space<semaphore_mem>> -> memref<!tpu.dma_semaphore, #tpu.memory_space<semaphore_mem>>
    tpu.enqueue_dma source(%76 : memref<128xf32, #tpu.memory_space<any>>) target(%78 : memref<128xf32, #tpu.memory_space<vmem>>) target_semaphore(%80 : memref<!tpu.dma_semaphore, #tpu.memory_space<semaphore_mem>>)
    %c8_i32_40 = arith.constant 8 : i32
    %81 = arith.addi %c8_i32_40, %0 : i32
    %c0_i32_41 = arith.constant 0 : i32
    %82 = arith.addi %81, %c0_i32_41 : i32
    %83 = arith.index_cast %82 : i32 to index
    %84 = memref.load %arg1[%83] : memref<64xi32, #tpu.memory_space<smem>>
    %c8_i32_42 = arith.constant 8 : i32
    %c0_i32_43 = arith.constant 0 : i32
    %c0_i32_44 = arith.constant 0 : i32
    %85 = tpu.memref_slice %arg2[%84, %c0_i32_44] : memref<16x128xf32, #tpu.memory_space<any>> -> memref<1x128xf32, #tpu.memory_space<any>>
    %86 = tpu.memref_squeeze %85 : memref<1x128xf32, #tpu.memory_space<any>> -> memref<128xf32, #tpu.memory_space<any>>
    %c0_i32_45 = arith.constant 0 : i32
    %87 = tpu.memref_slice %arg6[%c8_i32_42, %c0_i32_45] : memref<64x128xf32, #tpu.memory_space<vmem>> -> memref<1x128xf32, #tpu.memory_space<vmem>>
    %88 = tpu.memref_squeeze %87 : memref<1x128xf32, #tpu.memory_space<vmem>> -> memref<128xf32, #tpu.memory_space<vmem>>
    %89 = tpu.memref_slice %arg7[%c0_i32_43] : memref<1x!tpu.dma_semaphore, #tpu.memory_space<semaphore_mem>> -> memref<1x!tpu.dma_semaphore, #tpu.memory_space<semaphore_mem>>
    %90 = tpu.memref_squeeze %89 : memref<1x!tpu.dma_semaphore, #tpu.memory_space<semaphore_mem>> -> memref<!tpu.dma_semaphore, #tpu.memory_space<semaphore_mem>>
    tpu.enqueue_dma source(%86 : memref<128xf32, #tpu.memory_space<any>>) target(%88 : memref<128xf32, #tpu.memory_space<vmem>>) target_semaphore(%90 : memref<!tpu.dma_semaphore, #tpu.memory_space<semaphore_mem>>)
    %c8_i32_46 = arith.constant 8 : i32
    %91 = arith.addi %c8_i32_46, %0 : i32
    %c1_i32_47 = arith.constant 1 : i32
    %92 = arith.addi %91, %c1_i32_47 : i32
    %93 = arith.index_cast %92 : i32 to index
    %94 = memref.load %arg1[%93] : memref<64xi32, #tpu.memory_space<smem>>
    %c9_i32 = arith.constant 9 : i32
    %c0_i32_48 = arith.constant 0 : i32
    %c0_i32_49 = arith.constant 0 : i32
    %95 = tpu.memref_slice %arg2[%94, %c0_i32_49] : memref<16x128xf32, #tpu.memory_space<any>> -> memref<1x128xf32, #tpu.memory_space<any>>
    %96 = tpu.memref_squeeze %95 : memref<1x128xf32, #tpu.memory_space<any>> -> memref<128xf32, #tpu.memory_space<any>>
    %c0_i32_50 = arith.constant 0 : i32
    %97 = tpu.memref_slice %arg6[%c9_i32, %c0_i32_50] : memref<64x128xf32, #tpu.memory_space<vmem>> -> memref<1x128xf32, #tpu.memory_space<vmem>>
    %98 = tpu.memref_squeeze %97 : memref<1x128xf32, #tpu.memory_space<vmem>> -> memref<128xf32, #tpu.memory_space<vmem>>
    %99 = tpu.memref_slice %arg7[%c0_i32_48] : memref<1x!tpu.dma_semaphore, #tpu.memory_space<semaphore_mem>> -> memref<1x!tpu.dma_semaphore, #tpu.memory_space<semaphore_mem>>
    %100 = tpu.memref_squeeze %99 : memref<1x!tpu.dma_semaphore, #tpu.memory_space<semaphore_mem>> -> memref<!tpu.dma_semaphore, #tpu.memory_space<semaphore_mem>>
    tpu.enqueue_dma source(%96 : memref<128xf32, #tpu.memory_space<any>>) target(%98 : memref<128xf32, #tpu.memory_space<vmem>>) target_semaphore(%100 : memref<!tpu.dma_semaphore, #tpu.memory_space<semaphore_mem>>)
    %c8_i32_51 = arith.constant 8 : i32
    %101 = arith.addi %c8_i32_51, %0 : i32
    %c2_i32_52 = arith.constant 2 : i32
    %102 = arith.addi %101, %c2_i32_52 : i32
    %103 = arith.index_cast %102 : i32 to index
    %104 = memref.load %arg1[%103] : memref<64xi32, #tpu.memory_space<smem>>
    %c10_i32 = arith.constant 10 : i32
    %c0_i32_53 = arith.constant 0 : i32
    %c0_i32_54 = arith.constant 0 : i32
    %105 = tpu.memref_slice %arg2[%104, %c0_i32_54] : memref<16x128xf32, #tpu.memory_space<any>> -> memref<1x128xf32, #tpu.memory_space<any>>
    %106 = tpu.memref_squeeze %105 : memref<1x128xf32, #tpu.memory_space<any>> -> memref<128xf32, #tpu.memory_space<any>>
    %c0_i32_55 = arith.constant 0 : i32
    %107 = tpu.memref_slice %arg6[%c10_i32, %c0_i32_55] : memref<64x128xf32, #tpu.memory_space<vmem>> -> memref<1x128xf32, #tpu.memory_space<vmem>>
    %108 = tpu.memref_squeeze %107 : memref<1x128xf32, #tpu.memory_space<vmem>> -> memref<128xf32, #tpu.memory_space<vmem>>
    %109 = tpu.memref_slice %arg7[%c0_i32_53] : memref<1x!tpu.dma_semaphore, #tpu.memory_space<semaphore_mem>> -> memref<1x!tpu.dma_semaphore, #tpu.memory_space<semaphore_mem>>
    %110 = tpu.memref_squeeze %109 : memref<1x!tpu.dma_semaphore, #tpu.memory_space<semaphore_mem>> -> memref<!tpu.dma_semaphore, #tpu.memory_space<semaphore_mem>>
    tpu.enqueue_dma source(%106 : memref<128xf32, #tpu.memory_space<any>>) target(%108 : memref<128xf32, #tpu.memory_space<vmem>>) target_semaphore(%110 : memref<!tpu.dma_semaphore, #tpu.memory_space<semaphore_mem>>)
    %c8_i32_56 = arith.constant 8 : i32
    %111 = arith.addi %c8_i32_56, %0 : i32
    %c3_i32_57 = arith.constant 3 : i32
    %112 = arith.addi %111, %c3_i32_57 : i32
    %113 = arith.index_cast %112 : i32 to index
    %114 = memref.load %arg1[%113] : memref<64xi32, #tpu.memory_space<smem>>
    %c11_i32 = arith.constant 11 : i32
    %c0_i32_58 = arith.constant 0 : i32
    %c0_i32_59 = arith.constant 0 : i32
    %115 = tpu.memref_slice %arg2[%114, %c0_i32_59] : memref<16x128xf32, #tpu.memory_space<any>> -> memref<1x128xf32, #tpu.memory_space<any>>
    %116 = tpu.memref_squeeze %115 : memref<1x128xf32, #tpu.memory_space<any>> -> memref<128xf32, #tpu.memory_space<any>>
    %c0_i32_60 = arith.constant 0 : i32
    %117 = tpu.memref_slice %arg6[%c11_i32, %c0_i32_60] : memref<64x128xf32, #tpu.memory_space<vmem>> -> memref<1x128xf32, #tpu.memory_space<vmem>>
    %118 = tpu.memref_squeeze %117 : memref<1x128xf32, #tpu.memory_space<vmem>> -> memref<128xf32, #tpu.memory_space<vmem>>
    %119 = tpu.memref_slice %arg7[%c0_i32_58] : memref<1x!tpu.dma_semaphore, #tpu.memory_space<semaphore_mem>> -> memref<1x!tpu.dma_semaphore, #tpu.memory_space<semaphore_mem>>
    %120 = tpu.memref_squeeze %119 : memref<1x!tpu.dma_semaphore, #tpu.memory_space<semaphore_mem>> -> memref<!tpu.dma_semaphore, #tpu.memory_space<semaphore_mem>>
    tpu.enqueue_dma source(%116 : memref<128xf32, #tpu.memory_space<any>>) target(%118 : memref<128xf32, #tpu.memory_space<vmem>>) target_semaphore(%120 : memref<!tpu.dma_semaphore, #tpu.memory_space<semaphore_mem>>)
    %c8_i32_61 = arith.constant 8 : i32
    %121 = arith.addi %c8_i32_61, %0 : i32
    %c4_i32_62 = arith.constant 4 : i32
    %122 = arith.addi %121, %c4_i32_62 : i32
    %123 = arith.index_cast %122 : i32 to index
    %124 = memref.load %arg1[%123] : memref<64xi32, #tpu.memory_space<smem>>
    %c12_i32 = arith.constant 12 : i32
    %c0_i32_63 = arith.constant 0 : i32
    %c0_i32_64 = arith.constant 0 : i32
    %125 = tpu.memref_slice %arg2[%124, %c0_i32_64] : memref<16x128xf32, #tpu.memory_space<any>> -> memref<1x128xf32, #tpu.memory_space<any>>
    %126 = tpu.memref_squeeze %125 : memref<1x128xf32, #tpu.memory_space<any>> -> memref<128xf32, #tpu.memory_space<any>>
    %c0_i32_65 = arith.constant 0 : i32
    %127 = tpu.memref_slice %arg6[%c12_i32, %c0_i32_65] : memref<64x128xf32, #tpu.memory_space<vmem>> -> memref<1x128xf32, #tpu.memory_space<vmem>>
    %128 = tpu.memref_squeeze %127 : memref<1x128xf32, #tpu.memory_space<vmem>> -> memref<128xf32, #tpu.memory_space<vmem>>
    %129 = tpu.memref_slice %arg7[%c0_i32_63] : memref<1x!tpu.dma_semaphore, #tpu.memory_space<semaphore_mem>> -> memref<1x!tpu.dma_semaphore, #tpu.memory_space<semaphore_mem>>
    %130 = tpu.memref_squeeze %129 : memref<1x!tpu.dma_semaphore, #tpu.memory_space<semaphore_mem>> -> memref<!tpu.dma_semaphore, #tpu.memory_space<semaphore_mem>>
    tpu.enqueue_dma source(%126 : memref<128xf32, #tpu.memory_space<any>>) target(%128 : memref<128xf32, #tpu.memory_space<vmem>>) target_semaphore(%130 : memref<!tpu.dma_semaphore, #tpu.memory_space<semaphore_mem>>)
    %c8_i32_66 = arith.constant 8 : i32
    %131 = arith.addi %c8_i32_66, %0 : i32
    %c5_i32_67 = arith.constant 5 : i32
    %132 = arith.addi %131, %c5_i32_67 : i32
    %133 = arith.index_cast %132 : i32 to index
    %134 = memref.load %arg1[%133] : memref<64xi32, #tpu.memory_space<smem>>
    %c13_i32 = arith.constant 13 : i32
    %c0_i32_68 = arith.constant 0 : i32
    %c0_i32_69 = arith.constant 0 : i32
    %135 = tpu.memref_slice %arg2[%134, %c0_i32_69] : memref<16x128xf32, #tpu.memory_space<any>> -> memref<1x128xf32, #tpu.memory_space<any>>
    %136 = tpu.memref_squeeze %135 : memref<1x128xf32, #tpu.memory_space<any>> -> memref<128xf32, #tpu.memory_space<any>>
    %c0_i32_70 = arith.constant 0 : i32
    %137 = tpu.memref_slice %arg6[%c13_i32, %c0_i32_70] : memref<64x128xf32, #tpu.memory_space<vmem>> -> memref<1x128xf32, #tpu.memory_space<vmem>>
    %138 = tpu.memref_squeeze %137 : memref<1x128xf32, #tpu.memory_space<vmem>> -> memref<128xf32, #tpu.memory_space<vmem>>
    %139 = tpu.memref_slice %arg7[%c0_i32_68] : memref<1x!tpu.dma_semaphore, #tpu.memory_space<semaphore_mem>> -> memref<1x!tpu.dma_semaphore, #tpu.memory_space<semaphore_mem>>
    %140 = tpu.memref_squeeze %139 : memref<1x!tpu.dma_semaphore, #tpu.memory_space<semaphore_mem>> -> memref<!tpu.dma_semaphore, #tpu.memory_space<semaphore_mem>>
    tpu.enqueue_dma source(%136 : memref<128xf32, #tpu.memory_space<any>>) target(%138 : memref<128xf32, #tpu.memory_space<vmem>>) target_semaphore(%140 : memref<!tpu.dma_semaphore, #tpu.memory_space<semaphore_mem>>)
    %c8_i32_71 = arith.constant 8 : i32
    %141 = arith.addi %c8_i32_71, %0 : i32
    %c6_i32_72 = arith.constant 6 : i32
    %142 = arith.addi %141, %c6_i32_72 : i32
    %143 = arith.index_cast %142 : i32 to index
    %144 = memref.load %arg1[%143] : memref<64xi32, #tpu.memory_space<smem>>
    %c14_i32 = arith.constant 14 : i32
    %c0_i32_73 = arith.constant 0 : i32
    %c0_i32_74 = arith.constant 0 : i32
    %145 = tpu.memref_slice %arg2[%144, %c0_i32_74] : memref<16x128xf32, #tpu.memory_space<any>> -> memref<1x128xf32, #tpu.memory_space<any>>
    %146 = tpu.memref_squeeze %145 : memref<1x128xf32, #tpu.memory_space<any>> -> memref<128xf32, #tpu.memory_space<any>>
    %c0_i32_75 = arith.constant 0 : i32
    %147 = tpu.memref_slice %arg6[%c14_i32, %c0_i32_75] : memref<64x128xf32, #tpu.memory_space<vmem>> -> memref<1x128xf32, #tpu.memory_space<vmem>>
    %148 = tpu.memref_squeeze %147 : memref<1x128xf32, #tpu.memory_space<vmem>> -> memref<128xf32, #tpu.memory_space<vmem>>
    %149 = tpu.memref_slice %arg7[%c0_i32_73] : memref<1x!tpu.dma_semaphore, #tpu.memory_space<semaphore_mem>> -> memref<1x!tpu.dma_semaphore, #tpu.memory_space<semaphore_mem>>
    %150 = tpu.memref_squeeze %149 : memref<1x!tpu.dma_semaphore, #tpu.memory_space<semaphore_mem>> -> memref<!tpu.dma_semaphore, #tpu.memory_space<semaphore_mem>>
    tpu.enqueue_dma source(%146 : memref<128xf32, #tpu.memory_space<any>>) target(%148 : memref<128xf32, #tpu.memory_space<vmem>>) target_semaphore(%150 : memref<!tpu.dma_semaphore, #tpu.memory_space<semaphore_mem>>)
    %c8_i32_76 = arith.constant 8 : i32
    %151 = arith.addi %c8_i32_76, %0 : i32
    %c7_i32_77 = arith.constant 7 : i32
    %152 = arith.addi %151, %c7_i32_77 : i32
    %153 = arith.index_cast %152 : i32 to index
    %154 = memref.load %arg1[%153] : memref<64xi32, #tpu.memory_space<smem>>
    %c15_i32 = arith.constant 15 : i32
    %c0_i32_78 = arith.constant 0 : i32
    %c0_i32_79 = arith.constant 0 : i32
    %155 = tpu.memref_slice %arg2[%154, %c0_i32_79] : memref<16x128xf32, #tpu.memory_space<any>> -> memref<1x128xf32, #tpu.memory_space<any>>
    %156 = tpu.memref_squeeze %155 : memref<1x128xf32, #tpu.memory_space<any>> -> memref<128xf32, #tpu.memory_space<any>>
    %c0_i32_80 = arith.constant 0 : i32
    %157 = tpu.memref_slice %arg6[%c15_i32, %c0_i32_80] : memref<64x128xf32, #tpu.memory_space<vmem>> -> memref<1x128xf32, #tpu.memory_space<vmem>>
    %158 = tpu.memref_squeeze %157 : memref<1x128xf32, #tpu.memory_space<vmem>> -> memref<128xf32, #tpu.memory_space<vmem>>
    %159 = tpu.memref_slice %arg7[%c0_i32_78] : memref<1x!tpu.dma_semaphore, #tpu.memory_space<semaphore_mem>> -> memref<1x!tpu.dma_semaphore, #tpu.memory_space<semaphore_mem>>
    %160 = tpu.memref_squeeze %159 : memref<1x!tpu.dma_semaphore, #tpu.memory_space<semaphore_mem>> -> memref<!tpu.dma_semaphore, #tpu.memory_space<semaphore_mem>>
    tpu.enqueue_dma source(%156 : memref<128xf32, #tpu.memory_space<any>>) target(%158 : memref<128xf32, #tpu.memory_space<vmem>>) target_semaphore(%160 : memref<!tpu.dma_semaphore, #tpu.memory_space<semaphore_mem>>)
    %c16_i32 = arith.constant 16 : i32
    %161 = arith.addi %c16_i32, %0 : i32
    %c0_i32_81 = arith.constant 0 : i32
    %162 = arith.addi %161, %c0_i32_81 : i32
    %163 = arith.index_cast %162 : i32 to index
    %164 = memref.load %arg1[%163] : memref<64xi32, #tpu.memory_space<smem>>
    %c16_i32_82 = arith.constant 16 : i32
    %c0_i32_83 = arith.constant 0 : i32
    %c0_i32_84 = arith.constant 0 : i32
    %165 = tpu.memref_slice %arg2[%164, %c0_i32_84] : memref<16x128xf32, #tpu.memory_space<any>> -> memref<1x128xf32, #tpu.memory_space<any>>
    %166 = tpu.memref_squeeze %165 : memref<1x128xf32, #tpu.memory_space<any>> -> memref<128xf32, #tpu.memory_space<any>>
    %c0_i32_85 = arith.constant 0 : i32
    %167 = tpu.memref_slice %arg6[%c16_i32_82, %c0_i32_85] : memref<64x128xf32, #tpu.memory_space<vmem>> -> memref<1x128xf32, #tpu.memory_space<vmem>>
    %168 = tpu.memref_squeeze %167 : memref<1x128xf32, #tpu.memory_space<vmem>> -> memref<128xf32, #tpu.memory_space<vmem>>
    %169 = tpu.memref_slice %arg7[%c0_i32_83] : memref<1x!tpu.dma_semaphore, #tpu.memory_space<semaphore_mem>> -> memref<1x!tpu.dma_semaphore, #tpu.memory_space<semaphore_mem>>
    %170 = tpu.memref_squeeze %169 : memref<1x!tpu.dma_semaphore, #tpu.memory_space<semaphore_mem>> -> memref<!tpu.dma_semaphore, #tpu.memory_space<semaphore_mem>>
    tpu.enqueue_dma source(%166 : memref<128xf32, #tpu.memory_space<any>>) target(%168 : memref<128xf32, #tpu.memory_space<vmem>>) target_semaphore(%170 : memref<!tpu.dma_semaphore, #tpu.memory_space<semaphore_mem>>)
    %c16_i32_86 = arith.constant 16 : i32
    %171 = arith.addi %c16_i32_86, %0 : i32
    %c1_i32_87 = arith.constant 1 : i32
    %172 = arith.addi %171, %c1_i32_87 : i32
    %173 = arith.index_cast %172 : i32 to index
    %174 = memref.load %arg1[%173] : memref<64xi32, #tpu.memory_space<smem>>
    %c17_i32 = arith.constant 17 : i32
    %c0_i32_88 = arith.constant 0 : i32
    %c0_i32_89 = arith.constant 0 : i32
    %175 = tpu.memref_slice %arg2[%174, %c0_i32_89] : memref<16x128xf32, #tpu.memory_space<any>> -> memref<1x128xf32, #tpu.memory_space<any>>
    %176 = tpu.memref_squeeze %175 : memref<1x128xf32, #tpu.memory_space<any>> -> memref<128xf32, #tpu.memory_space<any>>
    %c0_i32_90 = arith.constant 0 : i32
    %177 = tpu.memref_slice %arg6[%c17_i32, %c0_i32_90] : memref<64x128xf32, #tpu.memory_space<vmem>> -> memref<1x128xf32, #tpu.memory_space<vmem>>
    %178 = tpu.memref_squeeze %177 : memref<1x128xf32, #tpu.memory_space<vmem>> -> memref<128xf32, #tpu.memory_space<vmem>>
    %179 = tpu.memref_slice %arg7[%c0_i32_88] : memref<1x!tpu.dma_semaphore, #tpu.memory_space<semaphore_mem>> -> memref<1x!tpu.dma_semaphore, #tpu.memory_space<semaphore_mem>>
    %180 = tpu.memref_squeeze %179 : memref<1x!tpu.dma_semaphore, #tpu.memory_space<semaphore_mem>> -> memref<!tpu.dma_semaphore, #tpu.memory_space<semaphore_mem>>
    tpu.enqueue_dma source(%176 : memref<128xf32, #tpu.memory_space<any>>) target(%178 : memref<128xf32, #tpu.memory_space<vmem>>) target_semaphore(%180 : memref<!tpu.dma_semaphore, #tpu.memory_space<semaphore_mem>>)
    %c16_i32_91 = arith.constant 16 : i32
    %181 = arith.addi %c16_i32_91, %0 : i32
    %c2_i32_92 = arith.constant 2 : i32
    %182 = arith.addi %181, %c2_i32_92 : i32
    %183 = arith.index_cast %182 : i32 to index
    %184 = memref.load %arg1[%183] : memref<64xi32, #tpu.memory_space<smem>>
    %c18_i32 = arith.constant 18 : i32
    %c0_i32_93 = arith.constant 0 : i32
    %c0_i32_94 = arith.constant 0 : i32
    %185 = tpu.memref_slice %arg2[%184, %c0_i32_94] : memref<16x128xf32, #tpu.memory_space<any>> -> memref<1x128xf32, #tpu.memory_space<any>>
    %186 = tpu.memref_squeeze %185 : memref<1x128xf32, #tpu.memory_space<any>> -> memref<128xf32, #tpu.memory_space<any>>
    %c0_i32_95 = arith.constant 0 : i32
    %187 = tpu.memref_slice %arg6[%c18_i32, %c0_i32_95] : memref<64x128xf32, #tpu.memory_space<vmem>> -> memref<1x128xf32, #tpu.memory_space<vmem>>
    %188 = tpu.memref_squeeze %187 : memref<1x128xf32, #tpu.memory_space<vmem>> -> memref<128xf32, #tpu.memory_space<vmem>>
    %189 = tpu.memref_slice %arg7[%c0_i32_93] : memref<1x!tpu.dma_semaphore, #tpu.memory_space<semaphore_mem>> -> memref<1x!tpu.dma_semaphore, #tpu.memory_space<semaphore_mem>>
    %190 = tpu.memref_squeeze %189 : memref<1x!tpu.dma_semaphore, #tpu.memory_space<semaphore_mem>> -> memref<!tpu.dma_semaphore, #tpu.memory_space<semaphore_mem>>
    tpu.enqueue_dma source(%186 : memref<128xf32, #tpu.memory_space<any>>) target(%188 : memref<128xf32, #tpu.memory_space<vmem>>) target_semaphore(%190 : memref<!tpu.dma_semaphore, #tpu.memory_space<semaphore_mem>>)
    %c16_i32_96 = arith.constant 16 : i32
    %191 = arith.addi %c16_i32_96, %0 : i32
    %c3_i32_97 = arith.constant 3 : i32
    %192 = arith.addi %191, %c3_i32_97 : i32
    %193 = arith.index_cast %192 : i32 to index
    %194 = memref.load %arg1[%193] : memref<64xi32, #tpu.memory_space<smem>>
    %c19_i32 = arith.constant 19 : i32
    %c0_i32_98 = arith.constant 0 : i32
    %c0_i32_99 = arith.constant 0 : i32
    %195 = tpu.memref_slice %arg2[%194, %c0_i32_99] : memref<16x128xf32, #tpu.memory_space<any>> -> memref<1x128xf32, #tpu.memory_space<any>>
    %196 = tpu.memref_squeeze %195 : memref<1x128xf32, #tpu.memory_space<any>> -> memref<128xf32, #tpu.memory_space<any>>
    %c0_i32_100 = arith.constant 0 : i32
    %197 = tpu.memref_slice %arg6[%c19_i32, %c0_i32_100] : memref<64x128xf32, #tpu.memory_space<vmem>> -> memref<1x128xf32, #tpu.memory_space<vmem>>
    %198 = tpu.memref_squeeze %197 : memref<1x128xf32, #tpu.memory_space<vmem>> -> memref<128xf32, #tpu.memory_space<vmem>>
    %199 = tpu.memref_slice %arg7[%c0_i32_98] : memref<1x!tpu.dma_semaphore, #tpu.memory_space<semaphore_mem>> -> memref<1x!tpu.dma_semaphore, #tpu.memory_space<semaphore_mem>>
    %200 = tpu.memref_squeeze %199 : memref<1x!tpu.dma_semaphore, #tpu.memory_space<semaphore_mem>> -> memref<!tpu.dma_semaphore, #tpu.memory_space<semaphore_mem>>
    tpu.enqueue_dma source(%196 : memref<128xf32, #tpu.memory_space<any>>) target(%198 : memref<128xf32, #tpu.memory_space<vmem>>) target_semaphore(%200 : memref<!tpu.dma_semaphore, #tpu.memory_space<semaphore_mem>>)
    %c16_i32_101 = arith.constant 16 : i32
    %201 = arith.addi %c16_i32_101, %0 : i32
    %c4_i32_102 = arith.constant 4 : i32
    %202 = arith.addi %201, %c4_i32_102 : i32
    %203 = arith.index_cast %202 : i32 to index
    %204 = memref.load %arg1[%203] : memref<64xi32, #tpu.memory_space<smem>>
    %c20_i32 = arith.constant 20 : i32
    %c0_i32_103 = arith.constant 0 : i32
    %c0_i32_104 = arith.constant 0 : i32
    %205 = tpu.memref_slice %arg2[%204, %c0_i32_104] : memref<16x128xf32, #tpu.memory_space<any>> -> memref<1x128xf32, #tpu.memory_space<any>>
    %206 = tpu.memref_squeeze %205 : memref<1x128xf32, #tpu.memory_space<any>> -> memref<128xf32, #tpu.memory_space<any>>
    %c0_i32_105 = arith.constant 0 : i32
    %207 = tpu.memref_slice %arg6[%c20_i32, %c0_i32_105] : memref<64x128xf32, #tpu.memory_space<vmem>> -> memref<1x128xf32, #tpu.memory_space<vmem>>
    %208 = tpu.memref_squeeze %207 : memref<1x128xf32, #tpu.memory_space<vmem>> -> memref<128xf32, #tpu.memory_space<vmem>>
    %209 = tpu.memref_slice %arg7[%c0_i32_103] : memref<1x!tpu.dma_semaphore, #tpu.memory_space<semaphore_mem>> -> memref<1x!tpu.dma_semaphore, #tpu.memory_space<semaphore_mem>>
    %210 = tpu.memref_squeeze %209 : memref<1x!tpu.dma_semaphore, #tpu.memory_space<semaphore_mem>> -> memref<!tpu.dma_semaphore, #tpu.memory_space<semaphore_mem>>
    tpu.enqueue_dma source(%206 : memref<128xf32, #tpu.memory_space<any>>) target(%208 : memref<128xf32, #tpu.memory_space<vmem>>) target_semaphore(%210 : memref<!tpu.dma_semaphore, #tpu.memory_space<semaphore_mem>>)
    %c16_i32_106 = arith.constant 16 : i32
    %211 = arith.addi %c16_i32_106, %0 : i32
    %c5_i32_107 = arith.constant 5 : i32
    %212 = arith.addi %211, %c5_i32_107 : i32
    %213 = arith.index_cast %212 : i32 to index
    %214 = memref.load %arg1[%213] : memref<64xi32, #tpu.memory_space<smem>>
    %c21_i32 = arith.constant 21 : i32
    %c0_i32_108 = arith.constant 0 : i32
    %c0_i32_109 = arith.constant 0 : i32
    %215 = tpu.memref_slice %arg2[%214, %c0_i32_109] : memref<16x128xf32, #tpu.memory_space<any>> -> memref<1x128xf32, #tpu.memory_space<any>>
    %216 = tpu.memref_squeeze %215 : memref<1x128xf32, #tpu.memory_space<any>> -> memref<128xf32, #tpu.memory_space<any>>
    %c0_i32_110 = arith.constant 0 : i32
    %217 = tpu.memref_slice %arg6[%c21_i32, %c0_i32_110] : memref<64x128xf32, #tpu.memory_space<vmem>> -> memref<1x128xf32, #tpu.memory_space<vmem>>
    %218 = tpu.memref_squeeze %217 : memref<1x128xf32, #tpu.memory_space<vmem>> -> memref<128xf32, #tpu.memory_space<vmem>>
    %219 = tpu.memref_slice %arg7[%c0_i32_108] : memref<1x!tpu.dma_semaphore, #tpu.memory_space<semaphore_mem>> -> memref<1x!tpu.dma_semaphore, #tpu.memory_space<semaphore_mem>>
    %220 = tpu.memref_squeeze %219 : memref<1x!tpu.dma_semaphore, #tpu.memory_space<semaphore_mem>> -> memref<!tpu.dma_semaphore, #tpu.memory_space<semaphore_mem>>
    tpu.enqueue_dma source(%216 : memref<128xf32, #tpu.memory_space<any>>) target(%218 : memref<128xf32, #tpu.memory_space<vmem>>) target_semaphore(%220 : memref<!tpu.dma_semaphore, #tpu.memory_space<semaphore_mem>>)
    %c16_i32_111 = arith.constant 16 : i32
    %221 = arith.addi %c16_i32_111, %0 : i32
    %c6_i32_112 = arith.constant 6 : i32
    %222 = arith.addi %221, %c6_i32_112 : i32
    %223 = arith.index_cast %222 : i32 to index
    %224 = memref.load %arg1[%223] : memref<64xi32, #tpu.memory_space<smem>>
    %c22_i32 = arith.constant 22 : i32
    %c0_i32_113 = arith.constant 0 : i32
    %c0_i32_114 = arith.constant 0 : i32
    %225 = tpu.memref_slice %arg2[%224, %c0_i32_114] : memref<16x128xf32, #tpu.memory_space<any>> -> memref<1x128xf32, #tpu.memory_space<any>>
    %226 = tpu.memref_squeeze %225 : memref<1x128xf32, #tpu.memory_space<any>> -> memref<128xf32, #tpu.memory_space<any>>
    %c0_i32_115 = arith.constant 0 : i32
    %227 = tpu.memref_slice %arg6[%c22_i32, %c0_i32_115] : memref<64x128xf32, #tpu.memory_space<vmem>> -> memref<1x128xf32, #tpu.memory_space<vmem>>
    %228 = tpu.memref_squeeze %227 : memref<1x128xf32, #tpu.memory_space<vmem>> -> memref<128xf32, #tpu.memory_space<vmem>>
    %229 = tpu.memref_slice %arg7[%c0_i32_113] : memref<1x!tpu.dma_semaphore, #tpu.memory_space<semaphore_mem>> -> memref<1x!tpu.dma_semaphore, #tpu.memory_space<semaphore_mem>>
    %230 = tpu.memref_squeeze %229 : memref<1x!tpu.dma_semaphore, #tpu.memory_space<semaphore_mem>> -> memref<!tpu.dma_semaphore, #tpu.memory_space<semaphore_mem>>
    tpu.enqueue_dma source(%226 : memref<128xf32, #tpu.memory_space<any>>) target(%228 : memref<128xf32, #tpu.memory_space<vmem>>) target_semaphore(%230 : memref<!tpu.dma_semaphore, #tpu.memory_space<semaphore_mem>>)
    %c16_i32_116 = arith.constant 16 : i32
    %231 = arith.addi %c16_i32_116, %0 : i32
    %c7_i32_117 = arith.constant 7 : i32
    %232 = arith.addi %231, %c7_i32_117 : i32
    %233 = arith.index_cast %232 : i32 to index
    %234 = memref.load %arg1[%233] : memref<64xi32, #tpu.memory_space<smem>>
    %c23_i32 = arith.constant 23 : i32
    %c0_i32_118 = arith.constant 0 : i32
    %c0_i32_119 = arith.constant 0 : i32
    %235 = tpu.memref_slice %arg2[%234, %c0_i32_119] : memref<16x128xf32, #tpu.memory_space<any>> -> memref<1x128xf32, #tpu.memory_space<any>>
    %236 = tpu.memref_squeeze %235 : memref<1x128xf32, #tpu.memory_space<any>> -> memref<128xf32, #tpu.memory_space<any>>
    %c0_i32_120 = arith.constant 0 : i32
    %237 = tpu.memref_slice %arg6[%c23_i32, %c0_i32_120] : memref<64x128xf32, #tpu.memory_space<vmem>> -> memref<1x128xf32, #tpu.memory_space<vmem>>
    %238 = tpu.memref_squeeze %237 : memref<1x128xf32, #tpu.memory_space<vmem>> -> memref<128xf32, #tpu.memory_space<vmem>>
    %239 = tpu.memref_slice %arg7[%c0_i32_118] : memref<1x!tpu.dma_semaphore, #tpu.memory_space<semaphore_mem>> -> memref<1x!tpu.dma_semaphore, #tpu.memory_space<semaphore_mem>>
    %240 = tpu.memref_squeeze %239 : memref<1x!tpu.dma_semaphore, #tpu.memory_space<semaphore_mem>> -> memref<!tpu.dma_semaphore, #tpu.memory_space<semaphore_mem>>
    tpu.enqueue_dma source(%236 : memref<128xf32, #tpu.memory_space<any>>) target(%238 : memref<128xf32, #tpu.memory_space<vmem>>) target_semaphore(%240 : memref<!tpu.dma_semaphore, #tpu.memory_space<semaphore_mem>>)
    %c24_i32 = arith.constant 24 : i32
    %241 = arith.addi %c24_i32, %0 : i32
    %c0_i32_121 = arith.constant 0 : i32
    %242 = arith.addi %241, %c0_i32_121 : i32
    %243 = arith.index_cast %242 : i32 to index
    %244 = memref.load %arg1[%243] : memref<64xi32, #tpu.memory_space<smem>>
    %c24_i32_122 = arith.constant 24 : i32
    %c0_i32_123 = arith.constant 0 : i32
    %c0_i32_124 = arith.constant 0 : i32
    %245 = tpu.memref_slice %arg2[%244, %c0_i32_124] : memref<16x128xf32, #tpu.memory_space<any>> -> memref<1x128xf32, #tpu.memory_space<any>>
    %246 = tpu.memref_squeeze %245 : memref<1x128xf32, #tpu.memory_space<any>> -> memref<128xf32, #tpu.memory_space<any>>
    %c0_i32_125 = arith.constant 0 : i32
    %247 = tpu.memref_slice %arg6[%c24_i32_122, %c0_i32_125] : memref<64x128xf32, #tpu.memory_space<vmem>> -> memref<1x128xf32, #tpu.memory_space<vmem>>
    %248 = tpu.memref_squeeze %247 : memref<1x128xf32, #tpu.memory_space<vmem>> -> memref<128xf32, #tpu.memory_space<vmem>>
    %249 = tpu.memref_slice %arg7[%c0_i32_123] : memref<1x!tpu.dma_semaphore, #tpu.memory_space<semaphore_mem>> -> memref<1x!tpu.dma_semaphore, #tpu.memory_space<semaphore_mem>>
    %250 = tpu.memref_squeeze %249 : memref<1x!tpu.dma_semaphore, #tpu.memory_space<semaphore_mem>> -> memref<!tpu.dma_semaphore, #tpu.memory_space<semaphore_mem>>
    tpu.enqueue_dma source(%246 : memref<128xf32, #tpu.memory_space<any>>) target(%248 : memref<128xf32, #tpu.memory_space<vmem>>) target_semaphore(%250 : memref<!tpu.dma_semaphore, #tpu.memory_space<semaphore_mem>>)
    %c24_i32_126 = arith.constant 24 : i32
    %251 = arith.addi %c24_i32_126, %0 : i32
    %c1_i32_127 = arith.constant 1 : i32
    %252 = arith.addi %251, %c1_i32_127 : i32
    %253 = arith.index_cast %252 : i32 to index
    %254 = memref.load %arg1[%253] : memref<64xi32, #tpu.memory_space<smem>>
    %c25_i32 = arith.constant 25 : i32
    %c0_i32_128 = arith.constant 0 : i32
    %c0_i32_129 = arith.constant 0 : i32
    %255 = tpu.memref_slice %arg2[%254, %c0_i32_129] : memref<16x128xf32, #tpu.memory_space<any>> -> memref<1x128xf32, #tpu.memory_space<any>>
    %256 = tpu.memref_squeeze %255 : memref<1x128xf32, #tpu.memory_space<any>> -> memref<128xf32, #tpu.memory_space<any>>
    %c0_i32_130 = arith.constant 0 : i32
    %257 = tpu.memref_slice %arg6[%c25_i32, %c0_i32_130] : memref<64x128xf32, #tpu.memory_space<vmem>> -> memref<1x128xf32, #tpu.memory_space<vmem>>
    %258 = tpu.memref_squeeze %257 : memref<1x128xf32, #tpu.memory_space<vmem>> -> memref<128xf32, #tpu.memory_space<vmem>>
    %259 = tpu.memref_slice %arg7[%c0_i32_128] : memref<1x!tpu.dma_semaphore, #tpu.memory_space<semaphore_mem>> -> memref<1x!tpu.dma_semaphore, #tpu.memory_space<semaphore_mem>>
    %260 = tpu.memref_squeeze %259 : memref<1x!tpu.dma_semaphore, #tpu.memory_space<semaphore_mem>> -> memref<!tpu.dma_semaphore, #tpu.memory_space<semaphore_mem>>
    tpu.enqueue_dma source(%256 : memref<128xf32, #tpu.memory_space<any>>) target(%258 : memref<128xf32, #tpu.memory_space<vmem>>) target_semaphore(%260 : memref<!tpu.dma_semaphore, #tpu.memory_space<semaphore_mem>>)
    %c24_i32_131 = arith.constant 24 : i32
    %261 = arith.addi %c24_i32_131, %0 : i32
    %c2_i32_132 = arith.constant 2 : i32
    %262 = arith.addi %261, %c2_i32_132 : i32
    %263 = arith.index_cast %262 : i32 to index
    %264 = memref.load %arg1[%263] : memref<64xi32, #tpu.memory_space<smem>>
    %c26_i32 = arith.constant 26 : i32
    %c0_i32_133 = arith.constant 0 : i32
    %c0_i32_134 = arith.constant 0 : i32
    %265 = tpu.memref_slice %arg2[%264, %c0_i32_134] : memref<16x128xf32, #tpu.memory_space<any>> -> memref<1x128xf32, #tpu.memory_space<any>>
    %266 = tpu.memref_squeeze %265 : memref<1x128xf32, #tpu.memory_space<any>> -> memref<128xf32, #tpu.memory_space<any>>
    %c0_i32_135 = arith.constant 0 : i32
    %267 = tpu.memref_slice %arg6[%c26_i32, %c0_i32_135] : memref<64x128xf32, #tpu.memory_space<vmem>> -> memref<1x128xf32, #tpu.memory_space<vmem>>
    %268 = tpu.memref_squeeze %267 : memref<1x128xf32, #tpu.memory_space<vmem>> -> memref<128xf32, #tpu.memory_space<vmem>>
    %269 = tpu.memref_slice %arg7[%c0_i32_133] : memref<1x!tpu.dma_semaphore, #tpu.memory_space<semaphore_mem>> -> memref<1x!tpu.dma_semaphore, #tpu.memory_space<semaphore_mem>>
    %270 = tpu.memref_squeeze %269 : memref<1x!tpu.dma_semaphore, #tpu.memory_space<semaphore_mem>> -> memref<!tpu.dma_semaphore, #tpu.memory_space<semaphore_mem>>
    tpu.enqueue_dma source(%266 : memref<128xf32, #tpu.memory_space<any>>) target(%268 : memref<128xf32, #tpu.memory_space<vmem>>) target_semaphore(%270 : memref<!tpu.dma_semaphore, #tpu.memory_space<semaphore_mem>>)
    %c24_i32_136 = arith.constant 24 : i32
    %271 = arith.addi %c24_i32_136, %0 : i32
    %c3_i32_137 = arith.constant 3 : i32
    %272 = arith.addi %271, %c3_i32_137 : i32
    %273 = arith.index_cast %272 : i32 to index
    %274 = memref.load %arg1[%273] : memref<64xi32, #tpu.memory_space<smem>>
    %c27_i32 = arith.constant 27 : i32
    %c0_i32_138 = arith.constant 0 : i32
    %c0_i32_139 = arith.constant 0 : i32
    %275 = tpu.memref_slice %arg2[%274, %c0_i32_139] : memref<16x128xf32, #tpu.memory_space<any>> -> memref<1x128xf32, #tpu.memory_space<any>>
    %276 = tpu.memref_squeeze %275 : memref<1x128xf32, #tpu.memory_space<any>> -> memref<128xf32, #tpu.memory_space<any>>
    %c0_i32_140 = arith.constant 0 : i32
    %277 = tpu.memref_slice %arg6[%c27_i32, %c0_i32_140] : memref<64x128xf32, #tpu.memory_space<vmem>> -> memref<1x128xf32, #tpu.memory_space<vmem>>
    %278 = tpu.memref_squeeze %277 : memref<1x128xf32, #tpu.memory_space<vmem>> -> memref<128xf32, #tpu.memory_space<vmem>>
    %279 = tpu.memref_slice %arg7[%c0_i32_138] : memref<1x!tpu.dma_semaphore, #tpu.memory_space<semaphore_mem>> -> memref<1x!tpu.dma_semaphore, #tpu.memory_space<semaphore_mem>>
    %280 = tpu.memref_squeeze %279 : memref<1x!tpu.dma_semaphore, #tpu.memory_space<semaphore_mem>> -> memref<!tpu.dma_semaphore, #tpu.memory_space<semaphore_mem>>
    tpu.enqueue_dma source(%276 : memref<128xf32, #tpu.memory_space<any>>) target(%278 : memref<128xf32, #tpu.memory_space<vmem>>) target_semaphore(%280 : memref<!tpu.dma_semaphore, #tpu.memory_space<semaphore_mem>>)
    %c24_i32_141 = arith.constant 24 : i32
    %281 = arith.addi %c24_i32_141, %0 : i32
    %c4_i32_142 = arith.constant 4 : i32
    %282 = arith.addi %281, %c4_i32_142 : i32
    %283 = arith.index_cast %282 : i32 to index
    %284 = memref.load %arg1[%283] : memref<64xi32, #tpu.memory_space<smem>>
    %c28_i32 = arith.constant 28 : i32
    %c0_i32_143 = arith.constant 0 : i32
    %c0_i32_144 = arith.constant 0 : i32
    %285 = tpu.memref_slice %arg2[%284, %c0_i32_144] : memref<16x128xf32, #tpu.memory_space<any>> -> memref<1x128xf32, #tpu.memory_space<any>>
    %286 = tpu.memref_squeeze %285 : memref<1x128xf32, #tpu.memory_space<any>> -> memref<128xf32, #tpu.memory_space<any>>
    %c0_i32_145 = arith.constant 0 : i32
    %287 = tpu.memref_slice %arg6[%c28_i32, %c0_i32_145] : memref<64x128xf32, #tpu.memory_space<vmem>> -> memref<1x128xf32, #tpu.memory_space<vmem>>
    %288 = tpu.memref_squeeze %287 : memref<1x128xf32, #tpu.memory_space<vmem>> -> memref<128xf32, #tpu.memory_space<vmem>>
    %289 = tpu.memref_slice %arg7[%c0_i32_143] : memref<1x!tpu.dma_semaphore, #tpu.memory_space<semaphore_mem>> -> memref<1x!tpu.dma_semaphore, #tpu.memory_space<semaphore_mem>>
    %290 = tpu.memref_squeeze %289 : memref<1x!tpu.dma_semaphore, #tpu.memory_space<semaphore_mem>> -> memref<!tpu.dma_semaphore, #tpu.memory_space<semaphore_mem>>
    tpu.enqueue_dma source(%286 : memref<128xf32, #tpu.memory_space<any>>) target(%288 : memref<128xf32, #tpu.memory_space<vmem>>) target_semaphore(%290 : memref<!tpu.dma_semaphore, #tpu.memory_space<semaphore_mem>>)
    %c24_i32_146 = arith.constant 24 : i32
    %291 = arith.addi %c24_i32_146, %0 : i32
    %c5_i32_147 = arith.constant 5 : i32
    %292 = arith.addi %291, %c5_i32_147 : i32
    %293 = arith.index_cast %292 : i32 to index
    %294 = memref.load %arg1[%293] : memref<64xi32, #tpu.memory_space<smem>>
    %c29_i32 = arith.constant 29 : i32
    %c0_i32_148 = arith.constant 0 : i32
    %c0_i32_149 = arith.constant 0 : i32
    %295 = tpu.memref_slice %arg2[%294, %c0_i32_149] : memref<16x128xf32, #tpu.memory_space<any>> -> memref<1x128xf32, #tpu.memory_space<any>>
    %296 = tpu.memref_squeeze %295 : memref<1x128xf32, #tpu.memory_space<any>> -> memref<128xf32, #tpu.memory_space<any>>
    %c0_i32_150 = arith.constant 0 : i32
    %297 = tpu.memref_slice %arg6[%c29_i32, %c0_i32_150] : memref<64x128xf32, #tpu.memory_space<vmem>> -> memref<1x128xf32, #tpu.memory_space<vmem>>
    %298 = tpu.memref_squeeze %297 : memref<1x128xf32, #tpu.memory_space<vmem>> -> memref<128xf32, #tpu.memory_space<vmem>>
    %299 = tpu.memref_slice %arg7[%c0_i32_148] : memref<1x!tpu.dma_semaphore, #tpu.memory_space<semaphore_mem>> -> memref<1x!tpu.dma_semaphore, #tpu.memory_space<semaphore_mem>>
    %300 = tpu.memref_squeeze %299 : memref<1x!tpu.dma_semaphore, #tpu.memory_space<semaphore_mem>> -> memref<!tpu.dma_semaphore, #tpu.memory_space<semaphore_mem>>
    tpu.enqueue_dma source(%296 : memref<128xf32, #tpu.memory_space<any>>) target(%298 : memref<128xf32, #tpu.memory_space<vmem>>) target_semaphore(%300 : memref<!tpu.dma_semaphore, #tpu.memory_space<semaphore_mem>>)
    %c24_i32_151 = arith.constant 24 : i32
    %301 = arith.addi %c24_i32_151, %0 : i32
    %c6_i32_152 = arith.constant 6 : i32
    %302 = arith.addi %301, %c6_i32_152 : i32
    %303 = arith.index_cast %302 : i32 to index
    %304 = memref.load %arg1[%303] : memref<64xi32, #tpu.memory_space<smem>>
    %c30_i32 = arith.constant 30 : i32
    %c0_i32_153 = arith.constant 0 : i32
    %c0_i32_154 = arith.constant 0 : i32
    %305 = tpu.memref_slice %arg2[%304, %c0_i32_154] : memref<16x128xf32, #tpu.memory_space<any>> -> memref<1x128xf32, #tpu.memory_space<any>>
    %306 = tpu.memref_squeeze %305 : memref<1x128xf32, #tpu.memory_space<any>> -> memref<128xf32, #tpu.memory_space<any>>
    %c0_i32_155 = arith.constant 0 : i32
    %307 = tpu.memref_slice %arg6[%c30_i32, %c0_i32_155] : memref<64x128xf32, #tpu.memory_space<vmem>> -> memref<1x128xf32, #tpu.memory_space<vmem>>
    %308 = tpu.memref_squeeze %307 : memref<1x128xf32, #tpu.memory_space<vmem>> -> memref<128xf32, #tpu.memory_space<vmem>>
    %309 = tpu.memref_slice %arg7[%c0_i32_153] : memref<1x!tpu.dma_semaphore, #tpu.memory_space<semaphore_mem>> -> memref<1x!tpu.dma_semaphore, #tpu.memory_space<semaphore_mem>>
    %310 = tpu.memref_squeeze %309 : memref<1x!tpu.dma_semaphore, #tpu.memory_space<semaphore_mem>> -> memref<!tpu.dma_semaphore, #tpu.memory_space<semaphore_mem>>
    tpu.enqueue_dma source(%306 : memref<128xf32, #tpu.memory_space<any>>) target(%308 : memref<128xf32, #tpu.memory_space<vmem>>) target_semaphore(%310 : memref<!tpu.dma_semaphore, #tpu.memory_space<semaphore_mem>>)
    %c24_i32_156 = arith.constant 24 : i32
    %311 = arith.addi %c24_i32_156, %0 : i32
    %c7_i32_157 = arith.constant 7 : i32
    %312 = arith.addi %311, %c7_i32_157 : i32
    %313 = arith.index_cast %312 : i32 to index
    %314 = memref.load %arg1[%313] : memref<64xi32, #tpu.memory_space<smem>>
    %c31_i32 = arith.constant 31 : i32
    %c0_i32_158 = arith.constant 0 : i32
    %c0_i32_159 = arith.constant 0 : i32
    %315 = tpu.memref_slice %arg2[%314, %c0_i32_159] : memref<16x128xf32, #tpu.memory_space<any>> -> memref<1x128xf32, #tpu.memory_space<any>>
    %316 = tpu.memref_squeeze %315 : memref<1x128xf32, #tpu.memory_space<any>> -> memref<128xf32, #tpu.memory_space<any>>
    %c0_i32_160 = arith.constant 0 : i32
    %317 = tpu.memref_slice %arg6[%c31_i32, %c0_i32_160] : memref<64x128xf32, #tpu.memory_space<vmem>> -> memref<1x128xf32, #tpu.memory_space<vmem>>
    %318 = tpu.memref_squeeze %317 : memref<1x128xf32, #tpu.memory_space<vmem>> -> memref<128xf32, #tpu.memory_space<vmem>>
    %319 = tpu.memref_slice %arg7[%c0_i32_158] : memref<1x!tpu.dma_semaphore, #tpu.memory_space<semaphore_mem>> -> memref<1x!tpu.dma_semaphore, #tpu.memory_space<semaphore_mem>>
    %320 = tpu.memref_squeeze %319 : memref<1x!tpu.dma_semaphore, #tpu.memory_space<semaphore_mem>> -> memref<!tpu.dma_semaphore, #tpu.memory_space<semaphore_mem>>
    tpu.enqueue_dma source(%316 : memref<128xf32, #tpu.memory_space<any>>) target(%318 : memref<128xf32, #tpu.memory_space<vmem>>) target_semaphore(%320 : memref<!tpu.dma_semaphore, #tpu.memory_space<semaphore_mem>>)
    %c32_i32 = arith.constant 32 : i32
    %321 = arith.addi %c32_i32, %0 : i32
    %c0_i32_161 = arith.constant 0 : i32
    %322 = arith.addi %321, %c0_i32_161 : i32
    %323 = arith.index_cast %322 : i32 to index
    %324 = memref.load %arg1[%323] : memref<64xi32, #tpu.memory_space<smem>>
    %c32_i32_162 = arith.constant 32 : i32
    %c0_i32_163 = arith.constant 0 : i32
    %c0_i32_164 = arith.constant 0 : i32
    %325 = tpu.memref_slice %arg2[%324, %c0_i32_164] : memref<16x128xf32, #tpu.memory_space<any>> -> memref<1x128xf32, #tpu.memory_space<any>>
    %326 = tpu.memref_squeeze %325 : memref<1x128xf32, #tpu.memory_space<any>> -> memref<128xf32, #tpu.memory_space<any>>
    %c0_i32_165 = arith.constant 0 : i32
    %327 = tpu.memref_slice %arg6[%c32_i32_162, %c0_i32_165] : memref<64x128xf32, #tpu.memory_space<vmem>> -> memref<1x128xf32, #tpu.memory_space<vmem>>
    %328 = tpu.memref_squeeze %327 : memref<1x128xf32, #tpu.memory_space<vmem>> -> memref<128xf32, #tpu.memory_space<vmem>>
    %329 = tpu.memref_slice %arg7[%c0_i32_163] : memref<1x!tpu.dma_semaphore, #tpu.memory_space<semaphore_mem>> -> memref<1x!tpu.dma_semaphore, #tpu.memory_space<semaphore_mem>>
    %330 = tpu.memref_squeeze %329 : memref<1x!tpu.dma_semaphore, #tpu.memory_space<semaphore_mem>> -> memref<!tpu.dma_semaphore, #tpu.memory_space<semaphore_mem>>
    tpu.enqueue_dma source(%326 : memref<128xf32, #tpu.memory_space<any>>) target(%328 : memref<128xf32, #tpu.memory_space<vmem>>) target_semaphore(%330 : memref<!tpu.dma_semaphore, #tpu.memory_space<semaphore_mem>>)
    %c32_i32_166 = arith.constant 32 : i32
    %331 = arith.addi %c32_i32_166, %0 : i32
    %c1_i32_167 = arith.constant 1 : i32
    %332 = arith.addi %331, %c1_i32_167 : i32
    %333 = arith.index_cast %332 : i32 to index
    %334 = memref.load %arg1[%333] : memref<64xi32, #tpu.memory_space<smem>>
    %c33_i32 = arith.constant 33 : i32
    %c0_i32_168 = arith.constant 0 : i32
    %c0_i32_169 = arith.constant 0 : i32
    %335 = tpu.memref_slice %arg2[%334, %c0_i32_169] : memref<16x128xf32, #tpu.memory_space<any>> -> memref<1x128xf32, #tpu.memory_space<any>>
    %336 = tpu.memref_squeeze %335 : memref<1x128xf32, #tpu.memory_space<any>> -> memref<128xf32, #tpu.memory_space<any>>
    %c0_i32_170 = arith.constant 0 : i32
    %337 = tpu.memref_slice %arg6[%c33_i32, %c0_i32_170] : memref<64x128xf32, #tpu.memory_space<vmem>> -> memref<1x128xf32, #tpu.memory_space<vmem>>
    %338 = tpu.memref_squeeze %337 : memref<1x128xf32, #tpu.memory_space<vmem>> -> memref<128xf32, #tpu.memory_space<vmem>>
    %339 = tpu.memref_slice %arg7[%c0_i32_168] : memref<1x!tpu.dma_semaphore, #tpu.memory_space<semaphore_mem>> -> memref<1x!tpu.dma_semaphore, #tpu.memory_space<semaphore_mem>>
    %340 = tpu.memref_squeeze %339 : memref<1x!tpu.dma_semaphore, #tpu.memory_space<semaphore_mem>> -> memref<!tpu.dma_semaphore, #tpu.memory_space<semaphore_mem>>
    tpu.enqueue_dma source(%336 : memref<128xf32, #tpu.memory_space<any>>) target(%338 : memref<128xf32, #tpu.memory_space<vmem>>) target_semaphore(%340 : memref<!tpu.dma_semaphore, #tpu.memory_space<semaphore_mem>>)
    %c32_i32_171 = arith.constant 32 : i32
    %341 = arith.addi %c32_i32_171, %0 : i32
    %c2_i32_172 = arith.constant 2 : i32
    %342 = arith.addi %341, %c2_i32_172 : i32
    %343 = arith.index_cast %342 : i32 to index
    %344 = memref.load %arg1[%343] : memref<64xi32, #tpu.memory_space<smem>>
    %c34_i32 = arith.constant 34 : i32
    %c0_i32_173 = arith.constant 0 : i32
    %c0_i32_174 = arith.constant 0 : i32
    %345 = tpu.memref_slice %arg2[%344, %c0_i32_174] : memref<16x128xf32, #tpu.memory_space<any>> -> memref<1x128xf32, #tpu.memory_space<any>>
    %346 = tpu.memref_squeeze %345 : memref<1x128xf32, #tpu.memory_space<any>> -> memref<128xf32, #tpu.memory_space<any>>
    %c0_i32_175 = arith.constant 0 : i32
    %347 = tpu.memref_slice %arg6[%c34_i32, %c0_i32_175] : memref<64x128xf32, #tpu.memory_space<vmem>> -> memref<1x128xf32, #tpu.memory_space<vmem>>
    %348 = tpu.memref_squeeze %347 : memref<1x128xf32, #tpu.memory_space<vmem>> -> memref<128xf32, #tpu.memory_space<vmem>>
    %349 = tpu.memref_slice %arg7[%c0_i32_173] : memref<1x!tpu.dma_semaphore, #tpu.memory_space<semaphore_mem>> -> memref<1x!tpu.dma_semaphore, #tpu.memory_space<semaphore_mem>>
    %350 = tpu.memref_squeeze %349 : memref<1x!tpu.dma_semaphore, #tpu.memory_space<semaphore_mem>> -> memref<!tpu.dma_semaphore, #tpu.memory_space<semaphore_mem>>
    tpu.enqueue_dma source(%346 : memref<128xf32, #tpu.memory_space<any>>) target(%348 : memref<128xf32, #tpu.memory_space<vmem>>) target_semaphore(%350 : memref<!tpu.dma_semaphore, #tpu.memory_space<semaphore_mem>>)
    %c32_i32_176 = arith.constant 32 : i32
    %351 = arith.addi %c32_i32_176, %0 : i32
    %c3_i32_177 = arith.constant 3 : i32
    %352 = arith.addi %351, %c3_i32_177 : i32
    %353 = arith.index_cast %352 : i32 to index
    %354 = memref.load %arg1[%353] : memref<64xi32, #tpu.memory_space<smem>>
    %c35_i32 = arith.constant 35 : i32
    %c0_i32_178 = arith.constant 0 : i32
    %c0_i32_179 = arith.constant 0 : i32
    %355 = tpu.memref_slice %arg2[%354, %c0_i32_179] : memref<16x128xf32, #tpu.memory_space<any>> -> memref<1x128xf32, #tpu.memory_space<any>>
    %356 = tpu.memref_squeeze %355 : memref<1x128xf32, #tpu.memory_space<any>> -> memref<128xf32, #tpu.memory_space<any>>
    %c0_i32_180 = arith.constant 0 : i32
    %357 = tpu.memref_slice %arg6[%c35_i32, %c0_i32_180] : memref<64x128xf32, #tpu.memory_space<vmem>> -> memref<1x128xf32, #tpu.memory_space<vmem>>
    %358 = tpu.memref_squeeze %357 : memref<1x128xf32, #tpu.memory_space<vmem>> -> memref<128xf32, #tpu.memory_space<vmem>>
    %359 = tpu.memref_slice %arg7[%c0_i32_178] : memref<1x!tpu.dma_semaphore, #tpu.memory_space<semaphore_mem>> -> memref<1x!tpu.dma_semaphore, #tpu.memory_space<semaphore_mem>>
    %360 = tpu.memref_squeeze %359 : memref<1x!tpu.dma_semaphore, #tpu.memory_space<semaphore_mem>> -> memref<!tpu.dma_semaphore, #tpu.memory_space<semaphore_mem>>
    tpu.enqueue_dma source(%356 : memref<128xf32, #tpu.memory_space<any>>) target(%358 : memref<128xf32, #tpu.memory_space<vmem>>) target_semaphore(%360 : memref<!tpu.dma_semaphore, #tpu.memory_space<semaphore_mem>>)
    %c32_i32_181 = arith.constant 32 : i32
    %361 = arith.addi %c32_i32_181, %0 : i32
    %c4_i32_182 = arith.constant 4 : i32
    %362 = arith.addi %361, %c4_i32_182 : i32
    %363 = arith.index_cast %362 : i32 to index
    %364 = memref.load %arg1[%363] : memref<64xi32, #tpu.memory_space<smem>>
    %c36_i32 = arith.constant 36 : i32
    %c0_i32_183 = arith.constant 0 : i32
    %c0_i32_184 = arith.constant 0 : i32
    %365 = tpu.memref_slice %arg2[%364, %c0_i32_184] : memref<16x128xf32, #tpu.memory_space<any>> -> memref<1x128xf32, #tpu.memory_space<any>>
    %366 = tpu.memref_squeeze %365 : memref<1x128xf32, #tpu.memory_space<any>> -> memref<128xf32, #tpu.memory_space<any>>
    %c0_i32_185 = arith.constant 0 : i32
    %367 = tpu.memref_slice %arg6[%c36_i32, %c0_i32_185] : memref<64x128xf32, #tpu.memory_space<vmem>> -> memref<1x128xf32, #tpu.memory_space<vmem>>
    %368 = tpu.memref_squeeze %367 : memref<1x128xf32, #tpu.memory_space<vmem>> -> memref<128xf32, #tpu.memory_space<vmem>>
    %369 = tpu.memref_slice %arg7[%c0_i32_183] : memref<1x!tpu.dma_semaphore, #tpu.memory_space<semaphore_mem>> -> memref<1x!tpu.dma_semaphore, #tpu.memory_space<semaphore_mem>>
    %370 = tpu.memref_squeeze %369 : memref<1x!tpu.dma_semaphore, #tpu.memory_space<semaphore_mem>> -> memref<!tpu.dma_semaphore, #tpu.memory_space<semaphore_mem>>
    tpu.enqueue_dma source(%366 : memref<128xf32, #tpu.memory_space<any>>) target(%368 : memref<128xf32, #tpu.memory_space<vmem>>) target_semaphore(%370 : memref<!tpu.dma_semaphore, #tpu.memory_space<semaphore_mem>>)
    %c32_i32_186 = arith.constant 32 : i32
    %371 = arith.addi %c32_i32_186, %0 : i32
    %c5_i32_187 = arith.constant 5 : i32
    %372 = arith.addi %371, %c5_i32_187 : i32
    %373 = arith.index_cast %372 : i32 to index
    %374 = memref.load %arg1[%373] : memref<64xi32, #tpu.memory_space<smem>>
    %c37_i32 = arith.constant 37 : i32
    %c0_i32_188 = arith.constant 0 : i32
    %c0_i32_189 = arith.constant 0 : i32
    %375 = tpu.memref_slice %arg2[%374, %c0_i32_189] : memref<16x128xf32, #tpu.memory_space<any>> -> memref<1x128xf32, #tpu.memory_space<any>>
    %376 = tpu.memref_squeeze %375 : memref<1x128xf32, #tpu.memory_space<any>> -> memref<128xf32, #tpu.memory_space<any>>
    %c0_i32_190 = arith.constant 0 : i32
    %377 = tpu.memref_slice %arg6[%c37_i32, %c0_i32_190] : memref<64x128xf32, #tpu.memory_space<vmem>> -> memref<1x128xf32, #tpu.memory_space<vmem>>
    %378 = tpu.memref_squeeze %377 : memref<1x128xf32, #tpu.memory_space<vmem>> -> memref<128xf32, #tpu.memory_space<vmem>>
    %379 = tpu.memref_slice %arg7[%c0_i32_188] : memref<1x!tpu.dma_semaphore, #tpu.memory_space<semaphore_mem>> -> memref<1x!tpu.dma_semaphore, #tpu.memory_space<semaphore_mem>>
    %380 = tpu.memref_squeeze %379 : memref<1x!tpu.dma_semaphore, #tpu.memory_space<semaphore_mem>> -> memref<!tpu.dma_semaphore, #tpu.memory_space<semaphore_mem>>
    tpu.enqueue_dma source(%376 : memref<128xf32, #tpu.memory_space<any>>) target(%378 : memref<128xf32, #tpu.memory_space<vmem>>) target_semaphore(%380 : memref<!tpu.dma_semaphore, #tpu.memory_space<semaphore_mem>>)
    %c32_i32_191 = arith.constant 32 : i32
    %381 = arith.addi %c32_i32_191, %0 : i32
    %c6_i32_192 = arith.constant 6 : i32
    %382 = arith.addi %381, %c6_i32_192 : i32
    %383 = arith.index_cast %382 : i32 to index
    %384 = memref.load %arg1[%383] : memref<64xi32, #tpu.memory_space<smem>>
    %c38_i32 = arith.constant 38 : i32
    %c0_i32_193 = arith.constant 0 : i32
    %c0_i32_194 = arith.constant 0 : i32
    %385 = tpu.memref_slice %arg2[%384, %c0_i32_194] : memref<16x128xf32, #tpu.memory_space<any>> -> memref<1x128xf32, #tpu.memory_space<any>>
    %386 = tpu.memref_squeeze %385 : memref<1x128xf32, #tpu.memory_space<any>> -> memref<128xf32, #tpu.memory_space<any>>
    %c0_i32_195 = arith.constant 0 : i32
    %387 = tpu.memref_slice %arg6[%c38_i32, %c0_i32_195] : memref<64x128xf32, #tpu.memory_space<vmem>> -> memref<1x128xf32, #tpu.memory_space<vmem>>
    %388 = tpu.memref_squeeze %387 : memref<1x128xf32, #tpu.memory_space<vmem>> -> memref<128xf32, #tpu.memory_space<vmem>>
    %389 = tpu.memref_slice %arg7[%c0_i32_193] : memref<1x!tpu.dma_semaphore, #tpu.memory_space<semaphore_mem>> -> memref<1x!tpu.dma_semaphore, #tpu.memory_space<semaphore_mem>>
    %390 = tpu.memref_squeeze %389 : memref<1x!tpu.dma_semaphore, #tpu.memory_space<semaphore_mem>> -> memref<!tpu.dma_semaphore, #tpu.memory_space<semaphore_mem>>
    tpu.enqueue_dma source(%386 : memref<128xf32, #tpu.memory_space<any>>) target(%388 : memref<128xf32, #tpu.memory_space<vmem>>) target_semaphore(%390 : memref<!tpu.dma_semaphore, #tpu.memory_space<semaphore_mem>>)
    %c32_i32_196 = arith.constant 32 : i32
    %391 = arith.addi %c32_i32_196, %0 : i32
    %c7_i32_197 = arith.constant 7 : i32
    %392 = arith.addi %391, %c7_i32_197 : i32
    %393 = arith.index_cast %392 : i32 to index
    %394 = memref.load %arg1[%393] : memref<64xi32, #tpu.memory_space<smem>>
    %c39_i32 = arith.constant 39 : i32
    %c0_i32_198 = arith.constant 0 : i32
    %c0_i32_199 = arith.constant 0 : i32
    %395 = tpu.memref_slice %arg2[%394, %c0_i32_199] : memref<16x128xf32, #tpu.memory_space<any>> -> memref<1x128xf32, #tpu.memory_space<any>>
    %396 = tpu.memref_squeeze %395 : memref<1x128xf32, #tpu.memory_space<any>> -> memref<128xf32, #tpu.memory_space<any>>
    %c0_i32_200 = arith.constant 0 : i32
    %397 = tpu.memref_slice %arg6[%c39_i32, %c0_i32_200] : memref<64x128xf32, #tpu.memory_space<vmem>> -> memref<1x128xf32, #tpu.memory_space<vmem>>
    %398 = tpu.memref_squeeze %397 : memref<1x128xf32, #tpu.memory_space<vmem>> -> memref<128xf32, #tpu.memory_space<vmem>>
    %399 = tpu.memref_slice %arg7[%c0_i32_198] : memref<1x!tpu.dma_semaphore, #tpu.memory_space<semaphore_mem>> -> memref<1x!tpu.dma_semaphore, #tpu.memory_space<semaphore_mem>>
    %400 = tpu.memref_squeeze %399 : memref<1x!tpu.dma_semaphore, #tpu.memory_space<semaphore_mem>> -> memref<!tpu.dma_semaphore, #tpu.memory_space<semaphore_mem>>
    tpu.enqueue_dma source(%396 : memref<128xf32, #tpu.memory_space<any>>) target(%398 : memref<128xf32, #tpu.memory_space<vmem>>) target_semaphore(%400 : memref<!tpu.dma_semaphore, #tpu.memory_space<semaphore_mem>>)
    %c40_i32 = arith.constant 40 : i32
    %401 = arith.addi %c40_i32, %0 : i32
    %c0_i32_201 = arith.constant 0 : i32
    %402 = arith.addi %401, %c0_i32_201 : i32
    %403 = arith.index_cast %402 : i32 to index
    %404 = memref.load %arg1[%403] : memref<64xi32, #tpu.memory_space<smem>>
    %c40_i32_202 = arith.constant 40 : i32
    %c0_i32_203 = arith.constant 0 : i32
    %c0_i32_204 = arith.constant 0 : i32
    %405 = tpu.memref_slice %arg2[%404, %c0_i32_204] : memref<16x128xf32, #tpu.memory_space<any>> -> memref<1x128xf32, #tpu.memory_space<any>>
    %406 = tpu.memref_squeeze %405 : memref<1x128xf32, #tpu.memory_space<any>> -> memref<128xf32, #tpu.memory_space<any>>
    %c0_i32_205 = arith.constant 0 : i32
    %407 = tpu.memref_slice %arg6[%c40_i32_202, %c0_i32_205] : memref<64x128xf32, #tpu.memory_space<vmem>> -> memref<1x128xf32, #tpu.memory_space<vmem>>
    %408 = tpu.memref_squeeze %407 : memref<1x128xf32, #tpu.memory_space<vmem>> -> memref<128xf32, #tpu.memory_space<vmem>>
    %409 = tpu.memref_slice %arg7[%c0_i32_203] : memref<1x!tpu.dma_semaphore, #tpu.memory_space<semaphore_mem>> -> memref<1x!tpu.dma_semaphore, #tpu.memory_space<semaphore_mem>>
    %410 = tpu.memref_squeeze %409 : memref<1x!tpu.dma_semaphore, #tpu.memory_space<semaphore_mem>> -> memref<!tpu.dma_semaphore, #tpu.memory_space<semaphore_mem>>
    tpu.enqueue_dma source(%406 : memref<128xf32, #tpu.memory_space<any>>) target(%408 : memref<128xf32, #tpu.memory_space<vmem>>) target_semaphore(%410 : memref<!tpu.dma_semaphore, #tpu.memory_space<semaphore_mem>>)
    %c40_i32_206 = arith.constant 40 : i32
    %411 = arith.addi %c40_i32_206, %0 : i32
    %c1_i32_207 = arith.constant 1 : i32
    %412 = arith.addi %411, %c1_i32_207 : i32
    %413 = arith.index_cast %412 : i32 to index
    %414 = memref.load %arg1[%413] : memref<64xi32, #tpu.memory_space<smem>>
    %c41_i32 = arith.constant 41 : i32
    %c0_i32_208 = arith.constant 0 : i32
    %c0_i32_209 = arith.constant 0 : i32
    %415 = tpu.memref_slice %arg2[%414, %c0_i32_209] : memref<16x128xf32, #tpu.memory_space<any>> -> memref<1x128xf32, #tpu.memory_space<any>>
    %416 = tpu.memref_squeeze %415 : memref<1x128xf32, #tpu.memory_space<any>> -> memref<128xf32, #tpu.memory_space<any>>
    %c0_i32_210 = arith.constant 0 : i32
    %417 = tpu.memref_slice %arg6[%c41_i32, %c0_i32_210] : memref<64x128xf32, #tpu.memory_space<vmem>> -> memref<1x128xf32, #tpu.memory_space<vmem>>
    %418 = tpu.memref_squeeze %417 : memref<1x128xf32, #tpu.memory_space<vmem>> -> memref<128xf32, #tpu.memory_space<vmem>>
    %419 = tpu.memref_slice %arg7[%c0_i32_208] : memref<1x!tpu.dma_semaphore, #tpu.memory_space<semaphore_mem>> -> memref<1x!tpu.dma_semaphore, #tpu.memory_space<semaphore_mem>>
    %420 = tpu.memref_squeeze %419 : memref<1x!tpu.dma_semaphore, #tpu.memory_space<semaphore_mem>> -> memref<!tpu.dma_semaphore, #tpu.memory_space<semaphore_mem>>
    tpu.enqueue_dma source(%416 : memref<128xf32, #tpu.memory_space<any>>) target(%418 : memref<128xf32, #tpu.memory_space<vmem>>) target_semaphore(%420 : memref<!tpu.dma_semaphore, #tpu.memory_space<semaphore_mem>>)
    %c40_i32_211 = arith.constant 40 : i32
    %421 = arith.addi %c40_i32_211, %0 : i32
    %c2_i32_212 = arith.constant 2 : i32
    %422 = arith.addi %421, %c2_i32_212 : i32
    %423 = arith.index_cast %422 : i32 to index
    %424 = memref.load %arg1[%423] : memref<64xi32, #tpu.memory_space<smem>>
    %c42_i32 = arith.constant 42 : i32
    %c0_i32_213 = arith.constant 0 : i32
    %c0_i32_214 = arith.constant 0 : i32
    %425 = tpu.memref_slice %arg2[%424, %c0_i32_214] : memref<16x128xf32, #tpu.memory_space<any>> -> memref<1x128xf32, #tpu.memory_space<any>>
    %426 = tpu.memref_squeeze %425 : memref<1x128xf32, #tpu.memory_space<any>> -> memref<128xf32, #tpu.memory_space<any>>
    %c0_i32_215 = arith.constant 0 : i32
    %427 = tpu.memref_slice %arg6[%c42_i32, %c0_i32_215] : memref<64x128xf32, #tpu.memory_space<vmem>> -> memref<1x128xf32, #tpu.memory_space<vmem>>
    %428 = tpu.memref_squeeze %427 : memref<1x128xf32, #tpu.memory_space<vmem>> -> memref<128xf32, #tpu.memory_space<vmem>>
    %429 = tpu.memref_slice %arg7[%c0_i32_213] : memref<1x!tpu.dma_semaphore, #tpu.memory_space<semaphore_mem>> -> memref<1x!tpu.dma_semaphore, #tpu.memory_space<semaphore_mem>>
    %430 = tpu.memref_squeeze %429 : memref<1x!tpu.dma_semaphore, #tpu.memory_space<semaphore_mem>> -> memref<!tpu.dma_semaphore, #tpu.memory_space<semaphore_mem>>
    tpu.enqueue_dma source(%426 : memref<128xf32, #tpu.memory_space<any>>) target(%428 : memref<128xf32, #tpu.memory_space<vmem>>) target_semaphore(%430 : memref<!tpu.dma_semaphore, #tpu.memory_space<semaphore_mem>>)
    %c40_i32_216 = arith.constant 40 : i32
    %431 = arith.addi %c40_i32_216, %0 : i32
    %c3_i32_217 = arith.constant 3 : i32
    %432 = arith.addi %431, %c3_i32_217 : i32
    %433 = arith.index_cast %432 : i32 to index
    %434 = memref.load %arg1[%433] : memref<64xi32, #tpu.memory_space<smem>>
    %c43_i32 = arith.constant 43 : i32
    %c0_i32_218 = arith.constant 0 : i32
    %c0_i32_219 = arith.constant 0 : i32
    %435 = tpu.memref_slice %arg2[%434, %c0_i32_219] : memref<16x128xf32, #tpu.memory_space<any>> -> memref<1x128xf32, #tpu.memory_space<any>>
    %436 = tpu.memref_squeeze %435 : memref<1x128xf32, #tpu.memory_space<any>> -> memref<128xf32, #tpu.memory_space<any>>
    %c0_i32_220 = arith.constant 0 : i32
    %437 = tpu.memref_slice %arg6[%c43_i32, %c0_i32_220] : memref<64x128xf32, #tpu.memory_space<vmem>> -> memref<1x128xf32, #tpu.memory_space<vmem>>
    %438 = tpu.memref_squeeze %437 : memref<1x128xf32, #tpu.memory_space<vmem>> -> memref<128xf32, #tpu.memory_space<vmem>>
    %439 = tpu.memref_slice %arg7[%c0_i32_218] : memref<1x!tpu.dma_semaphore, #tpu.memory_space<semaphore_mem>> -> memref<1x!tpu.dma_semaphore, #tpu.memory_space<semaphore_mem>>
    %440 = tpu.memref_squeeze %439 : memref<1x!tpu.dma_semaphore, #tpu.memory_space<semaphore_mem>> -> memref<!tpu.dma_semaphore, #tpu.memory_space<semaphore_mem>>
    tpu.enqueue_dma source(%436 : memref<128xf32, #tpu.memory_space<any>>) target(%438 : memref<128xf32, #tpu.memory_space<vmem>>) target_semaphore(%440 : memref<!tpu.dma_semaphore, #tpu.memory_space<semaphore_mem>>)
    %c40_i32_221 = arith.constant 40 : i32
    %441 = arith.addi %c40_i32_221, %0 : i32
    %c4_i32_222 = arith.constant 4 : i32
    %442 = arith.addi %441, %c4_i32_222 : i32
    %443 = arith.index_cast %442 : i32 to index
    %444 = memref.load %arg1[%443] : memref<64xi32, #tpu.memory_space<smem>>
    %c44_i32 = arith.constant 44 : i32
    %c0_i32_223 = arith.constant 0 : i32
    %c0_i32_224 = arith.constant 0 : i32
    %445 = tpu.memref_slice %arg2[%444, %c0_i32_224] : memref<16x128xf32, #tpu.memory_space<any>> -> memref<1x128xf32, #tpu.memory_space<any>>
    %446 = tpu.memref_squeeze %445 : memref<1x128xf32, #tpu.memory_space<any>> -> memref<128xf32, #tpu.memory_space<any>>
    %c0_i32_225 = arith.constant 0 : i32
    %447 = tpu.memref_slice %arg6[%c44_i32, %c0_i32_225] : memref<64x128xf32, #tpu.memory_space<vmem>> -> memref<1x128xf32, #tpu.memory_space<vmem>>
    %448 = tpu.memref_squeeze %447 : memref<1x128xf32, #tpu.memory_space<vmem>> -> memref<128xf32, #tpu.memory_space<vmem>>
    %449 = tpu.memref_slice %arg7[%c0_i32_223] : memref<1x!tpu.dma_semaphore, #tpu.memory_space<semaphore_mem>> -> memref<1x!tpu.dma_semaphore, #tpu.memory_space<semaphore_mem>>
    %450 = tpu.memref_squeeze %449 : memref<1x!tpu.dma_semaphore, #tpu.memory_space<semaphore_mem>> -> memref<!tpu.dma_semaphore, #tpu.memory_space<semaphore_mem>>
    tpu.enqueue_dma source(%446 : memref<128xf32, #tpu.memory_space<any>>) target(%448 : memref<128xf32, #tpu.memory_space<vmem>>) target_semaphore(%450 : memref<!tpu.dma_semaphore, #tpu.memory_space<semaphore_mem>>)
    %c40_i32_226 = arith.constant 40 : i32
    %451 = arith.addi %c40_i32_226, %0 : i32
    %c5_i32_227 = arith.constant 5 : i32
    %452 = arith.addi %451, %c5_i32_227 : i32
    %453 = arith.index_cast %452 : i32 to index
    %454 = memref.load %arg1[%453] : memref<64xi32, #tpu.memory_space<smem>>
    %c45_i32 = arith.constant 45 : i32
    %c0_i32_228 = arith.constant 0 : i32
    %c0_i32_229 = arith.constant 0 : i32
    %455 = tpu.memref_slice %arg2[%454, %c0_i32_229] : memref<16x128xf32, #tpu.memory_space<any>> -> memref<1x128xf32, #tpu.memory_space<any>>
    %456 = tpu.memref_squeeze %455 : memref<1x128xf32, #tpu.memory_space<any>> -> memref<128xf32, #tpu.memory_space<any>>
    %c0_i32_230 = arith.constant 0 : i32
    %457 = tpu.memref_slice %arg6[%c45_i32, %c0_i32_230] : memref<64x128xf32, #tpu.memory_space<vmem>> -> memref<1x128xf32, #tpu.memory_space<vmem>>
    %458 = tpu.memref_squeeze %457 : memref<1x128xf32, #tpu.memory_space<vmem>> -> memref<128xf32, #tpu.memory_space<vmem>>
    %459 = tpu.memref_slice %arg7[%c0_i32_228] : memref<1x!tpu.dma_semaphore, #tpu.memory_space<semaphore_mem>> -> memref<1x!tpu.dma_semaphore, #tpu.memory_space<semaphore_mem>>
    %460 = tpu.memref_squeeze %459 : memref<1x!tpu.dma_semaphore, #tpu.memory_space<semaphore_mem>> -> memref<!tpu.dma_semaphore, #tpu.memory_space<semaphore_mem>>
    tpu.enqueue_dma source(%456 : memref<128xf32, #tpu.memory_space<any>>) target(%458 : memref<128xf32, #tpu.memory_space<vmem>>) target_semaphore(%460 : memref<!tpu.dma_semaphore, #tpu.memory_space<semaphore_mem>>)
    %c40_i32_231 = arith.constant 40 : i32
    %461 = arith.addi %c40_i32_231, %0 : i32
    %c6_i32_232 = arith.constant 6 : i32
    %462 = arith.addi %461, %c6_i32_232 : i32
    %463 = arith.index_cast %462 : i32 to index
    %464 = memref.load %arg1[%463] : memref<64xi32, #tpu.memory_space<smem>>
    %c46_i32 = arith.constant 46 : i32
    %c0_i32_233 = arith.constant 0 : i32
    %c0_i32_234 = arith.constant 0 : i32
    %465 = tpu.memref_slice %arg2[%464, %c0_i32_234] : memref<16x128xf32, #tpu.memory_space<any>> -> memref<1x128xf32, #tpu.memory_space<any>>
    %466 = tpu.memref_squeeze %465 : memref<1x128xf32, #tpu.memory_space<any>> -> memref<128xf32, #tpu.memory_space<any>>
    %c0_i32_235 = arith.constant 0 : i32
    %467 = tpu.memref_slice %arg6[%c46_i32, %c0_i32_235] : memref<64x128xf32, #tpu.memory_space<vmem>> -> memref<1x128xf32, #tpu.memory_space<vmem>>
    %468 = tpu.memref_squeeze %467 : memref<1x128xf32, #tpu.memory_space<vmem>> -> memref<128xf32, #tpu.memory_space<vmem>>
    %469 = tpu.memref_slice %arg7[%c0_i32_233] : memref<1x!tpu.dma_semaphore, #tpu.memory_space<semaphore_mem>> -> memref<1x!tpu.dma_semaphore, #tpu.memory_space<semaphore_mem>>
    %470 = tpu.memref_squeeze %469 : memref<1x!tpu.dma_semaphore, #tpu.memory_space<semaphore_mem>> -> memref<!tpu.dma_semaphore, #tpu.memory_space<semaphore_mem>>
    tpu.enqueue_dma source(%466 : memref<128xf32, #tpu.memory_space<any>>) target(%468 : memref<128xf32, #tpu.memory_space<vmem>>) target_semaphore(%470 : memref<!tpu.dma_semaphore, #tpu.memory_space<semaphore_mem>>)
    %c40_i32_236 = arith.constant 40 : i32
    %471 = arith.addi %c40_i32_236, %0 : i32
    %c7_i32_237 = arith.constant 7 : i32
    %472 = arith.addi %471, %c7_i32_237 : i32
    %473 = arith.index_cast %472 : i32 to index
    %474 = memref.load %arg1[%473] : memref<64xi32, #tpu.memory_space<smem>>
    %c47_i32 = arith.constant 47 : i32
    %c0_i32_238 = arith.constant 0 : i32
    %c0_i32_239 = arith.constant 0 : i32
    %475 = tpu.memref_slice %arg2[%474, %c0_i32_239] : memref<16x128xf32, #tpu.memory_space<any>> -> memref<1x128xf32, #tpu.memory_space<any>>
    %476 = tpu.memref_squeeze %475 : memref<1x128xf32, #tpu.memory_space<any>> -> memref<128xf32, #tpu.memory_space<any>>
    %c0_i32_240 = arith.constant 0 : i32
    %477 = tpu.memref_slice %arg6[%c47_i32, %c0_i32_240] : memref<64x128xf32, #tpu.memory_space<vmem>> -> memref<1x128xf32, #tpu.memory_space<vmem>>
    %478 = tpu.memref_squeeze %477 : memref<1x128xf32, #tpu.memory_space<vmem>> -> memref<128xf32, #tpu.memory_space<vmem>>
    %479 = tpu.memref_slice %arg7[%c0_i32_238] : memref<1x!tpu.dma_semaphore, #tpu.memory_space<semaphore_mem>> -> memref<1x!tpu.dma_semaphore, #tpu.memory_space<semaphore_mem>>
    %480 = tpu.memref_squeeze %479 : memref<1x!tpu.dma_semaphore, #tpu.memory_space<semaphore_mem>> -> memref<!tpu.dma_semaphore, #tpu.memory_space<semaphore_mem>>
    tpu.enqueue_dma source(%476 : memref<128xf32, #tpu.memory_space<any>>) target(%478 : memref<128xf32, #tpu.memory_space<vmem>>) target_semaphore(%480 : memref<!tpu.dma_semaphore, #tpu.memory_space<semaphore_mem>>)
    %c48_i32 = arith.constant 48 : i32
    %481 = arith.addi %c48_i32, %0 : i32
    %c0_i32_241 = arith.constant 0 : i32
    %482 = arith.addi %481, %c0_i32_241 : i32
    %483 = arith.index_cast %482 : i32 to index
    %484 = memref.load %arg1[%483] : memref<64xi32, #tpu.memory_space<smem>>
    %c48_i32_242 = arith.constant 48 : i32
    %c0_i32_243 = arith.constant 0 : i32
    %c0_i32_244 = arith.constant 0 : i32
    %485 = tpu.memref_slice %arg2[%484, %c0_i32_244] : memref<16x128xf32, #tpu.memory_space<any>> -> memref<1x128xf32, #tpu.memory_space<any>>
    %486 = tpu.memref_squeeze %485 : memref<1x128xf32, #tpu.memory_space<any>> -> memref<128xf32, #tpu.memory_space<any>>
    %c0_i32_245 = arith.constant 0 : i32
    %487 = tpu.memref_slice %arg6[%c48_i32_242, %c0_i32_245] : memref<64x128xf32, #tpu.memory_space<vmem>> -> memref<1x128xf32, #tpu.memory_space<vmem>>
    %488 = tpu.memref_squeeze %487 : memref<1x128xf32, #tpu.memory_space<vmem>> -> memref<128xf32, #tpu.memory_space<vmem>>
    %489 = tpu.memref_slice %arg7[%c0_i32_243] : memref<1x!tpu.dma_semaphore, #tpu.memory_space<semaphore_mem>> -> memref<1x!tpu.dma_semaphore, #tpu.memory_space<semaphore_mem>>
    %490 = tpu.memref_squeeze %489 : memref<1x!tpu.dma_semaphore, #tpu.memory_space<semaphore_mem>> -> memref<!tpu.dma_semaphore, #tpu.memory_space<semaphore_mem>>
    tpu.enqueue_dma source(%486 : memref<128xf32, #tpu.memory_space<any>>) target(%488 : memref<128xf32, #tpu.memory_space<vmem>>) target_semaphore(%490 : memref<!tpu.dma_semaphore, #tpu.memory_space<semaphore_mem>>)
    %c48_i32_246 = arith.constant 48 : i32
    %491 = arith.addi %c48_i32_246, %0 : i32
    %c1_i32_247 = arith.constant 1 : i32
    %492 = arith.addi %491, %c1_i32_247 : i32
    %493 = arith.index_cast %492 : i32 to index
    %494 = memref.load %arg1[%493] : memref<64xi32, #tpu.memory_space<smem>>
    %c49_i32 = arith.constant 49 : i32
    %c0_i32_248 = arith.constant 0 : i32
    %c0_i32_249 = arith.constant 0 : i32
    %495 = tpu.memref_slice %arg2[%494, %c0_i32_249] : memref<16x128xf32, #tpu.memory_space<any>> -> memref<1x128xf32, #tpu.memory_space<any>>
    %496 = tpu.memref_squeeze %495 : memref<1x128xf32, #tpu.memory_space<any>> -> memref<128xf32, #tpu.memory_space<any>>
    %c0_i32_250 = arith.constant 0 : i32
    %497 = tpu.memref_slice %arg6[%c49_i32, %c0_i32_250] : memref<64x128xf32, #tpu.memory_space<vmem>> -> memref<1x128xf32, #tpu.memory_space<vmem>>
    %498 = tpu.memref_squeeze %497 : memref<1x128xf32, #tpu.memory_space<vmem>> -> memref<128xf32, #tpu.memory_space<vmem>>
    %499 = tpu.memref_slice %arg7[%c0_i32_248] : memref<1x!tpu.dma_semaphore, #tpu.memory_space<semaphore_mem>> -> memref<1x!tpu.dma_semaphore, #tpu.memory_space<semaphore_mem>>
    %500 = tpu.memref_squeeze %499 : memref<1x!tpu.dma_semaphore, #tpu.memory_space<semaphore_mem>> -> memref<!tpu.dma_semaphore, #tpu.memory_space<semaphore_mem>>
    tpu.enqueue_dma source(%496 : memref<128xf32, #tpu.memory_space<any>>) target(%498 : memref<128xf32, #tpu.memory_space<vmem>>) target_semaphore(%500 : memref<!tpu.dma_semaphore, #tpu.memory_space<semaphore_mem>>)
    %c48_i32_251 = arith.constant 48 : i32
    %501 = arith.addi %c48_i32_251, %0 : i32
    %c2_i32_252 = arith.constant 2 : i32
    %502 = arith.addi %501, %c2_i32_252 : i32
    %503 = arith.index_cast %502 : i32 to index
    %504 = memref.load %arg1[%503] : memref<64xi32, #tpu.memory_space<smem>>
    %c50_i32 = arith.constant 50 : i32
    %c0_i32_253 = arith.constant 0 : i32
    %c0_i32_254 = arith.constant 0 : i32
    %505 = tpu.memref_slice %arg2[%504, %c0_i32_254] : memref<16x128xf32, #tpu.memory_space<any>> -> memref<1x128xf32, #tpu.memory_space<any>>
    %506 = tpu.memref_squeeze %505 : memref<1x128xf32, #tpu.memory_space<any>> -> memref<128xf32, #tpu.memory_space<any>>
    %c0_i32_255 = arith.constant 0 : i32
    %507 = tpu.memref_slice %arg6[%c50_i32, %c0_i32_255] : memref<64x128xf32, #tpu.memory_space<vmem>> -> memref<1x128xf32, #tpu.memory_space<vmem>>
    %508 = tpu.memref_squeeze %507 : memref<1x128xf32, #tpu.memory_space<vmem>> -> memref<128xf32, #tpu.memory_space<vmem>>
    %509 = tpu.memref_slice %arg7[%c0_i32_253] : memref<1x!tpu.dma_semaphore, #tpu.memory_space<semaphore_mem>> -> memref<1x!tpu.dma_semaphore, #tpu.memory_space<semaphore_mem>>
    %510 = tpu.memref_squeeze %509 : memref<1x!tpu.dma_semaphore, #tpu.memory_space<semaphore_mem>> -> memref<!tpu.dma_semaphore, #tpu.memory_space<semaphore_mem>>
    tpu.enqueue_dma source(%506 : memref<128xf32, #tpu.memory_space<any>>) target(%508 : memref<128xf32, #tpu.memory_space<vmem>>) target_semaphore(%510 : memref<!tpu.dma_semaphore, #tpu.memory_space<semaphore_mem>>)
    %c48_i32_256 = arith.constant 48 : i32
    %511 = arith.addi %c48_i32_256, %0 : i32
    %c3_i32_257 = arith.constant 3 : i32
    %512 = arith.addi %511, %c3_i32_257 : i32
    %513 = arith.index_cast %512 : i32 to index
    %514 = memref.load %arg1[%513] : memref<64xi32, #tpu.memory_space<smem>>
    %c51_i32 = arith.constant 51 : i32
    %c0_i32_258 = arith.constant 0 : i32
    %c0_i32_259 = arith.constant 0 : i32
    %515 = tpu.memref_slice %arg2[%514, %c0_i32_259] : memref<16x128xf32, #tpu.memory_space<any>> -> memref<1x128xf32, #tpu.memory_space<any>>
    %516 = tpu.memref_squeeze %515 : memref<1x128xf32, #tpu.memory_space<any>> -> memref<128xf32, #tpu.memory_space<any>>
    %c0_i32_260 = arith.constant 0 : i32
    %517 = tpu.memref_slice %arg6[%c51_i32, %c0_i32_260] : memref<64x128xf32, #tpu.memory_space<vmem>> -> memref<1x128xf32, #tpu.memory_space<vmem>>
    %518 = tpu.memref_squeeze %517 : memref<1x128xf32, #tpu.memory_space<vmem>> -> memref<128xf32, #tpu.memory_space<vmem>>
    %519 = tpu.memref_slice %arg7[%c0_i32_258] : memref<1x!tpu.dma_semaphore, #tpu.memory_space<semaphore_mem>> -> memref<1x!tpu.dma_semaphore, #tpu.memory_space<semaphore_mem>>
    %520 = tpu.memref_squeeze %519 : memref<1x!tpu.dma_semaphore, #tpu.memory_space<semaphore_mem>> -> memref<!tpu.dma_semaphore, #tpu.memory_space<semaphore_mem>>
    tpu.enqueue_dma source(%516 : memref<128xf32, #tpu.memory_space<any>>) target(%518 : memref<128xf32, #tpu.memory_space<vmem>>) target_semaphore(%520 : memref<!tpu.dma_semaphore, #tpu.memory_space<semaphore_mem>>)
    %c48_i32_261 = arith.constant 48 : i32
    %521 = arith.addi %c48_i32_261, %0 : i32
    %c4_i32_262 = arith.constant 4 : i32
    %522 = arith.addi %521, %c4_i32_262 : i32
    %523 = arith.index_cast %522 : i32 to index
    %524 = memref.load %arg1[%523] : memref<64xi32, #tpu.memory_space<smem>>
    %c52_i32 = arith.constant 52 : i32
    %c0_i32_263 = arith.constant 0 : i32
    %c0_i32_264 = arith.constant 0 : i32
    %525 = tpu.memref_slice %arg2[%524, %c0_i32_264] : memref<16x128xf32, #tpu.memory_space<any>> -> memref<1x128xf32, #tpu.memory_space<any>>
    %526 = tpu.memref_squeeze %525 : memref<1x128xf32, #tpu.memory_space<any>> -> memref<128xf32, #tpu.memory_space<any>>
    %c0_i32_265 = arith.constant 0 : i32
    %527 = tpu.memref_slice %arg6[%c52_i32, %c0_i32_265] : memref<64x128xf32, #tpu.memory_space<vmem>> -> memref<1x128xf32, #tpu.memory_space<vmem>>
    %528 = tpu.memref_squeeze %527 : memref<1x128xf32, #tpu.memory_space<vmem>> -> memref<128xf32, #tpu.memory_space<vmem>>
    %529 = tpu.memref_slice %arg7[%c0_i32_263] : memref<1x!tpu.dma_semaphore, #tpu.memory_space<semaphore_mem>> -> memref<1x!tpu.dma_semaphore, #tpu.memory_space<semaphore_mem>>
    %530 = tpu.memref_squeeze %529 : memref<1x!tpu.dma_semaphore, #tpu.memory_space<semaphore_mem>> -> memref<!tpu.dma_semaphore, #tpu.memory_space<semaphore_mem>>
    tpu.enqueue_dma source(%526 : memref<128xf32, #tpu.memory_space<any>>) target(%528 : memref<128xf32, #tpu.memory_space<vmem>>) target_semaphore(%530 : memref<!tpu.dma_semaphore, #tpu.memory_space<semaphore_mem>>)
    %c48_i32_266 = arith.constant 48 : i32
    %531 = arith.addi %c48_i32_266, %0 : i32
    %c5_i32_267 = arith.constant 5 : i32
    %532 = arith.addi %531, %c5_i32_267 : i32
    %533 = arith.index_cast %532 : i32 to index
    %534 = memref.load %arg1[%533] : memref<64xi32, #tpu.memory_space<smem>>
    %c53_i32 = arith.constant 53 : i32
    %c0_i32_268 = arith.constant 0 : i32
    %c0_i32_269 = arith.constant 0 : i32
    %535 = tpu.memref_slice %arg2[%534, %c0_i32_269] : memref<16x128xf32, #tpu.memory_space<any>> -> memref<1x128xf32, #tpu.memory_space<any>>
    %536 = tpu.memref_squeeze %535 : memref<1x128xf32, #tpu.memory_space<any>> -> memref<128xf32, #tpu.memory_space<any>>
    %c0_i32_270 = arith.constant 0 : i32
    %537 = tpu.memref_slice %arg6[%c53_i32, %c0_i32_270] : memref<64x128xf32, #tpu.memory_space<vmem>> -> memref<1x128xf32, #tpu.memory_space<vmem>>
    %538 = tpu.memref_squeeze %537 : memref<1x128xf32, #tpu.memory_space<vmem>> -> memref<128xf32, #tpu.memory_space<vmem>>
    %539 = tpu.memref_slice %arg7[%c0_i32_268] : memref<1x!tpu.dma_semaphore, #tpu.memory_space<semaphore_mem>> -> memref<1x!tpu.dma_semaphore, #tpu.memory_space<semaphore_mem>>
    %540 = tpu.memref_squeeze %539 : memref<1x!tpu.dma_semaphore, #tpu.memory_space<semaphore_mem>> -> memref<!tpu.dma_semaphore, #tpu.memory_space<semaphore_mem>>
    tpu.enqueue_dma source(%536 : memref<128xf32, #tpu.memory_space<any>>) target(%538 : memref<128xf32, #tpu.memory_space<vmem>>) target_semaphore(%540 : memref<!tpu.dma_semaphore, #tpu.memory_space<semaphore_mem>>)
    %c48_i32_271 = arith.constant 48 : i32
    %541 = arith.addi %c48_i32_271, %0 : i32
    %c6_i32_272 = arith.constant 6 : i32
    %542 = arith.addi %541, %c6_i32_272 : i32
    %543 = arith.index_cast %542 : i32 to index
    %544 = memref.load %arg1[%543] : memref<64xi32, #tpu.memory_space<smem>>
    %c54_i32 = arith.constant 54 : i32
    %c0_i32_273 = arith.constant 0 : i32
    %c0_i32_274 = arith.constant 0 : i32
    %545 = tpu.memref_slice %arg2[%544, %c0_i32_274] : memref<16x128xf32, #tpu.memory_space<any>> -> memref<1x128xf32, #tpu.memory_space<any>>
    %546 = tpu.memref_squeeze %545 : memref<1x128xf32, #tpu.memory_space<any>> -> memref<128xf32, #tpu.memory_space<any>>
    %c0_i32_275 = arith.constant 0 : i32
    %547 = tpu.memref_slice %arg6[%c54_i32, %c0_i32_275] : memref<64x128xf32, #tpu.memory_space<vmem>> -> memref<1x128xf32, #tpu.memory_space<vmem>>
    %548 = tpu.memref_squeeze %547 : memref<1x128xf32, #tpu.memory_space<vmem>> -> memref<128xf32, #tpu.memory_space<vmem>>
    %549 = tpu.memref_slice %arg7[%c0_i32_273] : memref<1x!tpu.dma_semaphore, #tpu.memory_space<semaphore_mem>> -> memref<1x!tpu.dma_semaphore, #tpu.memory_space<semaphore_mem>>
    %550 = tpu.memref_squeeze %549 : memref<1x!tpu.dma_semaphore, #tpu.memory_space<semaphore_mem>> -> memref<!tpu.dma_semaphore, #tpu.memory_space<semaphore_mem>>
    tpu.enqueue_dma source(%546 : memref<128xf32, #tpu.memory_space<any>>) target(%548 : memref<128xf32, #tpu.memory_space<vmem>>) target_semaphore(%550 : memref<!tpu.dma_semaphore, #tpu.memory_space<semaphore_mem>>)
    %c48_i32_276 = arith.constant 48 : i32
    %551 = arith.addi %c48_i32_276, %0 : i32
    %c7_i32_277 = arith.constant 7 : i32
    %552 = arith.addi %551, %c7_i32_277 : i32
    %553 = arith.index_cast %552 : i32 to index
    %554 = memref.load %arg1[%553] : memref<64xi32, #tpu.memory_space<smem>>
    %c55_i32 = arith.constant 55 : i32
    %c0_i32_278 = arith.constant 0 : i32
    %c0_i32_279 = arith.constant 0 : i32
    %555 = tpu.memref_slice %arg2[%554, %c0_i32_279] : memref<16x128xf32, #tpu.memory_space<any>> -> memref<1x128xf32, #tpu.memory_space<any>>
    %556 = tpu.memref_squeeze %555 : memref<1x128xf32, #tpu.memory_space<any>> -> memref<128xf32, #tpu.memory_space<any>>
    %c0_i32_280 = arith.constant 0 : i32
    %557 = tpu.memref_slice %arg6[%c55_i32, %c0_i32_280] : memref<64x128xf32, #tpu.memory_space<vmem>> -> memref<1x128xf32, #tpu.memory_space<vmem>>
    %558 = tpu.memref_squeeze %557 : memref<1x128xf32, #tpu.memory_space<vmem>> -> memref<128xf32, #tpu.memory_space<vmem>>
    %559 = tpu.memref_slice %arg7[%c0_i32_278] : memref<1x!tpu.dma_semaphore, #tpu.memory_space<semaphore_mem>> -> memref<1x!tpu.dma_semaphore, #tpu.memory_space<semaphore_mem>>
    %560 = tpu.memref_squeeze %559 : memref<1x!tpu.dma_semaphore, #tpu.memory_space<semaphore_mem>> -> memref<!tpu.dma_semaphore, #tpu.memory_space<semaphore_mem>>
    tpu.enqueue_dma source(%556 : memref<128xf32, #tpu.memory_space<any>>) target(%558 : memref<128xf32, #tpu.memory_space<vmem>>) target_semaphore(%560 : memref<!tpu.dma_semaphore, #tpu.memory_space<semaphore_mem>>)
    %c56_i32 = arith.constant 56 : i32
    %561 = arith.addi %c56_i32, %0 : i32
    %c0_i32_281 = arith.constant 0 : i32
    %562 = arith.addi %561, %c0_i32_281 : i32
    %563 = arith.index_cast %562 : i32 to index
    %564 = memref.load %arg1[%563] : memref<64xi32, #tpu.memory_space<smem>>
    %c56_i32_282 = arith.constant 56 : i32
    %c0_i32_283 = arith.constant 0 : i32
    %c0_i32_284 = arith.constant 0 : i32
    %565 = tpu.memref_slice %arg2[%564, %c0_i32_284] : memref<16x128xf32, #tpu.memory_space<any>> -> memref<1x128xf32, #tpu.memory_space<any>>
    %566 = tpu.memref_squeeze %565 : memref<1x128xf32, #tpu.memory_space<any>> -> memref<128xf32, #tpu.memory_space<any>>
    %c0_i32_285 = arith.constant 0 : i32
    %567 = tpu.memref_slice %arg6[%c56_i32_282, %c0_i32_285] : memref<64x128xf32, #tpu.memory_space<vmem>> -> memref<1x128xf32, #tpu.memory_space<vmem>>
    %568 = tpu.memref_squeeze %567 : memref<1x128xf32, #tpu.memory_space<vmem>> -> memref<128xf32, #tpu.memory_space<vmem>>
    %569 = tpu.memref_slice %arg7[%c0_i32_283] : memref<1x!tpu.dma_semaphore, #tpu.memory_space<semaphore_mem>> -> memref<1x!tpu.dma_semaphore, #tpu.memory_space<semaphore_mem>>
    %570 = tpu.memref_squeeze %569 : memref<1x!tpu.dma_semaphore, #tpu.memory_space<semaphore_mem>> -> memref<!tpu.dma_semaphore, #tpu.memory_space<semaphore_mem>>
    tpu.enqueue_dma source(%566 : memref<128xf32, #tpu.memory_space<any>>) target(%568 : memref<128xf32, #tpu.memory_space<vmem>>) target_semaphore(%570 : memref<!tpu.dma_semaphore, #tpu.memory_space<semaphore_mem>>)
    %c56_i32_286 = arith.constant 56 : i32
    %571 = arith.addi %c56_i32_286, %0 : i32
    %c1_i32_287 = arith.constant 1 : i32
    %572 = arith.addi %571, %c1_i32_287 : i32
    %573 = arith.index_cast %572 : i32 to index
    %574 = memref.load %arg1[%573] : memref<64xi32, #tpu.memory_space<smem>>
    %c57_i32 = arith.constant 57 : i32
    %c0_i32_288 = arith.constant 0 : i32
    %c0_i32_289 = arith.constant 0 : i32
    %575 = tpu.memref_slice %arg2[%574, %c0_i32_289] : memref<16x128xf32, #tpu.memory_space<any>> -> memref<1x128xf32, #tpu.memory_space<any>>
    %576 = tpu.memref_squeeze %575 : memref<1x128xf32, #tpu.memory_space<any>> -> memref<128xf32, #tpu.memory_space<any>>
    %c0_i32_290 = arith.constant 0 : i32
    %577 = tpu.memref_slice %arg6[%c57_i32, %c0_i32_290] : memref<64x128xf32, #tpu.memory_space<vmem>> -> memref<1x128xf32, #tpu.memory_space<vmem>>
    %578 = tpu.memref_squeeze %577 : memref<1x128xf32, #tpu.memory_space<vmem>> -> memref<128xf32, #tpu.memory_space<vmem>>
    %579 = tpu.memref_slice %arg7[%c0_i32_288] : memref<1x!tpu.dma_semaphore, #tpu.memory_space<semaphore_mem>> -> memref<1x!tpu.dma_semaphore, #tpu.memory_space<semaphore_mem>>
    %580 = tpu.memref_squeeze %579 : memref<1x!tpu.dma_semaphore, #tpu.memory_space<semaphore_mem>> -> memref<!tpu.dma_semaphore, #tpu.memory_space<semaphore_mem>>
    tpu.enqueue_dma source(%576 : memref<128xf32, #tpu.memory_space<any>>) target(%578 : memref<128xf32, #tpu.memory_space<vmem>>) target_semaphore(%580 : memref<!tpu.dma_semaphore, #tpu.memory_space<semaphore_mem>>)
    %c56_i32_291 = arith.constant 56 : i32
    %581 = arith.addi %c56_i32_291, %0 : i32
    %c2_i32_292 = arith.constant 2 : i32
    %582 = arith.addi %581, %c2_i32_292 : i32
    %583 = arith.index_cast %582 : i32 to index
    %584 = memref.load %arg1[%583] : memref<64xi32, #tpu.memory_space<smem>>
    %c58_i32 = arith.constant 58 : i32
    %c0_i32_293 = arith.constant 0 : i32
    %c0_i32_294 = arith.constant 0 : i32
    %585 = tpu.memref_slice %arg2[%584, %c0_i32_294] : memref<16x128xf32, #tpu.memory_space<any>> -> memref<1x128xf32, #tpu.memory_space<any>>
    %586 = tpu.memref_squeeze %585 : memref<1x128xf32, #tpu.memory_space<any>> -> memref<128xf32, #tpu.memory_space<any>>
    %c0_i32_295 = arith.constant 0 : i32
    %587 = tpu.memref_slice %arg6[%c58_i32, %c0_i32_295] : memref<64x128xf32, #tpu.memory_space<vmem>> -> memref<1x128xf32, #tpu.memory_space<vmem>>
    %588 = tpu.memref_squeeze %587 : memref<1x128xf32, #tpu.memory_space<vmem>> -> memref<128xf32, #tpu.memory_space<vmem>>
    %589 = tpu.memref_slice %arg7[%c0_i32_293] : memref<1x!tpu.dma_semaphore, #tpu.memory_space<semaphore_mem>> -> memref<1x!tpu.dma_semaphore, #tpu.memory_space<semaphore_mem>>
    %590 = tpu.memref_squeeze %589 : memref<1x!tpu.dma_semaphore, #tpu.memory_space<semaphore_mem>> -> memref<!tpu.dma_semaphore, #tpu.memory_space<semaphore_mem>>
    tpu.enqueue_dma source(%586 : memref<128xf32, #tpu.memory_space<any>>) target(%588 : memref<128xf32, #tpu.memory_space<vmem>>) target_semaphore(%590 : memref<!tpu.dma_semaphore, #tpu.memory_space<semaphore_mem>>)
    %c56_i32_296 = arith.constant 56 : i32
    %591 = arith.addi %c56_i32_296, %0 : i32
    %c3_i32_297 = arith.constant 3 : i32
    %592 = arith.addi %591, %c3_i32_297 : i32
    %593 = arith.index_cast %592 : i32 to index
    %594 = memref.load %arg1[%593] : memref<64xi32, #tpu.memory_space<smem>>
    %c59_i32 = arith.constant 59 : i32
    %c0_i32_298 = arith.constant 0 : i32
    %c0_i32_299 = arith.constant 0 : i32
    %595 = tpu.memref_slice %arg2[%594, %c0_i32_299] : memref<16x128xf32, #tpu.memory_space<any>> -> memref<1x128xf32, #tpu.memory_space<any>>
    %596 = tpu.memref_squeeze %595 : memref<1x128xf32, #tpu.memory_space<any>> -> memref<128xf32, #tpu.memory_space<any>>
    %c0_i32_300 = arith.constant 0 : i32
    %597 = tpu.memref_slice %arg6[%c59_i32, %c0_i32_300] : memref<64x128xf32, #tpu.memory_space<vmem>> -> memref<1x128xf32, #tpu.memory_space<vmem>>
    %598 = tpu.memref_squeeze %597 : memref<1x128xf32, #tpu.memory_space<vmem>> -> memref<128xf32, #tpu.memory_space<vmem>>
    %599 = tpu.memref_slice %arg7[%c0_i32_298] : memref<1x!tpu.dma_semaphore, #tpu.memory_space<semaphore_mem>> -> memref<1x!tpu.dma_semaphore, #tpu.memory_space<semaphore_mem>>
    %600 = tpu.memref_squeeze %599 : memref<1x!tpu.dma_semaphore, #tpu.memory_space<semaphore_mem>> -> memref<!tpu.dma_semaphore, #tpu.memory_space<semaphore_mem>>
    tpu.enqueue_dma source(%596 : memref<128xf32, #tpu.memory_space<any>>) target(%598 : memref<128xf32, #tpu.memory_space<vmem>>) target_semaphore(%600 : memref<!tpu.dma_semaphore, #tpu.memory_space<semaphore_mem>>)
    %c56_i32_301 = arith.constant 56 : i32
    %601 = arith.addi %c56_i32_301, %0 : i32
    %c4_i32_302 = arith.constant 4 : i32
    %602 = arith.addi %601, %c4_i32_302 : i32
    %603 = arith.index_cast %602 : i32 to index
    %604 = memref.load %arg1[%603] : memref<64xi32, #tpu.memory_space<smem>>
    %c60_i32 = arith.constant 60 : i32
    %c0_i32_303 = arith.constant 0 : i32
    %c0_i32_304 = arith.constant 0 : i32
    %605 = tpu.memref_slice %arg2[%604, %c0_i32_304] : memref<16x128xf32, #tpu.memory_space<any>> -> memref<1x128xf32, #tpu.memory_space<any>>
    %606 = tpu.memref_squeeze %605 : memref<1x128xf32, #tpu.memory_space<any>> -> memref<128xf32, #tpu.memory_space<any>>
    %c0_i32_305 = arith.constant 0 : i32
    %607 = tpu.memref_slice %arg6[%c60_i32, %c0_i32_305] : memref<64x128xf32, #tpu.memory_space<vmem>> -> memref<1x128xf32, #tpu.memory_space<vmem>>
    %608 = tpu.memref_squeeze %607 : memref<1x128xf32, #tpu.memory_space<vmem>> -> memref<128xf32, #tpu.memory_space<vmem>>
    %609 = tpu.memref_slice %arg7[%c0_i32_303] : memref<1x!tpu.dma_semaphore, #tpu.memory_space<semaphore_mem>> -> memref<1x!tpu.dma_semaphore, #tpu.memory_space<semaphore_mem>>
    %610 = tpu.memref_squeeze %609 : memref<1x!tpu.dma_semaphore, #tpu.memory_space<semaphore_mem>> -> memref<!tpu.dma_semaphore, #tpu.memory_space<semaphore_mem>>
    tpu.enqueue_dma source(%606 : memref<128xf32, #tpu.memory_space<any>>) target(%608 : memref<128xf32, #tpu.memory_space<vmem>>) target_semaphore(%610 : memref<!tpu.dma_semaphore, #tpu.memory_space<semaphore_mem>>)
    %c56_i32_306 = arith.constant 56 : i32
    %611 = arith.addi %c56_i32_306, %0 : i32
    %c5_i32_307 = arith.constant 5 : i32
    %612 = arith.addi %611, %c5_i32_307 : i32
    %613 = arith.index_cast %612 : i32 to index
    %614 = memref.load %arg1[%613] : memref<64xi32, #tpu.memory_space<smem>>
    %c61_i32 = arith.constant 61 : i32
    %c0_i32_308 = arith.constant 0 : i32
    %c0_i32_309 = arith.constant 0 : i32
    %615 = tpu.memref_slice %arg2[%614, %c0_i32_309] : memref<16x128xf32, #tpu.memory_space<any>> -> memref<1x128xf32, #tpu.memory_space<any>>
    %616 = tpu.memref_squeeze %615 : memref<1x128xf32, #tpu.memory_space<any>> -> memref<128xf32, #tpu.memory_space<any>>
    %c0_i32_310 = arith.constant 0 : i32
    %617 = tpu.memref_slice %arg6[%c61_i32, %c0_i32_310] : memref<64x128xf32, #tpu.memory_space<vmem>> -> memref<1x128xf32, #tpu.memory_space<vmem>>
    %618 = tpu.memref_squeeze %617 : memref<1x128xf32, #tpu.memory_space<vmem>> -> memref<128xf32, #tpu.memory_space<vmem>>
    %619 = tpu.memref_slice %arg7[%c0_i32_308] : memref<1x!tpu.dma_semaphore, #tpu.memory_space<semaphore_mem>> -> memref<1x!tpu.dma_semaphore, #tpu.memory_space<semaphore_mem>>
    %620 = tpu.memref_squeeze %619 : memref<1x!tpu.dma_semaphore, #tpu.memory_space<semaphore_mem>> -> memref<!tpu.dma_semaphore, #tpu.memory_space<semaphore_mem>>
    tpu.enqueue_dma source(%616 : memref<128xf32, #tpu.memory_space<any>>) target(%618 : memref<128xf32, #tpu.memory_space<vmem>>) target_semaphore(%620 : memref<!tpu.dma_semaphore, #tpu.memory_space<semaphore_mem>>)
    %c56_i32_311 = arith.constant 56 : i32
    %621 = arith.addi %c56_i32_311, %0 : i32
    %c6_i32_312 = arith.constant 6 : i32
    %622 = arith.addi %621, %c6_i32_312 : i32
    %623 = arith.index_cast %622 : i32 to index
    %624 = memref.load %arg1[%623] : memref<64xi32, #tpu.memory_space<smem>>
    %c62_i32 = arith.constant 62 : i32
    %c0_i32_313 = arith.constant 0 : i32
    %c0_i32_314 = arith.constant 0 : i32
    %625 = tpu.memref_slice %arg2[%624, %c0_i32_314] : memref<16x128xf32, #tpu.memory_space<any>> -> memref<1x128xf32, #tpu.memory_space<any>>
    %626 = tpu.memref_squeeze %625 : memref<1x128xf32, #tpu.memory_space<any>> -> memref<128xf32, #tpu.memory_space<any>>
    %c0_i32_315 = arith.constant 0 : i32
    %627 = tpu.memref_slice %arg6[%c62_i32, %c0_i32_315] : memref<64x128xf32, #tpu.memory_space<vmem>> -> memref<1x128xf32, #tpu.memory_space<vmem>>
    %628 = tpu.memref_squeeze %627 : memref<1x128xf32, #tpu.memory_space<vmem>> -> memref<128xf32, #tpu.memory_space<vmem>>
    %629 = tpu.memref_slice %arg7[%c0_i32_313] : memref<1x!tpu.dma_semaphore, #tpu.memory_space<semaphore_mem>> -> memref<1x!tpu.dma_semaphore, #tpu.memory_space<semaphore_mem>>
    %630 = tpu.memref_squeeze %629 : memref<1x!tpu.dma_semaphore, #tpu.memory_space<semaphore_mem>> -> memref<!tpu.dma_semaphore, #tpu.memory_space<semaphore_mem>>
    tpu.enqueue_dma source(%626 : memref<128xf32, #tpu.memory_space<any>>) target(%628 : memref<128xf32, #tpu.memory_space<vmem>>) target_semaphore(%630 : memref<!tpu.dma_semaphore, #tpu.memory_space<semaphore_mem>>)
    %c56_i32_316 = arith.constant 56 : i32
    %631 = arith.addi %c56_i32_316, %0 : i32
    %c7_i32_317 = arith.constant 7 : i32
    %632 = arith.addi %631, %c7_i32_317 : i32
    %633 = arith.index_cast %632 : i32 to index
    %634 = memref.load %arg1[%633] : memref<64xi32, #tpu.memory_space<smem>>
    %c63_i32 = arith.constant 63 : i32
    %c0_i32_318 = arith.constant 0 : i32
    %c0_i32_319 = arith.constant 0 : i32
    %635 = tpu.memref_slice %arg2[%634, %c0_i32_319] : memref<16x128xf32, #tpu.memory_space<any>> -> memref<1x128xf32, #tpu.memory_space<any>>
    %636 = tpu.memref_squeeze %635 : memref<1x128xf32, #tpu.memory_space<any>> -> memref<128xf32, #tpu.memory_space<any>>
    %c0_i32_320 = arith.constant 0 : i32
    %637 = tpu.memref_slice %arg6[%c63_i32, %c0_i32_320] : memref<64x128xf32, #tpu.memory_space<vmem>> -> memref<1x128xf32, #tpu.memory_space<vmem>>
    %638 = tpu.memref_squeeze %637 : memref<1x128xf32, #tpu.memory_space<vmem>> -> memref<128xf32, #tpu.memory_space<vmem>>
    %639 = tpu.memref_slice %arg7[%c0_i32_318] : memref<1x!tpu.dma_semaphore, #tpu.memory_space<semaphore_mem>> -> memref<1x!tpu.dma_semaphore, #tpu.memory_space<semaphore_mem>>
    %640 = tpu.memref_squeeze %639 : memref<1x!tpu.dma_semaphore, #tpu.memory_space<semaphore_mem>> -> memref<!tpu.dma_semaphore, #tpu.memory_space<semaphore_mem>>
    tpu.enqueue_dma source(%636 : memref<128xf32, #tpu.memory_space<any>>) target(%638 : memref<128xf32, #tpu.memory_space<vmem>>) target_semaphore(%640 : memref<!tpu.dma_semaphore, #tpu.memory_space<semaphore_mem>>)
    %c0_i32_321 = arith.constant 0 : i32
    %c0_i32_322 = arith.constant 0 : i32
    %c0_i32_323 = arith.constant 0 : i32
    %641 = tpu.memref_slice %arg2[%4, %c0_i32_323] : memref<16x128xf32, #tpu.memory_space<any>> -> memref<1x128xf32, #tpu.memory_space<any>>
    %642 = tpu.memref_squeeze %641 : memref<1x128xf32, #tpu.memory_space<any>> -> memref<128xf32, #tpu.memory_space<any>>
    %c0_i32_324 = arith.constant 0 : i32
    %643 = tpu.memref_slice %arg6[%c0_i32_321, %c0_i32_324] : memref<64x128xf32, #tpu.memory_space<vmem>> -> memref<1x128xf32, #tpu.memory_space<vmem>>
    %644 = tpu.memref_squeeze %643 : memref<1x128xf32, #tpu.memory_space<vmem>> -> memref<128xf32, #tpu.memory_space<vmem>>
    %645 = tpu.memref_slice %arg7[%c0_i32_322] : memref<1x!tpu.dma_semaphore, #tpu.memory_space<semaphore_mem>> -> memref<1x!tpu.dma_semaphore, #tpu.memory_space<semaphore_mem>>
    %646 = tpu.memref_squeeze %645 : memref<1x!tpu.dma_semaphore, #tpu.memory_space<semaphore_mem>> -> memref<!tpu.dma_semaphore, #tpu.memory_space<semaphore_mem>>
    tpu.wait_dma2 semaphore(%646 : memref<!tpu.dma_semaphore, #tpu.memory_space<semaphore_mem>>) src(%642 : memref<128xf32, #tpu.memory_space<any>>) dst(%644 : memref<128xf32, #tpu.memory_space<vmem>>)
    %c1_i32_325 = arith.constant 1 : i32
    %c0_i32_326 = arith.constant 0 : i32
    %c0_i32_327 = arith.constant 0 : i32
    %647 = tpu.memref_slice %arg2[%14, %c0_i32_327] : memref<16x128xf32, #tpu.memory_space<any>> -> memref<1x128xf32, #tpu.memory_space<any>>
    %648 = tpu.memref_squeeze %647 : memref<1x128xf32, #tpu.memory_space<any>> -> memref<128xf32, #tpu.memory_space<any>>
    %c0_i32_328 = arith.constant 0 : i32
    %649 = tpu.memref_slice %arg6[%c1_i32_325, %c0_i32_328] : memref<64x128xf32, #tpu.memory_space<vmem>> -> memref<1x128xf32, #tpu.memory_space<vmem>>
    %650 = tpu.memref_squeeze %649 : memref<1x128xf32, #tpu.memory_space<vmem>> -> memref<128xf32, #tpu.memory_space<vmem>>
    %651 = tpu.memref_slice %arg7[%c0_i32_326] : memref<1x!tpu.dma_semaphore, #tpu.memory_space<semaphore_mem>> -> memref<1x!tpu.dma_semaphore, #tpu.memory_space<semaphore_mem>>
    %652 = tpu.memref_squeeze %651 : memref<1x!tpu.dma_semaphore, #tpu.memory_space<semaphore_mem>> -> memref<!tpu.dma_semaphore, #tpu.memory_space<semaphore_mem>>
    tpu.wait_dma2 semaphore(%652 : memref<!tpu.dma_semaphore, #tpu.memory_space<semaphore_mem>>) src(%648 : memref<128xf32, #tpu.memory_space<any>>) dst(%650 : memref<128xf32, #tpu.memory_space<vmem>>)
    %c2_i32_329 = arith.constant 2 : i32
    %c0_i32_330 = arith.constant 0 : i32
    %c0_i32_331 = arith.constant 0 : i32
    %653 = tpu.memref_slice %arg2[%24, %c0_i32_331] : memref<16x128xf32, #tpu.memory_space<any>> -> memref<1x128xf32, #tpu.memory_space<any>>
    %654 = tpu.memref_squeeze %653 : memref<1x128xf32, #tpu.memory_space<any>> -> memref<128xf32, #tpu.memory_space<any>>
    %c0_i32_332 = arith.constant 0 : i32
    %655 = tpu.memref_slice %arg6[%c2_i32_329, %c0_i32_332] : memref<64x128xf32, #tpu.memory_space<vmem>> -> memref<1x128xf32, #tpu.memory_space<vmem>>
    %656 = tpu.memref_squeeze %655 : memref<1x128xf32, #tpu.memory_space<vmem>> -> memref<128xf32, #tpu.memory_space<vmem>>
    %657 = tpu.memref_slice %arg7[%c0_i32_330] : memref<1x!tpu.dma_semaphore, #tpu.memory_space<semaphore_mem>> -> memref<1x!tpu.dma_semaphore, #tpu.memory_space<semaphore_mem>>
    %658 = tpu.memref_squeeze %657 : memref<1x!tpu.dma_semaphore, #tpu.memory_space<semaphore_mem>> -> memref<!tpu.dma_semaphore, #tpu.memory_space<semaphore_mem>>
    tpu.wait_dma2 semaphore(%658 : memref<!tpu.dma_semaphore, #tpu.memory_space<semaphore_mem>>) src(%654 : memref<128xf32, #tpu.memory_space<any>>) dst(%656 : memref<128xf32, #tpu.memory_space<vmem>>)
    %c3_i32_333 = arith.constant 3 : i32
    %c0_i32_334 = arith.constant 0 : i32
    %c0_i32_335 = arith.constant 0 : i32
    %659 = tpu.memref_slice %arg2[%34, %c0_i32_335] : memref<16x128xf32, #tpu.memory_space<any>> -> memref<1x128xf32, #tpu.memory_space<any>>
    %660 = tpu.memref_squeeze %659 : memref<1x128xf32, #tpu.memory_space<any>> -> memref<128xf32, #tpu.memory_space<any>>
    %c0_i32_336 = arith.constant 0 : i32
    %661 = tpu.memref_slice %arg6[%c3_i32_333, %c0_i32_336] : memref<64x128xf32, #tpu.memory_space<vmem>> -> memref<1x128xf32, #tpu.memory_space<vmem>>
    %662 = tpu.memref_squeeze %661 : memref<1x128xf32, #tpu.memory_space<vmem>> -> memref<128xf32, #tpu.memory_space<vmem>>
    %663 = tpu.memref_slice %arg7[%c0_i32_334] : memref<1x!tpu.dma_semaphore, #tpu.memory_space<semaphore_mem>> -> memref<1x!tpu.dma_semaphore, #tpu.memory_space<semaphore_mem>>
    %664 = tpu.memref_squeeze %663 : memref<1x!tpu.dma_semaphore, #tpu.memory_space<semaphore_mem>> -> memref<!tpu.dma_semaphore, #tpu.memory_space<semaphore_mem>>
    tpu.wait_dma2 semaphore(%664 : memref<!tpu.dma_semaphore, #tpu.memory_space<semaphore_mem>>) src(%660 : memref<128xf32, #tpu.memory_space<any>>) dst(%662 : memref<128xf32, #tpu.memory_space<vmem>>)
    %c4_i32_337 = arith.constant 4 : i32
    %c0_i32_338 = arith.constant 0 : i32
    %c0_i32_339 = arith.constant 0 : i32
    %665 = tpu.memref_slice %arg2[%44, %c0_i32_339] : memref<16x128xf32, #tpu.memory_space<any>> -> memref<1x128xf32, #tpu.memory_space<any>>
    %666 = tpu.memref_squeeze %665 : memref<1x128xf32, #tpu.memory_space<any>> -> memref<128xf32, #tpu.memory_space<any>>
    %c0_i32_340 = arith.constant 0 : i32
    %667 = tpu.memref_slice %arg6[%c4_i32_337, %c0_i32_340] : memref<64x128xf32, #tpu.memory_space<vmem>> -> memref<1x128xf32, #tpu.memory_space<vmem>>
    %668 = tpu.memref_squeeze %667 : memref<1x128xf32, #tpu.memory_space<vmem>> -> memref<128xf32, #tpu.memory_space<vmem>>
    %669 = tpu.memref_slice %arg7[%c0_i32_338] : memref<1x!tpu.dma_semaphore, #tpu.memory_space<semaphore_mem>> -> memref<1x!tpu.dma_semaphore, #tpu.memory_space<semaphore_mem>>
    %670 = tpu.memref_squeeze %669 : memref<1x!tpu.dma_semaphore, #tpu.memory_space<semaphore_mem>> -> memref<!tpu.dma_semaphore, #tpu.memory_space<semaphore_mem>>
    tpu.wait_dma2 semaphore(%670 : memref<!tpu.dma_semaphore, #tpu.memory_space<semaphore_mem>>) src(%666 : memref<128xf32, #tpu.memory_space<any>>) dst(%668 : memref<128xf32, #tpu.memory_space<vmem>>)
    %c5_i32_341 = arith.constant 5 : i32
    %c0_i32_342 = arith.constant 0 : i32
    %c0_i32_343 = arith.constant 0 : i32
    %671 = tpu.memref_slice %arg2[%54, %c0_i32_343] : memref<16x128xf32, #tpu.memory_space<any>> -> memref<1x128xf32, #tpu.memory_space<any>>
    %672 = tpu.memref_squeeze %671 : memref<1x128xf32, #tpu.memory_space<any>> -> memref<128xf32, #tpu.memory_space<any>>
    %c0_i32_344 = arith.constant 0 : i32
    %673 = tpu.memref_slice %arg6[%c5_i32_341, %c0_i32_344] : memref<64x128xf32, #tpu.memory_space<vmem>> -> memref<1x128xf32, #tpu.memory_space<vmem>>
    %674 = tpu.memref_squeeze %673 : memref<1x128xf32, #tpu.memory_space<vmem>> -> memref<128xf32, #tpu.memory_space<vmem>>
    %675 = tpu.memref_slice %arg7[%c0_i32_342] : memref<1x!tpu.dma_semaphore, #tpu.memory_space<semaphore_mem>> -> memref<1x!tpu.dma_semaphore, #tpu.memory_space<semaphore_mem>>
    %676 = tpu.memref_squeeze %675 : memref<1x!tpu.dma_semaphore, #tpu.memory_space<semaphore_mem>> -> memref<!tpu.dma_semaphore, #tpu.memory_space<semaphore_mem>>
    tpu.wait_dma2 semaphore(%676 : memref<!tpu.dma_semaphore, #tpu.memory_space<semaphore_mem>>) src(%672 : memref<128xf32, #tpu.memory_space<any>>) dst(%674 : memref<128xf32, #tpu.memory_space<vmem>>)
    %c6_i32_345 = arith.constant 6 : i32
    %c0_i32_346 = arith.constant 0 : i32
    %c0_i32_347 = arith.constant 0 : i32
    %677 = tpu.memref_slice %arg2[%64, %c0_i32_347] : memref<16x128xf32, #tpu.memory_space<any>> -> memref<1x128xf32, #tpu.memory_space<any>>
    %678 = tpu.memref_squeeze %677 : memref<1x128xf32, #tpu.memory_space<any>> -> memref<128xf32, #tpu.memory_space<any>>
    %c0_i32_348 = arith.constant 0 : i32
    %679 = tpu.memref_slice %arg6[%c6_i32_345, %c0_i32_348] : memref<64x128xf32, #tpu.memory_space<vmem>> -> memref<1x128xf32, #tpu.memory_space<vmem>>
    %680 = tpu.memref_squeeze %679 : memref<1x128xf32, #tpu.memory_space<vmem>> -> memref<128xf32, #tpu.memory_space<vmem>>
    %681 = tpu.memref_slice %arg7[%c0_i32_346] : memref<1x!tpu.dma_semaphore, #tpu.memory_space<semaphore_mem>> -> memref<1x!tpu.dma_semaphore, #tpu.memory_space<semaphore_mem>>
    %682 = tpu.memref_squeeze %681 : memref<1x!tpu.dma_semaphore, #tpu.memory_space<semaphore_mem>> -> memref<!tpu.dma_semaphore, #tpu.memory_space<semaphore_mem>>
    tpu.wait_dma2 semaphore(%682 : memref<!tpu.dma_semaphore, #tpu.memory_space<semaphore_mem>>) src(%678 : memref<128xf32, #tpu.memory_space<any>>) dst(%680 : memref<128xf32, #tpu.memory_space<vmem>>)
    %c7_i32_349 = arith.constant 7 : i32
    %c0_i32_350 = arith.constant 0 : i32
    %c0_i32_351 = arith.constant 0 : i32
    %683 = tpu.memref_slice %arg2[%74, %c0_i32_351] : memref<16x128xf32, #tpu.memory_space<any>> -> memref<1x128xf32, #tpu.memory_space<any>>
    %684 = tpu.memref_squeeze %683 : memref<1x128xf32, #tpu.memory_space<any>> -> memref<128xf32, #tpu.memory_space<any>>
    %c0_i32_352 = arith.constant 0 : i32
    %685 = tpu.memref_slice %arg6[%c7_i32_349, %c0_i32_352] : memref<64x128xf32, #tpu.memory_space<vmem>> -> memref<1x128xf32, #tpu.memory_space<vmem>>
    %686 = tpu.memref_squeeze %685 : memref<1x128xf32, #tpu.memory_space<vmem>> -> memref<128xf32, #tpu.memory_space<vmem>>
    %687 = tpu.memref_slice %arg7[%c0_i32_350] : memref<1x!tpu.dma_semaphore, #tpu.memory_space<semaphore_mem>> -> memref<1x!tpu.dma_semaphore, #tpu.memory_space<semaphore_mem>>
    %688 = tpu.memref_squeeze %687 : memref<1x!tpu.dma_semaphore, #tpu.memory_space<semaphore_mem>> -> memref<!tpu.dma_semaphore, #tpu.memory_space<semaphore_mem>>
    tpu.wait_dma2 semaphore(%688 : memref<!tpu.dma_semaphore, #tpu.memory_space<semaphore_mem>>) src(%684 : memref<128xf32, #tpu.memory_space<any>>) dst(%686 : memref<128xf32, #tpu.memory_space<vmem>>)
    %c8_i32_353 = arith.constant 8 : i32
    %c0_i32_354 = arith.constant 0 : i32
    %c0_i32_355 = arith.constant 0 : i32
    %689 = tpu.memref_slice %arg2[%84, %c0_i32_355] : memref<16x128xf32, #tpu.memory_space<any>> -> memref<1x128xf32, #tpu.memory_space<any>>
    %690 = tpu.memref_squeeze %689 : memref<1x128xf32, #tpu.memory_space<any>> -> memref<128xf32, #tpu.memory_space<any>>
    %c0_i32_356 = arith.constant 0 : i32
    %691 = tpu.memref_slice %arg6[%c8_i32_353, %c0_i32_356] : memref<64x128xf32, #tpu.memory_space<vmem>> -> memref<1x128xf32, #tpu.memory_space<vmem>>
    %692 = tpu.memref_squeeze %691 : memref<1x128xf32, #tpu.memory_space<vmem>> -> memref<128xf32, #tpu.memory_space<vmem>>
    %693 = tpu.memref_slice %arg7[%c0_i32_354] : memref<1x!tpu.dma_semaphore, #tpu.memory_space<semaphore_mem>> -> memref<1x!tpu.dma_semaphore, #tpu.memory_space<semaphore_mem>>
    %694 = tpu.memref_squeeze %693 : memref<1x!tpu.dma_semaphore, #tpu.memory_space<semaphore_mem>> -> memref<!tpu.dma_semaphore, #tpu.memory_space<semaphore_mem>>
    tpu.wait_dma2 semaphore(%694 : memref<!tpu.dma_semaphore, #tpu.memory_space<semaphore_mem>>) src(%690 : memref<128xf32, #tpu.memory_space<any>>) dst(%692 : memref<128xf32, #tpu.memory_space<vmem>>)
    %c9_i32_357 = arith.constant 9 : i32
    %c0_i32_358 = arith.constant 0 : i32
    %c0_i32_359 = arith.constant 0 : i32
    %695 = tpu.memref_slice %arg2[%94, %c0_i32_359] : memref<16x128xf32, #tpu.memory_space<any>> -> memref<1x128xf32, #tpu.memory_space<any>>
    %696 = tpu.memref_squeeze %695 : memref<1x128xf32, #tpu.memory_space<any>> -> memref<128xf32, #tpu.memory_space<any>>
    %c0_i32_360 = arith.constant 0 : i32
    %697 = tpu.memref_slice %arg6[%c9_i32_357, %c0_i32_360] : memref<64x128xf32, #tpu.memory_space<vmem>> -> memref<1x128xf32, #tpu.memory_space<vmem>>
    %698 = tpu.memref_squeeze %697 : memref<1x128xf32, #tpu.memory_space<vmem>> -> memref<128xf32, #tpu.memory_space<vmem>>
    %699 = tpu.memref_slice %arg7[%c0_i32_358] : memref<1x!tpu.dma_semaphore, #tpu.memory_space<semaphore_mem>> -> memref<1x!tpu.dma_semaphore, #tpu.memory_space<semaphore_mem>>
    %700 = tpu.memref_squeeze %699 : memref<1x!tpu.dma_semaphore, #tpu.memory_space<semaphore_mem>> -> memref<!tpu.dma_semaphore, #tpu.memory_space<semaphore_mem>>
    tpu.wait_dma2 semaphore(%700 : memref<!tpu.dma_semaphore, #tpu.memory_space<semaphore_mem>>) src(%696 : memref<128xf32, #tpu.memory_space<any>>) dst(%698 : memref<128xf32, #tpu.memory_space<vmem>>)
    %c10_i32_361 = arith.constant 10 : i32
    %c0_i32_362 = arith.constant 0 : i32
    %c0_i32_363 = arith.constant 0 : i32
    %701 = tpu.memref_slice %arg2[%104, %c0_i32_363] : memref<16x128xf32, #tpu.memory_space<any>> -> memref<1x128xf32, #tpu.memory_space<any>>
    %702 = tpu.memref_squeeze %701 : memref<1x128xf32, #tpu.memory_space<any>> -> memref<128xf32, #tpu.memory_space<any>>
    %c0_i32_364 = arith.constant 0 : i32
    %703 = tpu.memref_slice %arg6[%c10_i32_361, %c0_i32_364] : memref<64x128xf32, #tpu.memory_space<vmem>> -> memref<1x128xf32, #tpu.memory_space<vmem>>
    %704 = tpu.memref_squeeze %703 : memref<1x128xf32, #tpu.memory_space<vmem>> -> memref<128xf32, #tpu.memory_space<vmem>>
    %705 = tpu.memref_slice %arg7[%c0_i32_362] : memref<1x!tpu.dma_semaphore, #tpu.memory_space<semaphore_mem>> -> memref<1x!tpu.dma_semaphore, #tpu.memory_space<semaphore_mem>>
    %706 = tpu.memref_squeeze %705 : memref<1x!tpu.dma_semaphore, #tpu.memory_space<semaphore_mem>> -> memref<!tpu.dma_semaphore, #tpu.memory_space<semaphore_mem>>
    tpu.wait_dma2 semaphore(%706 : memref<!tpu.dma_semaphore, #tpu.memory_space<semaphore_mem>>) src(%702 : memref<128xf32, #tpu.memory_space<any>>) dst(%704 : memref<128xf32, #tpu.memory_space<vmem>>)
    %c11_i32_365 = arith.constant 11 : i32
    %c0_i32_366 = arith.constant 0 : i32
    %c0_i32_367 = arith.constant 0 : i32
    %707 = tpu.memref_slice %arg2[%114, %c0_i32_367] : memref<16x128xf32, #tpu.memory_space<any>> -> memref<1x128xf32, #tpu.memory_space<any>>
    %708 = tpu.memref_squeeze %707 : memref<1x128xf32, #tpu.memory_space<any>> -> memref<128xf32, #tpu.memory_space<any>>
    %c0_i32_368 = arith.constant 0 : i32
    %709 = tpu.memref_slice %arg6[%c11_i32_365, %c0_i32_368] : memref<64x128xf32, #tpu.memory_space<vmem>> -> memref<1x128xf32, #tpu.memory_space<vmem>>
    %710 = tpu.memref_squeeze %709 : memref<1x128xf32, #tpu.memory_space<vmem>> -> memref<128xf32, #tpu.memory_space<vmem>>
    %711 = tpu.memref_slice %arg7[%c0_i32_366] : memref<1x!tpu.dma_semaphore, #tpu.memory_space<semaphore_mem>> -> memref<1x!tpu.dma_semaphore, #tpu.memory_space<semaphore_mem>>
    %712 = tpu.memref_squeeze %711 : memref<1x!tpu.dma_semaphore, #tpu.memory_space<semaphore_mem>> -> memref<!tpu.dma_semaphore, #tpu.memory_space<semaphore_mem>>
    tpu.wait_dma2 semaphore(%712 : memref<!tpu.dma_semaphore, #tpu.memory_space<semaphore_mem>>) src(%708 : memref<128xf32, #tpu.memory_space<any>>) dst(%710 : memref<128xf32, #tpu.memory_space<vmem>>)
    %c12_i32_369 = arith.constant 12 : i32
    %c0_i32_370 = arith.constant 0 : i32
    %c0_i32_371 = arith.constant 0 : i32
    %713 = tpu.memref_slice %arg2[%124, %c0_i32_371] : memref<16x128xf32, #tpu.memory_space<any>> -> memref<1x128xf32, #tpu.memory_space<any>>
    %714 = tpu.memref_squeeze %713 : memref<1x128xf32, #tpu.memory_space<any>> -> memref<128xf32, #tpu.memory_space<any>>
    %c0_i32_372 = arith.constant 0 : i32
    %715 = tpu.memref_slice %arg6[%c12_i32_369, %c0_i32_372] : memref<64x128xf32, #tpu.memory_space<vmem>> -> memref<1x128xf32, #tpu.memory_space<vmem>>
    %716 = tpu.memref_squeeze %715 : memref<1x128xf32, #tpu.memory_space<vmem>> -> memref<128xf32, #tpu.memory_space<vmem>>
    %717 = tpu.memref_slice %arg7[%c0_i32_370] : memref<1x!tpu.dma_semaphore, #tpu.memory_space<semaphore_mem>> -> memref<1x!tpu.dma_semaphore, #tpu.memory_space<semaphore_mem>>
    %718 = tpu.memref_squeeze %717 : memref<1x!tpu.dma_semaphore, #tpu.memory_space<semaphore_mem>> -> memref<!tpu.dma_semaphore, #tpu.memory_space<semaphore_mem>>
    tpu.wait_dma2 semaphore(%718 : memref<!tpu.dma_semaphore, #tpu.memory_space<semaphore_mem>>) src(%714 : memref<128xf32, #tpu.memory_space<any>>) dst(%716 : memref<128xf32, #tpu.memory_space<vmem>>)
    %c13_i32_373 = arith.constant 13 : i32
    %c0_i32_374 = arith.constant 0 : i32
    %c0_i32_375 = arith.constant 0 : i32
    %719 = tpu.memref_slice %arg2[%134, %c0_i32_375] : memref<16x128xf32, #tpu.memory_space<any>> -> memref<1x128xf32, #tpu.memory_space<any>>
    %720 = tpu.memref_squeeze %719 : memref<1x128xf32, #tpu.memory_space<any>> -> memref<128xf32, #tpu.memory_space<any>>
    %c0_i32_376 = arith.constant 0 : i32
    %721 = tpu.memref_slice %arg6[%c13_i32_373, %c0_i32_376] : memref<64x128xf32, #tpu.memory_space<vmem>> -> memref<1x128xf32, #tpu.memory_space<vmem>>
    %722 = tpu.memref_squeeze %721 : memref<1x128xf32, #tpu.memory_space<vmem>> -> memref<128xf32, #tpu.memory_space<vmem>>
    %723 = tpu.memref_slice %arg7[%c0_i32_374] : memref<1x!tpu.dma_semaphore, #tpu.memory_space<semaphore_mem>> -> memref<1x!tpu.dma_semaphore, #tpu.memory_space<semaphore_mem>>
    %724 = tpu.memref_squeeze %723 : memref<1x!tpu.dma_semaphore, #tpu.memory_space<semaphore_mem>> -> memref<!tpu.dma_semaphore, #tpu.memory_space<semaphore_mem>>
    tpu.wait_dma2 semaphore(%724 : memref<!tpu.dma_semaphore, #tpu.memory_space<semaphore_mem>>) src(%720 : memref<128xf32, #tpu.memory_space<any>>) dst(%722 : memref<128xf32, #tpu.memory_space<vmem>>)
    %c14_i32_377 = arith.constant 14 : i32
    %c0_i32_378 = arith.constant 0 : i32
    %c0_i32_379 = arith.constant 0 : i32
    %725 = tpu.memref_slice %arg2[%144, %c0_i32_379] : memref<16x128xf32, #tpu.memory_space<any>> -> memref<1x128xf32, #tpu.memory_space<any>>
    %726 = tpu.memref_squeeze %725 : memref<1x128xf32, #tpu.memory_space<any>> -> memref<128xf32, #tpu.memory_space<any>>
    %c0_i32_380 = arith.constant 0 : i32
    %727 = tpu.memref_slice %arg6[%c14_i32_377, %c0_i32_380] : memref<64x128xf32, #tpu.memory_space<vmem>> -> memref<1x128xf32, #tpu.memory_space<vmem>>
    %728 = tpu.memref_squeeze %727 : memref<1x128xf32, #tpu.memory_space<vmem>> -> memref<128xf32, #tpu.memory_space<vmem>>
    %729 = tpu.memref_slice %arg7[%c0_i32_378] : memref<1x!tpu.dma_semaphore, #tpu.memory_space<semaphore_mem>> -> memref<1x!tpu.dma_semaphore, #tpu.memory_space<semaphore_mem>>
    %730 = tpu.memref_squeeze %729 : memref<1x!tpu.dma_semaphore, #tpu.memory_space<semaphore_mem>> -> memref<!tpu.dma_semaphore, #tpu.memory_space<semaphore_mem>>
    tpu.wait_dma2 semaphore(%730 : memref<!tpu.dma_semaphore, #tpu.memory_space<semaphore_mem>>) src(%726 : memref<128xf32, #tpu.memory_space<any>>) dst(%728 : memref<128xf32, #tpu.memory_space<vmem>>)
    %c15_i32_381 = arith.constant 15 : i32
    %c0_i32_382 = arith.constant 0 : i32
    %c0_i32_383 = arith.constant 0 : i32
    %731 = tpu.memref_slice %arg2[%154, %c0_i32_383] : memref<16x128xf32, #tpu.memory_space<any>> -> memref<1x128xf32, #tpu.memory_space<any>>
    %732 = tpu.memref_squeeze %731 : memref<1x128xf32, #tpu.memory_space<any>> -> memref<128xf32, #tpu.memory_space<any>>
    %c0_i32_384 = arith.constant 0 : i32
    %733 = tpu.memref_slice %arg6[%c15_i32_381, %c0_i32_384] : memref<64x128xf32, #tpu.memory_space<vmem>> -> memref<1x128xf32, #tpu.memory_space<vmem>>
    %734 = tpu.memref_squeeze %733 : memref<1x128xf32, #tpu.memory_space<vmem>> -> memref<128xf32, #tpu.memory_space<vmem>>
    %735 = tpu.memref_slice %arg7[%c0_i32_382] : memref<1x!tpu.dma_semaphore, #tpu.memory_space<semaphore_mem>> -> memref<1x!tpu.dma_semaphore, #tpu.memory_space<semaphore_mem>>
    %736 = tpu.memref_squeeze %735 : memref<1x!tpu.dma_semaphore, #tpu.memory_space<semaphore_mem>> -> memref<!tpu.dma_semaphore, #tpu.memory_space<semaphore_mem>>
    tpu.wait_dma2 semaphore(%736 : memref<!tpu.dma_semaphore, #tpu.memory_space<semaphore_mem>>) src(%732 : memref<128xf32, #tpu.memory_space<any>>) dst(%734 : memref<128xf32, #tpu.memory_space<vmem>>)
    %c16_i32_385 = arith.constant 16 : i32
    %c0_i32_386 = arith.constant 0 : i32
    %c0_i32_387 = arith.constant 0 : i32
    %737 = tpu.memref_slice %arg2[%164, %c0_i32_387] : memref<16x128xf32, #tpu.memory_space<any>> -> memref<1x128xf32, #tpu.memory_space<any>>
    %738 = tpu.memref_squeeze %737 : memref<1x128xf32, #tpu.memory_space<any>> -> memref<128xf32, #tpu.memory_space<any>>
    %c0_i32_388 = arith.constant 0 : i32
    %739 = tpu.memref_slice %arg6[%c16_i32_385, %c0_i32_388] : memref<64x128xf32, #tpu.memory_space<vmem>> -> memref<1x128xf32, #tpu.memory_space<vmem>>
    %740 = tpu.memref_squeeze %739 : memref<1x128xf32, #tpu.memory_space<vmem>> -> memref<128xf32, #tpu.memory_space<vmem>>
    %741 = tpu.memref_slice %arg7[%c0_i32_386] : memref<1x!tpu.dma_semaphore, #tpu.memory_space<semaphore_mem>> -> memref<1x!tpu.dma_semaphore, #tpu.memory_space<semaphore_mem>>
    %742 = tpu.memref_squeeze %741 : memref<1x!tpu.dma_semaphore, #tpu.memory_space<semaphore_mem>> -> memref<!tpu.dma_semaphore, #tpu.memory_space<semaphore_mem>>
    tpu.wait_dma2 semaphore(%742 : memref<!tpu.dma_semaphore, #tpu.memory_space<semaphore_mem>>) src(%738 : memref<128xf32, #tpu.memory_space<any>>) dst(%740 : memref<128xf32, #tpu.memory_space<vmem>>)
    %c17_i32_389 = arith.constant 17 : i32
    %c0_i32_390 = arith.constant 0 : i32
    %c0_i32_391 = arith.constant 0 : i32
    %743 = tpu.memref_slice %arg2[%174, %c0_i32_391] : memref<16x128xf32, #tpu.memory_space<any>> -> memref<1x128xf32, #tpu.memory_space<any>>
    %744 = tpu.memref_squeeze %743 : memref<1x128xf32, #tpu.memory_space<any>> -> memref<128xf32, #tpu.memory_space<any>>
    %c0_i32_392 = arith.constant 0 : i32
    %745 = tpu.memref_slice %arg6[%c17_i32_389, %c0_i32_392] : memref<64x128xf32, #tpu.memory_space<vmem>> -> memref<1x128xf32, #tpu.memory_space<vmem>>
    %746 = tpu.memref_squeeze %745 : memref<1x128xf32, #tpu.memory_space<vmem>> -> memref<128xf32, #tpu.memory_space<vmem>>
    %747 = tpu.memref_slice %arg7[%c0_i32_390] : memref<1x!tpu.dma_semaphore, #tpu.memory_space<semaphore_mem>> -> memref<1x!tpu.dma_semaphore, #tpu.memory_space<semaphore_mem>>
    %748 = tpu.memref_squeeze %747 : memref<1x!tpu.dma_semaphore, #tpu.memory_space<semaphore_mem>> -> memref<!tpu.dma_semaphore, #tpu.memory_space<semaphore_mem>>
    tpu.wait_dma2 semaphore(%748 : memref<!tpu.dma_semaphore, #tpu.memory_space<semaphore_mem>>) src(%744 : memref<128xf32, #tpu.memory_space<any>>) dst(%746 : memref<128xf32, #tpu.memory_space<vmem>>)
    %c18_i32_393 = arith.constant 18 : i32
    %c0_i32_394 = arith.constant 0 : i32
    %c0_i32_395 = arith.constant 0 : i32
    %749 = tpu.memref_slice %arg2[%184, %c0_i32_395] : memref<16x128xf32, #tpu.memory_space<any>> -> memref<1x128xf32, #tpu.memory_space<any>>
    %750 = tpu.memref_squeeze %749 : memref<1x128xf32, #tpu.memory_space<any>> -> memref<128xf32, #tpu.memory_space<any>>
    %c0_i32_396 = arith.constant 0 : i32
    %751 = tpu.memref_slice %arg6[%c18_i32_393, %c0_i32_396] : memref<64x128xf32, #tpu.memory_space<vmem>> -> memref<1x128xf32, #tpu.memory_space<vmem>>
    %752 = tpu.memref_squeeze %751 : memref<1x128xf32, #tpu.memory_space<vmem>> -> memref<128xf32, #tpu.memory_space<vmem>>
    %753 = tpu.memref_slice %arg7[%c0_i32_394] : memref<1x!tpu.dma_semaphore, #tpu.memory_space<semaphore_mem>> -> memref<1x!tpu.dma_semaphore, #tpu.memory_space<semaphore_mem>>
    %754 = tpu.memref_squeeze %753 : memref<1x!tpu.dma_semaphore, #tpu.memory_space<semaphore_mem>> -> memref<!tpu.dma_semaphore, #tpu.memory_space<semaphore_mem>>
    tpu.wait_dma2 semaphore(%754 : memref<!tpu.dma_semaphore, #tpu.memory_space<semaphore_mem>>) src(%750 : memref<128xf32, #tpu.memory_space<any>>) dst(%752 : memref<128xf32, #tpu.memory_space<vmem>>)
    %c19_i32_397 = arith.constant 19 : i32
    %c0_i32_398 = arith.constant 0 : i32
    %c0_i32_399 = arith.constant 0 : i32
    %755 = tpu.memref_slice %arg2[%194, %c0_i32_399] : memref<16x128xf32, #tpu.memory_space<any>> -> memref<1x128xf32, #tpu.memory_space<any>>
    %756 = tpu.memref_squeeze %755 : memref<1x128xf32, #tpu.memory_space<any>> -> memref<128xf32, #tpu.memory_space<any>>
    %c0_i32_400 = arith.constant 0 : i32
    %757 = tpu.memref_slice %arg6[%c19_i32_397, %c0_i32_400] : memref<64x128xf32, #tpu.memory_space<vmem>> -> memref<1x128xf32, #tpu.memory_space<vmem>>
    %758 = tpu.memref_squeeze %757 : memref<1x128xf32, #tpu.memory_space<vmem>> -> memref<128xf32, #tpu.memory_space<vmem>>
    %759 = tpu.memref_slice %arg7[%c0_i32_398] : memref<1x!tpu.dma_semaphore, #tpu.memory_space<semaphore_mem>> -> memref<1x!tpu.dma_semaphore, #tpu.memory_space<semaphore_mem>>
    %760 = tpu.memref_squeeze %759 : memref<1x!tpu.dma_semaphore, #tpu.memory_space<semaphore_mem>> -> memref<!tpu.dma_semaphore, #tpu.memory_space<semaphore_mem>>
    tpu.wait_dma2 semaphore(%760 : memref<!tpu.dma_semaphore, #tpu.memory_space<semaphore_mem>>) src(%756 : memref<128xf32, #tpu.memory_space<any>>) dst(%758 : memref<128xf32, #tpu.memory_space<vmem>>)
    %c20_i32_401 = arith.constant 20 : i32
    %c0_i32_402 = arith.constant 0 : i32
    %c0_i32_403 = arith.constant 0 : i32
    %761 = tpu.memref_slice %arg2[%204, %c0_i32_403] : memref<16x128xf32, #tpu.memory_space<any>> -> memref<1x128xf32, #tpu.memory_space<any>>
    %762 = tpu.memref_squeeze %761 : memref<1x128xf32, #tpu.memory_space<any>> -> memref<128xf32, #tpu.memory_space<any>>
    %c0_i32_404 = arith.constant 0 : i32
    %763 = tpu.memref_slice %arg6[%c20_i32_401, %c0_i32_404] : memref<64x128xf32, #tpu.memory_space<vmem>> -> memref<1x128xf32, #tpu.memory_space<vmem>>
    %764 = tpu.memref_squeeze %763 : memref<1x128xf32, #tpu.memory_space<vmem>> -> memref<128xf32, #tpu.memory_space<vmem>>
    %765 = tpu.memref_slice %arg7[%c0_i32_402] : memref<1x!tpu.dma_semaphore, #tpu.memory_space<semaphore_mem>> -> memref<1x!tpu.dma_semaphore, #tpu.memory_space<semaphore_mem>>
    %766 = tpu.memref_squeeze %765 : memref<1x!tpu.dma_semaphore, #tpu.memory_space<semaphore_mem>> -> memref<!tpu.dma_semaphore, #tpu.memory_space<semaphore_mem>>
    tpu.wait_dma2 semaphore(%766 : memref<!tpu.dma_semaphore, #tpu.memory_space<semaphore_mem>>) src(%762 : memref<128xf32, #tpu.memory_space<any>>) dst(%764 : memref<128xf32, #tpu.memory_space<vmem>>)
    %c21_i32_405 = arith.constant 21 : i32
    %c0_i32_406 = arith.constant 0 : i32
    %c0_i32_407 = arith.constant 0 : i32
    %767 = tpu.memref_slice %arg2[%214, %c0_i32_407] : memref<16x128xf32, #tpu.memory_space<any>> -> memref<1x128xf32, #tpu.memory_space<any>>
    %768 = tpu.memref_squeeze %767 : memref<1x128xf32, #tpu.memory_space<any>> -> memref<128xf32, #tpu.memory_space<any>>
    %c0_i32_408 = arith.constant 0 : i32
    %769 = tpu.memref_slice %arg6[%c21_i32_405, %c0_i32_408] : memref<64x128xf32, #tpu.memory_space<vmem>> -> memref<1x128xf32, #tpu.memory_space<vmem>>
    %770 = tpu.memref_squeeze %769 : memref<1x128xf32, #tpu.memory_space<vmem>> -> memref<128xf32, #tpu.memory_space<vmem>>
    %771 = tpu.memref_slice %arg7[%c0_i32_406] : memref<1x!tpu.dma_semaphore, #tpu.memory_space<semaphore_mem>> -> memref<1x!tpu.dma_semaphore, #tpu.memory_space<semaphore_mem>>
    %772 = tpu.memref_squeeze %771 : memref<1x!tpu.dma_semaphore, #tpu.memory_space<semaphore_mem>> -> memref<!tpu.dma_semaphore, #tpu.memory_space<semaphore_mem>>
    tpu.wait_dma2 semaphore(%772 : memref<!tpu.dma_semaphore, #tpu.memory_space<semaphore_mem>>) src(%768 : memref<128xf32, #tpu.memory_space<any>>) dst(%770 : memref<128xf32, #tpu.memory_space<vmem>>)
    %c22_i32_409 = arith.constant 22 : i32
    %c0_i32_410 = arith.constant 0 : i32
    %c0_i32_411 = arith.constant 0 : i32
    %773 = tpu.memref_slice %arg2[%224, %c0_i32_411] : memref<16x128xf32, #tpu.memory_space<any>> -> memref<1x128xf32, #tpu.memory_space<any>>
    %774 = tpu.memref_squeeze %773 : memref<1x128xf32, #tpu.memory_space<any>> -> memref<128xf32, #tpu.memory_space<any>>
    %c0_i32_412 = arith.constant 0 : i32
    %775 = tpu.memref_slice %arg6[%c22_i32_409, %c0_i32_412] : memref<64x128xf32, #tpu.memory_space<vmem>> -> memref<1x128xf32, #tpu.memory_space<vmem>>
    %776 = tpu.memref_squeeze %775 : memref<1x128xf32, #tpu.memory_space<vmem>> -> memref<128xf32, #tpu.memory_space<vmem>>
    %777 = tpu.memref_slice %arg7[%c0_i32_410] : memref<1x!tpu.dma_semaphore, #tpu.memory_space<semaphore_mem>> -> memref<1x!tpu.dma_semaphore, #tpu.memory_space<semaphore_mem>>
    %778 = tpu.memref_squeeze %777 : memref<1x!tpu.dma_semaphore, #tpu.memory_space<semaphore_mem>> -> memref<!tpu.dma_semaphore, #tpu.memory_space<semaphore_mem>>
    tpu.wait_dma2 semaphore(%778 : memref<!tpu.dma_semaphore, #tpu.memory_space<semaphore_mem>>) src(%774 : memref<128xf32, #tpu.memory_space<any>>) dst(%776 : memref<128xf32, #tpu.memory_space<vmem>>)
    %c23_i32_413 = arith.constant 23 : i32
    %c0_i32_414 = arith.constant 0 : i32
    %c0_i32_415 = arith.constant 0 : i32
    %779 = tpu.memref_slice %arg2[%234, %c0_i32_415] : memref<16x128xf32, #tpu.memory_space<any>> -> memref<1x128xf32, #tpu.memory_space<any>>
    %780 = tpu.memref_squeeze %779 : memref<1x128xf32, #tpu.memory_space<any>> -> memref<128xf32, #tpu.memory_space<any>>
    %c0_i32_416 = arith.constant 0 : i32
    %781 = tpu.memref_slice %arg6[%c23_i32_413, %c0_i32_416] : memref<64x128xf32, #tpu.memory_space<vmem>> -> memref<1x128xf32, #tpu.memory_space<vmem>>
    %782 = tpu.memref_squeeze %781 : memref<1x128xf32, #tpu.memory_space<vmem>> -> memref<128xf32, #tpu.memory_space<vmem>>
    %783 = tpu.memref_slice %arg7[%c0_i32_414] : memref<1x!tpu.dma_semaphore, #tpu.memory_space<semaphore_mem>> -> memref<1x!tpu.dma_semaphore, #tpu.memory_space<semaphore_mem>>
    %784 = tpu.memref_squeeze %783 : memref<1x!tpu.dma_semaphore, #tpu.memory_space<semaphore_mem>> -> memref<!tpu.dma_semaphore, #tpu.memory_space<semaphore_mem>>
    tpu.wait_dma2 semaphore(%784 : memref<!tpu.dma_semaphore, #tpu.memory_space<semaphore_mem>>) src(%780 : memref<128xf32, #tpu.memory_space<any>>) dst(%782 : memref<128xf32, #tpu.memory_space<vmem>>)
    %c24_i32_417 = arith.constant 24 : i32
    %c0_i32_418 = arith.constant 0 : i32
    %c0_i32_419 = arith.constant 0 : i32
    %785 = tpu.memref_slice %arg2[%244, %c0_i32_419] : memref<16x128xf32, #tpu.memory_space<any>> -> memref<1x128xf32, #tpu.memory_space<any>>
    %786 = tpu.memref_squeeze %785 : memref<1x128xf32, #tpu.memory_space<any>> -> memref<128xf32, #tpu.memory_space<any>>
    %c0_i32_420 = arith.constant 0 : i32
    %787 = tpu.memref_slice %arg6[%c24_i32_417, %c0_i32_420] : memref<64x128xf32, #tpu.memory_space<vmem>> -> memref<1x128xf32, #tpu.memory_space<vmem>>
    %788 = tpu.memref_squeeze %787 : memref<1x128xf32, #tpu.memory_space<vmem>> -> memref<128xf32, #tpu.memory_space<vmem>>
    %789 = tpu.memref_slice %arg7[%c0_i32_418] : memref<1x!tpu.dma_semaphore, #tpu.memory_space<semaphore_mem>> -> memref<1x!tpu.dma_semaphore, #tpu.memory_space<semaphore_mem>>
    %790 = tpu.memref_squeeze %789 : memref<1x!tpu.dma_semaphore, #tpu.memory_space<semaphore_mem>> -> memref<!tpu.dma_semaphore, #tpu.memory_space<semaphore_mem>>
    tpu.wait_dma2 semaphore(%790 : memref<!tpu.dma_semaphore, #tpu.memory_space<semaphore_mem>>) src(%786 : memref<128xf32, #tpu.memory_space<any>>) dst(%788 : memref<128xf32, #tpu.memory_space<vmem>>)
    %c25_i32_421 = arith.constant 25 : i32
    %c0_i32_422 = arith.constant 0 : i32
    %c0_i32_423 = arith.constant 0 : i32
    %791 = tpu.memref_slice %arg2[%254, %c0_i32_423] : memref<16x128xf32, #tpu.memory_space<any>> -> memref<1x128xf32, #tpu.memory_space<any>>
    %792 = tpu.memref_squeeze %791 : memref<1x128xf32, #tpu.memory_space<any>> -> memref<128xf32, #tpu.memory_space<any>>
    %c0_i32_424 = arith.constant 0 : i32
    %793 = tpu.memref_slice %arg6[%c25_i32_421, %c0_i32_424] : memref<64x128xf32, #tpu.memory_space<vmem>> -> memref<1x128xf32, #tpu.memory_space<vmem>>
    %794 = tpu.memref_squeeze %793 : memref<1x128xf32, #tpu.memory_space<vmem>> -> memref<128xf32, #tpu.memory_space<vmem>>
    %795 = tpu.memref_slice %arg7[%c0_i32_422] : memref<1x!tpu.dma_semaphore, #tpu.memory_space<semaphore_mem>> -> memref<1x!tpu.dma_semaphore, #tpu.memory_space<semaphore_mem>>
    %796 = tpu.memref_squeeze %795 : memref<1x!tpu.dma_semaphore, #tpu.memory_space<semaphore_mem>> -> memref<!tpu.dma_semaphore, #tpu.memory_space<semaphore_mem>>
    tpu.wait_dma2 semaphore(%796 : memref<!tpu.dma_semaphore, #tpu.memory_space<semaphore_mem>>) src(%792 : memref<128xf32, #tpu.memory_space<any>>) dst(%794 : memref<128xf32, #tpu.memory_space<vmem>>)
    %c26_i32_425 = arith.constant 26 : i32
    %c0_i32_426 = arith.constant 0 : i32
    %c0_i32_427 = arith.constant 0 : i32
    %797 = tpu.memref_slice %arg2[%264, %c0_i32_427] : memref<16x128xf32, #tpu.memory_space<any>> -> memref<1x128xf32, #tpu.memory_space<any>>
    %798 = tpu.memref_squeeze %797 : memref<1x128xf32, #tpu.memory_space<any>> -> memref<128xf32, #tpu.memory_space<any>>
    %c0_i32_428 = arith.constant 0 : i32
    %799 = tpu.memref_slice %arg6[%c26_i32_425, %c0_i32_428] : memref<64x128xf32, #tpu.memory_space<vmem>> -> memref<1x128xf32, #tpu.memory_space<vmem>>
    %800 = tpu.memref_squeeze %799 : memref<1x128xf32, #tpu.memory_space<vmem>> -> memref<128xf32, #tpu.memory_space<vmem>>
    %801 = tpu.memref_slice %arg7[%c0_i32_426] : memref<1x!tpu.dma_semaphore, #tpu.memory_space<semaphore_mem>> -> memref<1x!tpu.dma_semaphore, #tpu.memory_space<semaphore_mem>>
    %802 = tpu.memref_squeeze %801 : memref<1x!tpu.dma_semaphore, #tpu.memory_space<semaphore_mem>> -> memref<!tpu.dma_semaphore, #tpu.memory_space<semaphore_mem>>
    tpu.wait_dma2 semaphore(%802 : memref<!tpu.dma_semaphore, #tpu.memory_space<semaphore_mem>>) src(%798 : memref<128xf32, #tpu.memory_space<any>>) dst(%800 : memref<128xf32, #tpu.memory_space<vmem>>)
    %c27_i32_429 = arith.constant 27 : i32
    %c0_i32_430 = arith.constant 0 : i32
    %c0_i32_431 = arith.constant 0 : i32
    %803 = tpu.memref_slice %arg2[%274, %c0_i32_431] : memref<16x128xf32, #tpu.memory_space<any>> -> memref<1x128xf32, #tpu.memory_space<any>>
    %804 = tpu.memref_squeeze %803 : memref<1x128xf32, #tpu.memory_space<any>> -> memref<128xf32, #tpu.memory_space<any>>
    %c0_i32_432 = arith.constant 0 : i32
    %805 = tpu.memref_slice %arg6[%c27_i32_429, %c0_i32_432] : memref<64x128xf32, #tpu.memory_space<vmem>> -> memref<1x128xf32, #tpu.memory_space<vmem>>
    %806 = tpu.memref_squeeze %805 : memref<1x128xf32, #tpu.memory_space<vmem>> -> memref<128xf32, #tpu.memory_space<vmem>>
    %807 = tpu.memref_slice %arg7[%c0_i32_430] : memref<1x!tpu.dma_semaphore, #tpu.memory_space<semaphore_mem>> -> memref<1x!tpu.dma_semaphore, #tpu.memory_space<semaphore_mem>>
    %808 = tpu.memref_squeeze %807 : memref<1x!tpu.dma_semaphore, #tpu.memory_space<semaphore_mem>> -> memref<!tpu.dma_semaphore, #tpu.memory_space<semaphore_mem>>
    tpu.wait_dma2 semaphore(%808 : memref<!tpu.dma_semaphore, #tpu.memory_space<semaphore_mem>>) src(%804 : memref<128xf32, #tpu.memory_space<any>>) dst(%806 : memref<128xf32, #tpu.memory_space<vmem>>)
    %c28_i32_433 = arith.constant 28 : i32
    %c0_i32_434 = arith.constant 0 : i32
    %c0_i32_435 = arith.constant 0 : i32
    %809 = tpu.memref_slice %arg2[%284, %c0_i32_435] : memref<16x128xf32, #tpu.memory_space<any>> -> memref<1x128xf32, #tpu.memory_space<any>>
    %810 = tpu.memref_squeeze %809 : memref<1x128xf32, #tpu.memory_space<any>> -> memref<128xf32, #tpu.memory_space<any>>
    %c0_i32_436 = arith.constant 0 : i32
    %811 = tpu.memref_slice %arg6[%c28_i32_433, %c0_i32_436] : memref<64x128xf32, #tpu.memory_space<vmem>> -> memref<1x128xf32, #tpu.memory_space<vmem>>
    %812 = tpu.memref_squeeze %811 : memref<1x128xf32, #tpu.memory_space<vmem>> -> memref<128xf32, #tpu.memory_space<vmem>>
    %813 = tpu.memref_slice %arg7[%c0_i32_434] : memref<1x!tpu.dma_semaphore, #tpu.memory_space<semaphore_mem>> -> memref<1x!tpu.dma_semaphore, #tpu.memory_space<semaphore_mem>>
    %814 = tpu.memref_squeeze %813 : memref<1x!tpu.dma_semaphore, #tpu.memory_space<semaphore_mem>> -> memref<!tpu.dma_semaphore, #tpu.memory_space<semaphore_mem>>
    tpu.wait_dma2 semaphore(%814 : memref<!tpu.dma_semaphore, #tpu.memory_space<semaphore_mem>>) src(%810 : memref<128xf32, #tpu.memory_space<any>>) dst(%812 : memref<128xf32, #tpu.memory_space<vmem>>)
    %c29_i32_437 = arith.constant 29 : i32
    %c0_i32_438 = arith.constant 0 : i32
    %c0_i32_439 = arith.constant 0 : i32
    %815 = tpu.memref_slice %arg2[%294, %c0_i32_439] : memref<16x128xf32, #tpu.memory_space<any>> -> memref<1x128xf32, #tpu.memory_space<any>>
    %816 = tpu.memref_squeeze %815 : memref<1x128xf32, #tpu.memory_space<any>> -> memref<128xf32, #tpu.memory_space<any>>
    %c0_i32_440 = arith.constant 0 : i32
    %817 = tpu.memref_slice %arg6[%c29_i32_437, %c0_i32_440] : memref<64x128xf32, #tpu.memory_space<vmem>> -> memref<1x128xf32, #tpu.memory_space<vmem>>
    %818 = tpu.memref_squeeze %817 : memref<1x128xf32, #tpu.memory_space<vmem>> -> memref<128xf32, #tpu.memory_space<vmem>>
    %819 = tpu.memref_slice %arg7[%c0_i32_438] : memref<1x!tpu.dma_semaphore, #tpu.memory_space<semaphore_mem>> -> memref<1x!tpu.dma_semaphore, #tpu.memory_space<semaphore_mem>>
    %820 = tpu.memref_squeeze %819 : memref<1x!tpu.dma_semaphore, #tpu.memory_space<semaphore_mem>> -> memref<!tpu.dma_semaphore, #tpu.memory_space<semaphore_mem>>
    tpu.wait_dma2 semaphore(%820 : memref<!tpu.dma_semaphore, #tpu.memory_space<semaphore_mem>>) src(%816 : memref<128xf32, #tpu.memory_space<any>>) dst(%818 : memref<128xf32, #tpu.memory_space<vmem>>)
    %c30_i32_441 = arith.constant 30 : i32
    %c0_i32_442 = arith.constant 0 : i32
    %c0_i32_443 = arith.constant 0 : i32
    %821 = tpu.memref_slice %arg2[%304, %c0_i32_443] : memref<16x128xf32, #tpu.memory_space<any>> -> memref<1x128xf32, #tpu.memory_space<any>>
    %822 = tpu.memref_squeeze %821 : memref<1x128xf32, #tpu.memory_space<any>> -> memref<128xf32, #tpu.memory_space<any>>
    %c0_i32_444 = arith.constant 0 : i32
    %823 = tpu.memref_slice %arg6[%c30_i32_441, %c0_i32_444] : memref<64x128xf32, #tpu.memory_space<vmem>> -> memref<1x128xf32, #tpu.memory_space<vmem>>
    %824 = tpu.memref_squeeze %823 : memref<1x128xf32, #tpu.memory_space<vmem>> -> memref<128xf32, #tpu.memory_space<vmem>>
    %825 = tpu.memref_slice %arg7[%c0_i32_442] : memref<1x!tpu.dma_semaphore, #tpu.memory_space<semaphore_mem>> -> memref<1x!tpu.dma_semaphore, #tpu.memory_space<semaphore_mem>>
    %826 = tpu.memref_squeeze %825 : memref<1x!tpu.dma_semaphore, #tpu.memory_space<semaphore_mem>> -> memref<!tpu.dma_semaphore, #tpu.memory_space<semaphore_mem>>
    tpu.wait_dma2 semaphore(%826 : memref<!tpu.dma_semaphore, #tpu.memory_space<semaphore_mem>>) src(%822 : memref<128xf32, #tpu.memory_space<any>>) dst(%824 : memref<128xf32, #tpu.memory_space<vmem>>)
    %c31_i32_445 = arith.constant 31 : i32
    %c0_i32_446 = arith.constant 0 : i32
    %c0_i32_447 = arith.constant 0 : i32
    %827 = tpu.memref_slice %arg2[%314, %c0_i32_447] : memref<16x128xf32, #tpu.memory_space<any>> -> memref<1x128xf32, #tpu.memory_space<any>>
    %828 = tpu.memref_squeeze %827 : memref<1x128xf32, #tpu.memory_space<any>> -> memref<128xf32, #tpu.memory_space<any>>
    %c0_i32_448 = arith.constant 0 : i32
    %829 = tpu.memref_slice %arg6[%c31_i32_445, %c0_i32_448] : memref<64x128xf32, #tpu.memory_space<vmem>> -> memref<1x128xf32, #tpu.memory_space<vmem>>
    %830 = tpu.memref_squeeze %829 : memref<1x128xf32, #tpu.memory_space<vmem>> -> memref<128xf32, #tpu.memory_space<vmem>>
    %831 = tpu.memref_slice %arg7[%c0_i32_446] : memref<1x!tpu.dma_semaphore, #tpu.memory_space<semaphore_mem>> -> memref<1x!tpu.dma_semaphore, #tpu.memory_space<semaphore_mem>>
    %832 = tpu.memref_squeeze %831 : memref<1x!tpu.dma_semaphore, #tpu.memory_space<semaphore_mem>> -> memref<!tpu.dma_semaphore, #tpu.memory_space<semaphore_mem>>
    tpu.wait_dma2 semaphore(%832 : memref<!tpu.dma_semaphore, #tpu.memory_space<semaphore_mem>>) src(%828 : memref<128xf32, #tpu.memory_space<any>>) dst(%830 : memref<128xf32, #tpu.memory_space<vmem>>)
    %c32_i32_449 = arith.constant 32 : i32
    %c0_i32_450 = arith.constant 0 : i32
    %c0_i32_451 = arith.constant 0 : i32
    %833 = tpu.memref_slice %arg2[%324, %c0_i32_451] : memref<16x128xf32, #tpu.memory_space<any>> -> memref<1x128xf32, #tpu.memory_space<any>>
    %834 = tpu.memref_squeeze %833 : memref<1x128xf32, #tpu.memory_space<any>> -> memref<128xf32, #tpu.memory_space<any>>
    %c0_i32_452 = arith.constant 0 : i32
    %835 = tpu.memref_slice %arg6[%c32_i32_449, %c0_i32_452] : memref<64x128xf32, #tpu.memory_space<vmem>> -> memref<1x128xf32, #tpu.memory_space<vmem>>
    %836 = tpu.memref_squeeze %835 : memref<1x128xf32, #tpu.memory_space<vmem>> -> memref<128xf32, #tpu.memory_space<vmem>>
    %837 = tpu.memref_slice %arg7[%c0_i32_450] : memref<1x!tpu.dma_semaphore, #tpu.memory_space<semaphore_mem>> -> memref<1x!tpu.dma_semaphore, #tpu.memory_space<semaphore_mem>>
    %838 = tpu.memref_squeeze %837 : memref<1x!tpu.dma_semaphore, #tpu.memory_space<semaphore_mem>> -> memref<!tpu.dma_semaphore, #tpu.memory_space<semaphore_mem>>
    tpu.wait_dma2 semaphore(%838 : memref<!tpu.dma_semaphore, #tpu.memory_space<semaphore_mem>>) src(%834 : memref<128xf32, #tpu.memory_space<any>>) dst(%836 : memref<128xf32, #tpu.memory_space<vmem>>)
    %c33_i32_453 = arith.constant 33 : i32
    %c0_i32_454 = arith.constant 0 : i32
    %c0_i32_455 = arith.constant 0 : i32
    %839 = tpu.memref_slice %arg2[%334, %c0_i32_455] : memref<16x128xf32, #tpu.memory_space<any>> -> memref<1x128xf32, #tpu.memory_space<any>>
    %840 = tpu.memref_squeeze %839 : memref<1x128xf32, #tpu.memory_space<any>> -> memref<128xf32, #tpu.memory_space<any>>
    %c0_i32_456 = arith.constant 0 : i32
    %841 = tpu.memref_slice %arg6[%c33_i32_453, %c0_i32_456] : memref<64x128xf32, #tpu.memory_space<vmem>> -> memref<1x128xf32, #tpu.memory_space<vmem>>
    %842 = tpu.memref_squeeze %841 : memref<1x128xf32, #tpu.memory_space<vmem>> -> memref<128xf32, #tpu.memory_space<vmem>>
    %843 = tpu.memref_slice %arg7[%c0_i32_454] : memref<1x!tpu.dma_semaphore, #tpu.memory_space<semaphore_mem>> -> memref<1x!tpu.dma_semaphore, #tpu.memory_space<semaphore_mem>>
    %844 = tpu.memref_squeeze %843 : memref<1x!tpu.dma_semaphore, #tpu.memory_space<semaphore_mem>> -> memref<!tpu.dma_semaphore, #tpu.memory_space<semaphore_mem>>
    tpu.wait_dma2 semaphore(%844 : memref<!tpu.dma_semaphore, #tpu.memory_space<semaphore_mem>>) src(%840 : memref<128xf32, #tpu.memory_space<any>>) dst(%842 : memref<128xf32, #tpu.memory_space<vmem>>)
    %c34_i32_457 = arith.constant 34 : i32
    %c0_i32_458 = arith.constant 0 : i32
    %c0_i32_459 = arith.constant 0 : i32
    %845 = tpu.memref_slice %arg2[%344, %c0_i32_459] : memref<16x128xf32, #tpu.memory_space<any>> -> memref<1x128xf32, #tpu.memory_space<any>>
    %846 = tpu.memref_squeeze %845 : memref<1x128xf32, #tpu.memory_space<any>> -> memref<128xf32, #tpu.memory_space<any>>
    %c0_i32_460 = arith.constant 0 : i32
    %847 = tpu.memref_slice %arg6[%c34_i32_457, %c0_i32_460] : memref<64x128xf32, #tpu.memory_space<vmem>> -> memref<1x128xf32, #tpu.memory_space<vmem>>
    %848 = tpu.memref_squeeze %847 : memref<1x128xf32, #tpu.memory_space<vmem>> -> memref<128xf32, #tpu.memory_space<vmem>>
    %849 = tpu.memref_slice %arg7[%c0_i32_458] : memref<1x!tpu.dma_semaphore, #tpu.memory_space<semaphore_mem>> -> memref<1x!tpu.dma_semaphore, #tpu.memory_space<semaphore_mem>>
    %850 = tpu.memref_squeeze %849 : memref<1x!tpu.dma_semaphore, #tpu.memory_space<semaphore_mem>> -> memref<!tpu.dma_semaphore, #tpu.memory_space<semaphore_mem>>
    tpu.wait_dma2 semaphore(%850 : memref<!tpu.dma_semaphore, #tpu.memory_space<semaphore_mem>>) src(%846 : memref<128xf32, #tpu.memory_space<any>>) dst(%848 : memref<128xf32, #tpu.memory_space<vmem>>)
    %c35_i32_461 = arith.constant 35 : i32
    %c0_i32_462 = arith.constant 0 : i32
    %c0_i32_463 = arith.constant 0 : i32
    %851 = tpu.memref_slice %arg2[%354, %c0_i32_463] : memref<16x128xf32, #tpu.memory_space<any>> -> memref<1x128xf32, #tpu.memory_space<any>>
    %852 = tpu.memref_squeeze %851 : memref<1x128xf32, #tpu.memory_space<any>> -> memref<128xf32, #tpu.memory_space<any>>
    %c0_i32_464 = arith.constant 0 : i32
    %853 = tpu.memref_slice %arg6[%c35_i32_461, %c0_i32_464] : memref<64x128xf32, #tpu.memory_space<vmem>> -> memref<1x128xf32, #tpu.memory_space<vmem>>
    %854 = tpu.memref_squeeze %853 : memref<1x128xf32, #tpu.memory_space<vmem>> -> memref<128xf32, #tpu.memory_space<vmem>>
    %855 = tpu.memref_slice %arg7[%c0_i32_462] : memref<1x!tpu.dma_semaphore, #tpu.memory_space<semaphore_mem>> -> memref<1x!tpu.dma_semaphore, #tpu.memory_space<semaphore_mem>>
    %856 = tpu.memref_squeeze %855 : memref<1x!tpu.dma_semaphore, #tpu.memory_space<semaphore_mem>> -> memref<!tpu.dma_semaphore, #tpu.memory_space<semaphore_mem>>
    tpu.wait_dma2 semaphore(%856 : memref<!tpu.dma_semaphore, #tpu.memory_space<semaphore_mem>>) src(%852 : memref<128xf32, #tpu.memory_space<any>>) dst(%854 : memref<128xf32, #tpu.memory_space<vmem>>)
    %c36_i32_465 = arith.constant 36 : i32
    %c0_i32_466 = arith.constant 0 : i32
    %c0_i32_467 = arith.constant 0 : i32
    %857 = tpu.memref_slice %arg2[%364, %c0_i32_467] : memref<16x128xf32, #tpu.memory_space<any>> -> memref<1x128xf32, #tpu.memory_space<any>>
    %858 = tpu.memref_squeeze %857 : memref<1x128xf32, #tpu.memory_space<any>> -> memref<128xf32, #tpu.memory_space<any>>
    %c0_i32_468 = arith.constant 0 : i32
    %859 = tpu.memref_slice %arg6[%c36_i32_465, %c0_i32_468] : memref<64x128xf32, #tpu.memory_space<vmem>> -> memref<1x128xf32, #tpu.memory_space<vmem>>
    %860 = tpu.memref_squeeze %859 : memref<1x128xf32, #tpu.memory_space<vmem>> -> memref<128xf32, #tpu.memory_space<vmem>>
    %861 = tpu.memref_slice %arg7[%c0_i32_466] : memref<1x!tpu.dma_semaphore, #tpu.memory_space<semaphore_mem>> -> memref<1x!tpu.dma_semaphore, #tpu.memory_space<semaphore_mem>>
    %862 = tpu.memref_squeeze %861 : memref<1x!tpu.dma_semaphore, #tpu.memory_space<semaphore_mem>> -> memref<!tpu.dma_semaphore, #tpu.memory_space<semaphore_mem>>
    tpu.wait_dma2 semaphore(%862 : memref<!tpu.dma_semaphore, #tpu.memory_space<semaphore_mem>>) src(%858 : memref<128xf32, #tpu.memory_space<any>>) dst(%860 : memref<128xf32, #tpu.memory_space<vmem>>)
    %c37_i32_469 = arith.constant 37 : i32
    %c0_i32_470 = arith.constant 0 : i32
    %c0_i32_471 = arith.constant 0 : i32
    %863 = tpu.memref_slice %arg2[%374, %c0_i32_471] : memref<16x128xf32, #tpu.memory_space<any>> -> memref<1x128xf32, #tpu.memory_space<any>>
    %864 = tpu.memref_squeeze %863 : memref<1x128xf32, #tpu.memory_space<any>> -> memref<128xf32, #tpu.memory_space<any>>
    %c0_i32_472 = arith.constant 0 : i32
    %865 = tpu.memref_slice %arg6[%c37_i32_469, %c0_i32_472] : memref<64x128xf32, #tpu.memory_space<vmem>> -> memref<1x128xf32, #tpu.memory_space<vmem>>
    %866 = tpu.memref_squeeze %865 : memref<1x128xf32, #tpu.memory_space<vmem>> -> memref<128xf32, #tpu.memory_space<vmem>>
    %867 = tpu.memref_slice %arg7[%c0_i32_470] : memref<1x!tpu.dma_semaphore, #tpu.memory_space<semaphore_mem>> -> memref<1x!tpu.dma_semaphore, #tpu.memory_space<semaphore_mem>>
    %868 = tpu.memref_squeeze %867 : memref<1x!tpu.dma_semaphore, #tpu.memory_space<semaphore_mem>> -> memref<!tpu.dma_semaphore, #tpu.memory_space<semaphore_mem>>
    tpu.wait_dma2 semaphore(%868 : memref<!tpu.dma_semaphore, #tpu.memory_space<semaphore_mem>>) src(%864 : memref<128xf32, #tpu.memory_space<any>>) dst(%866 : memref<128xf32, #tpu.memory_space<vmem>>)
    %c38_i32_473 = arith.constant 38 : i32
    %c0_i32_474 = arith.constant 0 : i32
    %c0_i32_475 = arith.constant 0 : i32
    %869 = tpu.memref_slice %arg2[%384, %c0_i32_475] : memref<16x128xf32, #tpu.memory_space<any>> -> memref<1x128xf32, #tpu.memory_space<any>>
    %870 = tpu.memref_squeeze %869 : memref<1x128xf32, #tpu.memory_space<any>> -> memref<128xf32, #tpu.memory_space<any>>
    %c0_i32_476 = arith.constant 0 : i32
    %871 = tpu.memref_slice %arg6[%c38_i32_473, %c0_i32_476] : memref<64x128xf32, #tpu.memory_space<vmem>> -> memref<1x128xf32, #tpu.memory_space<vmem>>
    %872 = tpu.memref_squeeze %871 : memref<1x128xf32, #tpu.memory_space<vmem>> -> memref<128xf32, #tpu.memory_space<vmem>>
    %873 = tpu.memref_slice %arg7[%c0_i32_474] : memref<1x!tpu.dma_semaphore, #tpu.memory_space<semaphore_mem>> -> memref<1x!tpu.dma_semaphore, #tpu.memory_space<semaphore_mem>>
    %874 = tpu.memref_squeeze %873 : memref<1x!tpu.dma_semaphore, #tpu.memory_space<semaphore_mem>> -> memref<!tpu.dma_semaphore, #tpu.memory_space<semaphore_mem>>
    tpu.wait_dma2 semaphore(%874 : memref<!tpu.dma_semaphore, #tpu.memory_space<semaphore_mem>>) src(%870 : memref<128xf32, #tpu.memory_space<any>>) dst(%872 : memref<128xf32, #tpu.memory_space<vmem>>)
    %c39_i32_477 = arith.constant 39 : i32
    %c0_i32_478 = arith.constant 0 : i32
    %c0_i32_479 = arith.constant 0 : i32
    %875 = tpu.memref_slice %arg2[%394, %c0_i32_479] : memref<16x128xf32, #tpu.memory_space<any>> -> memref<1x128xf32, #tpu.memory_space<any>>
    %876 = tpu.memref_squeeze %875 : memref<1x128xf32, #tpu.memory_space<any>> -> memref<128xf32, #tpu.memory_space<any>>
    %c0_i32_480 = arith.constant 0 : i32
    %877 = tpu.memref_slice %arg6[%c39_i32_477, %c0_i32_480] : memref<64x128xf32, #tpu.memory_space<vmem>> -> memref<1x128xf32, #tpu.memory_space<vmem>>
    %878 = tpu.memref_squeeze %877 : memref<1x128xf32, #tpu.memory_space<vmem>> -> memref<128xf32, #tpu.memory_space<vmem>>
    %879 = tpu.memref_slice %arg7[%c0_i32_478] : memref<1x!tpu.dma_semaphore, #tpu.memory_space<semaphore_mem>> -> memref<1x!tpu.dma_semaphore, #tpu.memory_space<semaphore_mem>>
    %880 = tpu.memref_squeeze %879 : memref<1x!tpu.dma_semaphore, #tpu.memory_space<semaphore_mem>> -> memref<!tpu.dma_semaphore, #tpu.memory_space<semaphore_mem>>
    tpu.wait_dma2 semaphore(%880 : memref<!tpu.dma_semaphore, #tpu.memory_space<semaphore_mem>>) src(%876 : memref<128xf32, #tpu.memory_space<any>>) dst(%878 : memref<128xf32, #tpu.memory_space<vmem>>)
    %c40_i32_481 = arith.constant 40 : i32
    %c0_i32_482 = arith.constant 0 : i32
    %c0_i32_483 = arith.constant 0 : i32
    %881 = tpu.memref_slice %arg2[%404, %c0_i32_483] : memref<16x128xf32, #tpu.memory_space<any>> -> memref<1x128xf32, #tpu.memory_space<any>>
    %882 = tpu.memref_squeeze %881 : memref<1x128xf32, #tpu.memory_space<any>> -> memref<128xf32, #tpu.memory_space<any>>
    %c0_i32_484 = arith.constant 0 : i32
    %883 = tpu.memref_slice %arg6[%c40_i32_481, %c0_i32_484] : memref<64x128xf32, #tpu.memory_space<vmem>> -> memref<1x128xf32, #tpu.memory_space<vmem>>
    %884 = tpu.memref_squeeze %883 : memref<1x128xf32, #tpu.memory_space<vmem>> -> memref<128xf32, #tpu.memory_space<vmem>>
    %885 = tpu.memref_slice %arg7[%c0_i32_482] : memref<1x!tpu.dma_semaphore, #tpu.memory_space<semaphore_mem>> -> memref<1x!tpu.dma_semaphore, #tpu.memory_space<semaphore_mem>>
    %886 = tpu.memref_squeeze %885 : memref<1x!tpu.dma_semaphore, #tpu.memory_space<semaphore_mem>> -> memref<!tpu.dma_semaphore, #tpu.memory_space<semaphore_mem>>
    tpu.wait_dma2 semaphore(%886 : memref<!tpu.dma_semaphore, #tpu.memory_space<semaphore_mem>>) src(%882 : memref<128xf32, #tpu.memory_space<any>>) dst(%884 : memref<128xf32, #tpu.memory_space<vmem>>)
    %c41_i32_485 = arith.constant 41 : i32
    %c0_i32_486 = arith.constant 0 : i32
    %c0_i32_487 = arith.constant 0 : i32
    %887 = tpu.memref_slice %arg2[%414, %c0_i32_487] : memref<16x128xf32, #tpu.memory_space<any>> -> memref<1x128xf32, #tpu.memory_space<any>>
    %888 = tpu.memref_squeeze %887 : memref<1x128xf32, #tpu.memory_space<any>> -> memref<128xf32, #tpu.memory_space<any>>
    %c0_i32_488 = arith.constant 0 : i32
    %889 = tpu.memref_slice %arg6[%c41_i32_485, %c0_i32_488] : memref<64x128xf32, #tpu.memory_space<vmem>> -> memref<1x128xf32, #tpu.memory_space<vmem>>
    %890 = tpu.memref_squeeze %889 : memref<1x128xf32, #tpu.memory_space<vmem>> -> memref<128xf32, #tpu.memory_space<vmem>>
    %891 = tpu.memref_slice %arg7[%c0_i32_486] : memref<1x!tpu.dma_semaphore, #tpu.memory_space<semaphore_mem>> -> memref<1x!tpu.dma_semaphore, #tpu.memory_space<semaphore_mem>>
    %892 = tpu.memref_squeeze %891 : memref<1x!tpu.dma_semaphore, #tpu.memory_space<semaphore_mem>> -> memref<!tpu.dma_semaphore, #tpu.memory_space<semaphore_mem>>
    tpu.wait_dma2 semaphore(%892 : memref<!tpu.dma_semaphore, #tpu.memory_space<semaphore_mem>>) src(%888 : memref<128xf32, #tpu.memory_space<any>>) dst(%890 : memref<128xf32, #tpu.memory_space<vmem>>)
    %c42_i32_489 = arith.constant 42 : i32
    %c0_i32_490 = arith.constant 0 : i32
    %c0_i32_491 = arith.constant 0 : i32
    %893 = tpu.memref_slice %arg2[%424, %c0_i32_491] : memref<16x128xf32, #tpu.memory_space<any>> -> memref<1x128xf32, #tpu.memory_space<any>>
    %894 = tpu.memref_squeeze %893 : memref<1x128xf32, #tpu.memory_space<any>> -> memref<128xf32, #tpu.memory_space<any>>
    %c0_i32_492 = arith.constant 0 : i32
    %895 = tpu.memref_slice %arg6[%c42_i32_489, %c0_i32_492] : memref<64x128xf32, #tpu.memory_space<vmem>> -> memref<1x128xf32, #tpu.memory_space<vmem>>
    %896 = tpu.memref_squeeze %895 : memref<1x128xf32, #tpu.memory_space<vmem>> -> memref<128xf32, #tpu.memory_space<vmem>>
    %897 = tpu.memref_slice %arg7[%c0_i32_490] : memref<1x!tpu.dma_semaphore, #tpu.memory_space<semaphore_mem>> -> memref<1x!tpu.dma_semaphore, #tpu.memory_space<semaphore_mem>>
    %898 = tpu.memref_squeeze %897 : memref<1x!tpu.dma_semaphore, #tpu.memory_space<semaphore_mem>> -> memref<!tpu.dma_semaphore, #tpu.memory_space<semaphore_mem>>
    tpu.wait_dma2 semaphore(%898 : memref<!tpu.dma_semaphore, #tpu.memory_space<semaphore_mem>>) src(%894 : memref<128xf32, #tpu.memory_space<any>>) dst(%896 : memref<128xf32, #tpu.memory_space<vmem>>)
    %c43_i32_493 = arith.constant 43 : i32
    %c0_i32_494 = arith.constant 0 : i32
    %c0_i32_495 = arith.constant 0 : i32
    %899 = tpu.memref_slice %arg2[%434, %c0_i32_495] : memref<16x128xf32, #tpu.memory_space<any>> -> memref<1x128xf32, #tpu.memory_space<any>>
    %900 = tpu.memref_squeeze %899 : memref<1x128xf32, #tpu.memory_space<any>> -> memref<128xf32, #tpu.memory_space<any>>
    %c0_i32_496 = arith.constant 0 : i32
    %901 = tpu.memref_slice %arg6[%c43_i32_493, %c0_i32_496] : memref<64x128xf32, #tpu.memory_space<vmem>> -> memref<1x128xf32, #tpu.memory_space<vmem>>
    %902 = tpu.memref_squeeze %901 : memref<1x128xf32, #tpu.memory_space<vmem>> -> memref<128xf32, #tpu.memory_space<vmem>>
    %903 = tpu.memref_slice %arg7[%c0_i32_494] : memref<1x!tpu.dma_semaphore, #tpu.memory_space<semaphore_mem>> -> memref<1x!tpu.dma_semaphore, #tpu.memory_space<semaphore_mem>>
    %904 = tpu.memref_squeeze %903 : memref<1x!tpu.dma_semaphore, #tpu.memory_space<semaphore_mem>> -> memref<!tpu.dma_semaphore, #tpu.memory_space<semaphore_mem>>
    tpu.wait_dma2 semaphore(%904 : memref<!tpu.dma_semaphore, #tpu.memory_space<semaphore_mem>>) src(%900 : memref<128xf32, #tpu.memory_space<any>>) dst(%902 : memref<128xf32, #tpu.memory_space<vmem>>)
    %c44_i32_497 = arith.constant 44 : i32
    %c0_i32_498 = arith.constant 0 : i32
    %c0_i32_499 = arith.constant 0 : i32
    %905 = tpu.memref_slice %arg2[%444, %c0_i32_499] : memref<16x128xf32, #tpu.memory_space<any>> -> memref<1x128xf32, #tpu.memory_space<any>>
    %906 = tpu.memref_squeeze %905 : memref<1x128xf32, #tpu.memory_space<any>> -> memref<128xf32, #tpu.memory_space<any>>
    %c0_i32_500 = arith.constant 0 : i32
    %907 = tpu.memref_slice %arg6[%c44_i32_497, %c0_i32_500] : memref<64x128xf32, #tpu.memory_space<vmem>> -> memref<1x128xf32, #tpu.memory_space<vmem>>
    %908 = tpu.memref_squeeze %907 : memref<1x128xf32, #tpu.memory_space<vmem>> -> memref<128xf32, #tpu.memory_space<vmem>>
    %909 = tpu.memref_slice %arg7[%c0_i32_498] : memref<1x!tpu.dma_semaphore, #tpu.memory_space<semaphore_mem>> -> memref<1x!tpu.dma_semaphore, #tpu.memory_space<semaphore_mem>>
    %910 = tpu.memref_squeeze %909 : memref<1x!tpu.dma_semaphore, #tpu.memory_space<semaphore_mem>> -> memref<!tpu.dma_semaphore, #tpu.memory_space<semaphore_mem>>
    tpu.wait_dma2 semaphore(%910 : memref<!tpu.dma_semaphore, #tpu.memory_space<semaphore_mem>>) src(%906 : memref<128xf32, #tpu.memory_space<any>>) dst(%908 : memref<128xf32, #tpu.memory_space<vmem>>)
    %c45_i32_501 = arith.constant 45 : i32
    %c0_i32_502 = arith.constant 0 : i32
    %c0_i32_503 = arith.constant 0 : i32
    %911 = tpu.memref_slice %arg2[%454, %c0_i32_503] : memref<16x128xf32, #tpu.memory_space<any>> -> memref<1x128xf32, #tpu.memory_space<any>>
    %912 = tpu.memref_squeeze %911 : memref<1x128xf32, #tpu.memory_space<any>> -> memref<128xf32, #tpu.memory_space<any>>
    %c0_i32_504 = arith.constant 0 : i32
    %913 = tpu.memref_slice %arg6[%c45_i32_501, %c0_i32_504] : memref<64x128xf32, #tpu.memory_space<vmem>> -> memref<1x128xf32, #tpu.memory_space<vmem>>
    %914 = tpu.memref_squeeze %913 : memref<1x128xf32, #tpu.memory_space<vmem>> -> memref<128xf32, #tpu.memory_space<vmem>>
    %915 = tpu.memref_slice %arg7[%c0_i32_502] : memref<1x!tpu.dma_semaphore, #tpu.memory_space<semaphore_mem>> -> memref<1x!tpu.dma_semaphore, #tpu.memory_space<semaphore_mem>>
    %916 = tpu.memref_squeeze %915 : memref<1x!tpu.dma_semaphore, #tpu.memory_space<semaphore_mem>> -> memref<!tpu.dma_semaphore, #tpu.memory_space<semaphore_mem>>
    tpu.wait_dma2 semaphore(%916 : memref<!tpu.dma_semaphore, #tpu.memory_space<semaphore_mem>>) src(%912 : memref<128xf32, #tpu.memory_space<any>>) dst(%914 : memref<128xf32, #tpu.memory_space<vmem>>)
    %c46_i32_505 = arith.constant 46 : i32
    %c0_i32_506 = arith.constant 0 : i32
    %c0_i32_507 = arith.constant 0 : i32
    %917 = tpu.memref_slice %arg2[%464, %c0_i32_507] : memref<16x128xf32, #tpu.memory_space<any>> -> memref<1x128xf32, #tpu.memory_space<any>>
    %918 = tpu.memref_squeeze %917 : memref<1x128xf32, #tpu.memory_space<any>> -> memref<128xf32, #tpu.memory_space<any>>
    %c0_i32_508 = arith.constant 0 : i32
    %919 = tpu.memref_slice %arg6[%c46_i32_505, %c0_i32_508] : memref<64x128xf32, #tpu.memory_space<vmem>> -> memref<1x128xf32, #tpu.memory_space<vmem>>
    %920 = tpu.memref_squeeze %919 : memref<1x128xf32, #tpu.memory_space<vmem>> -> memref<128xf32, #tpu.memory_space<vmem>>
    %921 = tpu.memref_slice %arg7[%c0_i32_506] : memref<1x!tpu.dma_semaphore, #tpu.memory_space<semaphore_mem>> -> memref<1x!tpu.dma_semaphore, #tpu.memory_space<semaphore_mem>>
    %922 = tpu.memref_squeeze %921 : memref<1x!tpu.dma_semaphore, #tpu.memory_space<semaphore_mem>> -> memref<!tpu.dma_semaphore, #tpu.memory_space<semaphore_mem>>
    tpu.wait_dma2 semaphore(%922 : memref<!tpu.dma_semaphore, #tpu.memory_space<semaphore_mem>>) src(%918 : memref<128xf32, #tpu.memory_space<any>>) dst(%920 : memref<128xf32, #tpu.memory_space<vmem>>)
    %c47_i32_509 = arith.constant 47 : i32
    %c0_i32_510 = arith.constant 0 : i32
    %c0_i32_511 = arith.constant 0 : i32
    %923 = tpu.memref_slice %arg2[%474, %c0_i32_511] : memref<16x128xf32, #tpu.memory_space<any>> -> memref<1x128xf32, #tpu.memory_space<any>>
    %924 = tpu.memref_squeeze %923 : memref<1x128xf32, #tpu.memory_space<any>> -> memref<128xf32, #tpu.memory_space<any>>
    %c0_i32_512 = arith.constant 0 : i32
    %925 = tpu.memref_slice %arg6[%c47_i32_509, %c0_i32_512] : memref<64x128xf32, #tpu.memory_space<vmem>> -> memref<1x128xf32, #tpu.memory_space<vmem>>
    %926 = tpu.memref_squeeze %925 : memref<1x128xf32, #tpu.memory_space<vmem>> -> memref<128xf32, #tpu.memory_space<vmem>>
    %927 = tpu.memref_slice %arg7[%c0_i32_510] : memref<1x!tpu.dma_semaphore, #tpu.memory_space<semaphore_mem>> -> memref<1x!tpu.dma_semaphore, #tpu.memory_space<semaphore_mem>>
    %928 = tpu.memref_squeeze %927 : memref<1x!tpu.dma_semaphore, #tpu.memory_space<semaphore_mem>> -> memref<!tpu.dma_semaphore, #tpu.memory_space<semaphore_mem>>
    tpu.wait_dma2 semaphore(%928 : memref<!tpu.dma_semaphore, #tpu.memory_space<semaphore_mem>>) src(%924 : memref<128xf32, #tpu.memory_space<any>>) dst(%926 : memref<128xf32, #tpu.memory_space<vmem>>)
    %c48_i32_513 = arith.constant 48 : i32
    %c0_i32_514 = arith.constant 0 : i32
    %c0_i32_515 = arith.constant 0 : i32
    %929 = tpu.memref_slice %arg2[%484, %c0_i32_515] : memref<16x128xf32, #tpu.memory_space<any>> -> memref<1x128xf32, #tpu.memory_space<any>>
    %930 = tpu.memref_squeeze %929 : memref<1x128xf32, #tpu.memory_space<any>> -> memref<128xf32, #tpu.memory_space<any>>
    %c0_i32_516 = arith.constant 0 : i32
    %931 = tpu.memref_slice %arg6[%c48_i32_513, %c0_i32_516] : memref<64x128xf32, #tpu.memory_space<vmem>> -> memref<1x128xf32, #tpu.memory_space<vmem>>
    %932 = tpu.memref_squeeze %931 : memref<1x128xf32, #tpu.memory_space<vmem>> -> memref<128xf32, #tpu.memory_space<vmem>>
    %933 = tpu.memref_slice %arg7[%c0_i32_514] : memref<1x!tpu.dma_semaphore, #tpu.memory_space<semaphore_mem>> -> memref<1x!tpu.dma_semaphore, #tpu.memory_space<semaphore_mem>>
    %934 = tpu.memref_squeeze %933 : memref<1x!tpu.dma_semaphore, #tpu.memory_space<semaphore_mem>> -> memref<!tpu.dma_semaphore, #tpu.memory_space<semaphore_mem>>
    tpu.wait_dma2 semaphore(%934 : memref<!tpu.dma_semaphore, #tpu.memory_space<semaphore_mem>>) src(%930 : memref<128xf32, #tpu.memory_space<any>>) dst(%932 : memref<128xf32, #tpu.memory_space<vmem>>)
    %c49_i32_517 = arith.constant 49 : i32
    %c0_i32_518 = arith.constant 0 : i32
    %c0_i32_519 = arith.constant 0 : i32
    %935 = tpu.memref_slice %arg2[%494, %c0_i32_519] : memref<16x128xf32, #tpu.memory_space<any>> -> memref<1x128xf32, #tpu.memory_space<any>>
    %936 = tpu.memref_squeeze %935 : memref<1x128xf32, #tpu.memory_space<any>> -> memref<128xf32, #tpu.memory_space<any>>
    %c0_i32_520 = arith.constant 0 : i32
    %937 = tpu.memref_slice %arg6[%c49_i32_517, %c0_i32_520] : memref<64x128xf32, #tpu.memory_space<vmem>> -> memref<1x128xf32, #tpu.memory_space<vmem>>
    %938 = tpu.memref_squeeze %937 : memref<1x128xf32, #tpu.memory_space<vmem>> -> memref<128xf32, #tpu.memory_space<vmem>>
    %939 = tpu.memref_slice %arg7[%c0_i32_518] : memref<1x!tpu.dma_semaphore, #tpu.memory_space<semaphore_mem>> -> memref<1x!tpu.dma_semaphore, #tpu.memory_space<semaphore_mem>>
    %940 = tpu.memref_squeeze %939 : memref<1x!tpu.dma_semaphore, #tpu.memory_space<semaphore_mem>> -> memref<!tpu.dma_semaphore, #tpu.memory_space<semaphore_mem>>
    tpu.wait_dma2 semaphore(%940 : memref<!tpu.dma_semaphore, #tpu.memory_space<semaphore_mem>>) src(%936 : memref<128xf32, #tpu.memory_space<any>>) dst(%938 : memref<128xf32, #tpu.memory_space<vmem>>)
    %c50_i32_521 = arith.constant 50 : i32
    %c0_i32_522 = arith.constant 0 : i32
    %c0_i32_523 = arith.constant 0 : i32
    %941 = tpu.memref_slice %arg2[%504, %c0_i32_523] : memref<16x128xf32, #tpu.memory_space<any>> -> memref<1x128xf32, #tpu.memory_space<any>>
    %942 = tpu.memref_squeeze %941 : memref<1x128xf32, #tpu.memory_space<any>> -> memref<128xf32, #tpu.memory_space<any>>
    %c0_i32_524 = arith.constant 0 : i32
    %943 = tpu.memref_slice %arg6[%c50_i32_521, %c0_i32_524] : memref<64x128xf32, #tpu.memory_space<vmem>> -> memref<1x128xf32, #tpu.memory_space<vmem>>
    %944 = tpu.memref_squeeze %943 : memref<1x128xf32, #tpu.memory_space<vmem>> -> memref<128xf32, #tpu.memory_space<vmem>>
    %945 = tpu.memref_slice %arg7[%c0_i32_522] : memref<1x!tpu.dma_semaphore, #tpu.memory_space<semaphore_mem>> -> memref<1x!tpu.dma_semaphore, #tpu.memory_space<semaphore_mem>>
    %946 = tpu.memref_squeeze %945 : memref<1x!tpu.dma_semaphore, #tpu.memory_space<semaphore_mem>> -> memref<!tpu.dma_semaphore, #tpu.memory_space<semaphore_mem>>
    tpu.wait_dma2 semaphore(%946 : memref<!tpu.dma_semaphore, #tpu.memory_space<semaphore_mem>>) src(%942 : memref<128xf32, #tpu.memory_space<any>>) dst(%944 : memref<128xf32, #tpu.memory_space<vmem>>)
    %c51_i32_525 = arith.constant 51 : i32
    %c0_i32_526 = arith.constant 0 : i32
    %c0_i32_527 = arith.constant 0 : i32
    %947 = tpu.memref_slice %arg2[%514, %c0_i32_527] : memref<16x128xf32, #tpu.memory_space<any>> -> memref<1x128xf32, #tpu.memory_space<any>>
    %948 = tpu.memref_squeeze %947 : memref<1x128xf32, #tpu.memory_space<any>> -> memref<128xf32, #tpu.memory_space<any>>
    %c0_i32_528 = arith.constant 0 : i32
    %949 = tpu.memref_slice %arg6[%c51_i32_525, %c0_i32_528] : memref<64x128xf32, #tpu.memory_space<vmem>> -> memref<1x128xf32, #tpu.memory_space<vmem>>
    %950 = tpu.memref_squeeze %949 : memref<1x128xf32, #tpu.memory_space<vmem>> -> memref<128xf32, #tpu.memory_space<vmem>>
    %951 = tpu.memref_slice %arg7[%c0_i32_526] : memref<1x!tpu.dma_semaphore, #tpu.memory_space<semaphore_mem>> -> memref<1x!tpu.dma_semaphore, #tpu.memory_space<semaphore_mem>>
    %952 = tpu.memref_squeeze %951 : memref<1x!tpu.dma_semaphore, #tpu.memory_space<semaphore_mem>> -> memref<!tpu.dma_semaphore, #tpu.memory_space<semaphore_mem>>
    tpu.wait_dma2 semaphore(%952 : memref<!tpu.dma_semaphore, #tpu.memory_space<semaphore_mem>>) src(%948 : memref<128xf32, #tpu.memory_space<any>>) dst(%950 : memref<128xf32, #tpu.memory_space<vmem>>)
    %c52_i32_529 = arith.constant 52 : i32
    %c0_i32_530 = arith.constant 0 : i32
    %c0_i32_531 = arith.constant 0 : i32
    %953 = tpu.memref_slice %arg2[%524, %c0_i32_531] : memref<16x128xf32, #tpu.memory_space<any>> -> memref<1x128xf32, #tpu.memory_space<any>>
    %954 = tpu.memref_squeeze %953 : memref<1x128xf32, #tpu.memory_space<any>> -> memref<128xf32, #tpu.memory_space<any>>
    %c0_i32_532 = arith.constant 0 : i32
    %955 = tpu.memref_slice %arg6[%c52_i32_529, %c0_i32_532] : memref<64x128xf32, #tpu.memory_space<vmem>> -> memref<1x128xf32, #tpu.memory_space<vmem>>
    %956 = tpu.memref_squeeze %955 : memref<1x128xf32, #tpu.memory_space<vmem>> -> memref<128xf32, #tpu.memory_space<vmem>>
    %957 = tpu.memref_slice %arg7[%c0_i32_530] : memref<1x!tpu.dma_semaphore, #tpu.memory_space<semaphore_mem>> -> memref<1x!tpu.dma_semaphore, #tpu.memory_space<semaphore_mem>>
    %958 = tpu.memref_squeeze %957 : memref<1x!tpu.dma_semaphore, #tpu.memory_space<semaphore_mem>> -> memref<!tpu.dma_semaphore, #tpu.memory_space<semaphore_mem>>
    tpu.wait_dma2 semaphore(%958 : memref<!tpu.dma_semaphore, #tpu.memory_space<semaphore_mem>>) src(%954 : memref<128xf32, #tpu.memory_space<any>>) dst(%956 : memref<128xf32, #tpu.memory_space<vmem>>)
    %c53_i32_533 = arith.constant 53 : i32
    %c0_i32_534 = arith.constant 0 : i32
    %c0_i32_535 = arith.constant 0 : i32
    %959 = tpu.memref_slice %arg2[%534, %c0_i32_535] : memref<16x128xf32, #tpu.memory_space<any>> -> memref<1x128xf32, #tpu.memory_space<any>>
    %960 = tpu.memref_squeeze %959 : memref<1x128xf32, #tpu.memory_space<any>> -> memref<128xf32, #tpu.memory_space<any>>
    %c0_i32_536 = arith.constant 0 : i32
    %961 = tpu.memref_slice %arg6[%c53_i32_533, %c0_i32_536] : memref<64x128xf32, #tpu.memory_space<vmem>> -> memref<1x128xf32, #tpu.memory_space<vmem>>
    %962 = tpu.memref_squeeze %961 : memref<1x128xf32, #tpu.memory_space<vmem>> -> memref<128xf32, #tpu.memory_space<vmem>>
    %963 = tpu.memref_slice %arg7[%c0_i32_534] : memref<1x!tpu.dma_semaphore, #tpu.memory_space<semaphore_mem>> -> memref<1x!tpu.dma_semaphore, #tpu.memory_space<semaphore_mem>>
    %964 = tpu.memref_squeeze %963 : memref<1x!tpu.dma_semaphore, #tpu.memory_space<semaphore_mem>> -> memref<!tpu.dma_semaphore, #tpu.memory_space<semaphore_mem>>
    tpu.wait_dma2 semaphore(%964 : memref<!tpu.dma_semaphore, #tpu.memory_space<semaphore_mem>>) src(%960 : memref<128xf32, #tpu.memory_space<any>>) dst(%962 : memref<128xf32, #tpu.memory_space<vmem>>)
    %c54_i32_537 = arith.constant 54 : i32
    %c0_i32_538 = arith.constant 0 : i32
    %c0_i32_539 = arith.constant 0 : i32
    %965 = tpu.memref_slice %arg2[%544, %c0_i32_539] : memref<16x128xf32, #tpu.memory_space<any>> -> memref<1x128xf32, #tpu.memory_space<any>>
    %966 = tpu.memref_squeeze %965 : memref<1x128xf32, #tpu.memory_space<any>> -> memref<128xf32, #tpu.memory_space<any>>
    %c0_i32_540 = arith.constant 0 : i32
    %967 = tpu.memref_slice %arg6[%c54_i32_537, %c0_i32_540] : memref<64x128xf32, #tpu.memory_space<vmem>> -> memref<1x128xf32, #tpu.memory_space<vmem>>
    %968 = tpu.memref_squeeze %967 : memref<1x128xf32, #tpu.memory_space<vmem>> -> memref<128xf32, #tpu.memory_space<vmem>>
    %969 = tpu.memref_slice %arg7[%c0_i32_538] : memref<1x!tpu.dma_semaphore, #tpu.memory_space<semaphore_mem>> -> memref<1x!tpu.dma_semaphore, #tpu.memory_space<semaphore_mem>>
    %970 = tpu.memref_squeeze %969 : memref<1x!tpu.dma_semaphore, #tpu.memory_space<semaphore_mem>> -> memref<!tpu.dma_semaphore, #tpu.memory_space<semaphore_mem>>
    tpu.wait_dma2 semaphore(%970 : memref<!tpu.dma_semaphore, #tpu.memory_space<semaphore_mem>>) src(%966 : memref<128xf32, #tpu.memory_space<any>>) dst(%968 : memref<128xf32, #tpu.memory_space<vmem>>)
    %c55_i32_541 = arith.constant 55 : i32
    %c0_i32_542 = arith.constant 0 : i32
    %c0_i32_543 = arith.constant 0 : i32
    %971 = tpu.memref_slice %arg2[%554, %c0_i32_543] : memref<16x128xf32, #tpu.memory_space<any>> -> memref<1x128xf32, #tpu.memory_space<any>>
    %972 = tpu.memref_squeeze %971 : memref<1x128xf32, #tpu.memory_space<any>> -> memref<128xf32, #tpu.memory_space<any>>
    %c0_i32_544 = arith.constant 0 : i32
    %973 = tpu.memref_slice %arg6[%c55_i32_541, %c0_i32_544] : memref<64x128xf32, #tpu.memory_space<vmem>> -> memref<1x128xf32, #tpu.memory_space<vmem>>
    %974 = tpu.memref_squeeze %973 : memref<1x128xf32, #tpu.memory_space<vmem>> -> memref<128xf32, #tpu.memory_space<vmem>>
    %975 = tpu.memref_slice %arg7[%c0_i32_542] : memref<1x!tpu.dma_semaphore, #tpu.memory_space<semaphore_mem>> -> memref<1x!tpu.dma_semaphore, #tpu.memory_space<semaphore_mem>>
    %976 = tpu.memref_squeeze %975 : memref<1x!tpu.dma_semaphore, #tpu.memory_space<semaphore_mem>> -> memref<!tpu.dma_semaphore, #tpu.memory_space<semaphore_mem>>
    tpu.wait_dma2 semaphore(%976 : memref<!tpu.dma_semaphore, #tpu.memory_space<semaphore_mem>>) src(%972 : memref<128xf32, #tpu.memory_space<any>>) dst(%974 : memref<128xf32, #tpu.memory_space<vmem>>)
    %c56_i32_545 = arith.constant 56 : i32
    %c0_i32_546 = arith.constant 0 : i32
    %c0_i32_547 = arith.constant 0 : i32
    %977 = tpu.memref_slice %arg2[%564, %c0_i32_547] : memref<16x128xf32, #tpu.memory_space<any>> -> memref<1x128xf32, #tpu.memory_space<any>>
    %978 = tpu.memref_squeeze %977 : memref<1x128xf32, #tpu.memory_space<any>> -> memref<128xf32, #tpu.memory_space<any>>
    %c0_i32_548 = arith.constant 0 : i32
    %979 = tpu.memref_slice %arg6[%c56_i32_545, %c0_i32_548] : memref<64x128xf32, #tpu.memory_space<vmem>> -> memref<1x128xf32, #tpu.memory_space<vmem>>
    %980 = tpu.memref_squeeze %979 : memref<1x128xf32, #tpu.memory_space<vmem>> -> memref<128xf32, #tpu.memory_space<vmem>>
    %981 = tpu.memref_slice %arg7[%c0_i32_546] : memref<1x!tpu.dma_semaphore, #tpu.memory_space<semaphore_mem>> -> memref<1x!tpu.dma_semaphore, #tpu.memory_space<semaphore_mem>>
    %982 = tpu.memref_squeeze %981 : memref<1x!tpu.dma_semaphore, #tpu.memory_space<semaphore_mem>> -> memref<!tpu.dma_semaphore, #tpu.memory_space<semaphore_mem>>
    tpu.wait_dma2 semaphore(%982 : memref<!tpu.dma_semaphore, #tpu.memory_space<semaphore_mem>>) src(%978 : memref<128xf32, #tpu.memory_space<any>>) dst(%980 : memref<128xf32, #tpu.memory_space<vmem>>)
    %c57_i32_549 = arith.constant 57 : i32
    %c0_i32_550 = arith.constant 0 : i32
    %c0_i32_551 = arith.constant 0 : i32
    %983 = tpu.memref_slice %arg2[%574, %c0_i32_551] : memref<16x128xf32, #tpu.memory_space<any>> -> memref<1x128xf32, #tpu.memory_space<any>>
    %984 = tpu.memref_squeeze %983 : memref<1x128xf32, #tpu.memory_space<any>> -> memref<128xf32, #tpu.memory_space<any>>
    %c0_i32_552 = arith.constant 0 : i32
    %985 = tpu.memref_slice %arg6[%c57_i32_549, %c0_i32_552] : memref<64x128xf32, #tpu.memory_space<vmem>> -> memref<1x128xf32, #tpu.memory_space<vmem>>
    %986 = tpu.memref_squeeze %985 : memref<1x128xf32, #tpu.memory_space<vmem>> -> memref<128xf32, #tpu.memory_space<vmem>>
    %987 = tpu.memref_slice %arg7[%c0_i32_550] : memref<1x!tpu.dma_semaphore, #tpu.memory_space<semaphore_mem>> -> memref<1x!tpu.dma_semaphore, #tpu.memory_space<semaphore_mem>>
    %988 = tpu.memref_squeeze %987 : memref<1x!tpu.dma_semaphore, #tpu.memory_space<semaphore_mem>> -> memref<!tpu.dma_semaphore, #tpu.memory_space<semaphore_mem>>
    tpu.wait_dma2 semaphore(%988 : memref<!tpu.dma_semaphore, #tpu.memory_space<semaphore_mem>>) src(%984 : memref<128xf32, #tpu.memory_space<any>>) dst(%986 : memref<128xf32, #tpu.memory_space<vmem>>)
    %c58_i32_553 = arith.constant 58 : i32
    %c0_i32_554 = arith.constant 0 : i32
    %c0_i32_555 = arith.constant 0 : i32
    %989 = tpu.memref_slice %arg2[%584, %c0_i32_555] : memref<16x128xf32, #tpu.memory_space<any>> -> memref<1x128xf32, #tpu.memory_space<any>>
    %990 = tpu.memref_squeeze %989 : memref<1x128xf32, #tpu.memory_space<any>> -> memref<128xf32, #tpu.memory_space<any>>
    %c0_i32_556 = arith.constant 0 : i32
    %991 = tpu.memref_slice %arg6[%c58_i32_553, %c0_i32_556] : memref<64x128xf32, #tpu.memory_space<vmem>> -> memref<1x128xf32, #tpu.memory_space<vmem>>
    %992 = tpu.memref_squeeze %991 : memref<1x128xf32, #tpu.memory_space<vmem>> -> memref<128xf32, #tpu.memory_space<vmem>>
    %993 = tpu.memref_slice %arg7[%c0_i32_554] : memref<1x!tpu.dma_semaphore, #tpu.memory_space<semaphore_mem>> -> memref<1x!tpu.dma_semaphore, #tpu.memory_space<semaphore_mem>>
    %994 = tpu.memref_squeeze %993 : memref<1x!tpu.dma_semaphore, #tpu.memory_space<semaphore_mem>> -> memref<!tpu.dma_semaphore, #tpu.memory_space<semaphore_mem>>
    tpu.wait_dma2 semaphore(%994 : memref<!tpu.dma_semaphore, #tpu.memory_space<semaphore_mem>>) src(%990 : memref<128xf32, #tpu.memory_space<any>>) dst(%992 : memref<128xf32, #tpu.memory_space<vmem>>)
    %c59_i32_557 = arith.constant 59 : i32
    %c0_i32_558 = arith.constant 0 : i32
    %c0_i32_559 = arith.constant 0 : i32
    %995 = tpu.memref_slice %arg2[%594, %c0_i32_559] : memref<16x128xf32, #tpu.memory_space<any>> -> memref<1x128xf32, #tpu.memory_space<any>>
    %996 = tpu.memref_squeeze %995 : memref<1x128xf32, #tpu.memory_space<any>> -> memref<128xf32, #tpu.memory_space<any>>
    %c0_i32_560 = arith.constant 0 : i32
    %997 = tpu.memref_slice %arg6[%c59_i32_557, %c0_i32_560] : memref<64x128xf32, #tpu.memory_space<vmem>> -> memref<1x128xf32, #tpu.memory_space<vmem>>
    %998 = tpu.memref_squeeze %997 : memref<1x128xf32, #tpu.memory_space<vmem>> -> memref<128xf32, #tpu.memory_space<vmem>>
    %999 = tpu.memref_slice %arg7[%c0_i32_558] : memref<1x!tpu.dma_semaphore, #tpu.memory_space<semaphore_mem>> -> memref<1x!tpu.dma_semaphore, #tpu.memory_space<semaphore_mem>>
    %1000 = tpu.memref_squeeze %999 : memref<1x!tpu.dma_semaphore, #tpu.memory_space<semaphore_mem>> -> memref<!tpu.dma_semaphore, #tpu.memory_space<semaphore_mem>>
    tpu.wait_dma2 semaphore(%1000 : memref<!tpu.dma_semaphore, #tpu.memory_space<semaphore_mem>>) src(%996 : memref<128xf32, #tpu.memory_space<any>>) dst(%998 : memref<128xf32, #tpu.memory_space<vmem>>)
    %c60_i32_561 = arith.constant 60 : i32
    %c0_i32_562 = arith.constant 0 : i32
    %c0_i32_563 = arith.constant 0 : i32
    %1001 = tpu.memref_slice %arg2[%604, %c0_i32_563] : memref<16x128xf32, #tpu.memory_space<any>> -> memref<1x128xf32, #tpu.memory_space<any>>
    %1002 = tpu.memref_squeeze %1001 : memref<1x128xf32, #tpu.memory_space<any>> -> memref<128xf32, #tpu.memory_space<any>>
    %c0_i32_564 = arith.constant 0 : i32
    %1003 = tpu.memref_slice %arg6[%c60_i32_561, %c0_i32_564] : memref<64x128xf32, #tpu.memory_space<vmem>> -> memref<1x128xf32, #tpu.memory_space<vmem>>
    %1004 = tpu.memref_squeeze %1003 : memref<1x128xf32, #tpu.memory_space<vmem>> -> memref<128xf32, #tpu.memory_space<vmem>>
    %1005 = tpu.memref_slice %arg7[%c0_i32_562] : memref<1x!tpu.dma_semaphore, #tpu.memory_space<semaphore_mem>> -> memref<1x!tpu.dma_semaphore, #tpu.memory_space<semaphore_mem>>
    %1006 = tpu.memref_squeeze %1005 : memref<1x!tpu.dma_semaphore, #tpu.memory_space<semaphore_mem>> -> memref<!tpu.dma_semaphore, #tpu.memory_space<semaphore_mem>>
    tpu.wait_dma2 semaphore(%1006 : memref<!tpu.dma_semaphore, #tpu.memory_space<semaphore_mem>>) src(%1002 : memref<128xf32, #tpu.memory_space<any>>) dst(%1004 : memref<128xf32, #tpu.memory_space<vmem>>)
    %c61_i32_565 = arith.constant 61 : i32
    %c0_i32_566 = arith.constant 0 : i32
    %c0_i32_567 = arith.constant 0 : i32
    %1007 = tpu.memref_slice %arg2[%614, %c0_i32_567] : memref<16x128xf32, #tpu.memory_space<any>> -> memref<1x128xf32, #tpu.memory_space<any>>
    %1008 = tpu.memref_squeeze %1007 : memref<1x128xf32, #tpu.memory_space<any>> -> memref<128xf32, #tpu.memory_space<any>>
    %c0_i32_568 = arith.constant 0 : i32
    %1009 = tpu.memref_slice %arg6[%c61_i32_565, %c0_i32_568] : memref<64x128xf32, #tpu.memory_space<vmem>> -> memref<1x128xf32, #tpu.memory_space<vmem>>
    %1010 = tpu.memref_squeeze %1009 : memref<1x128xf32, #tpu.memory_space<vmem>> -> memref<128xf32, #tpu.memory_space<vmem>>
    %1011 = tpu.memref_slice %arg7[%c0_i32_566] : memref<1x!tpu.dma_semaphore, #tpu.memory_space<semaphore_mem>> -> memref<1x!tpu.dma_semaphore, #tpu.memory_space<semaphore_mem>>
    %1012 = tpu.memref_squeeze %1011 : memref<1x!tpu.dma_semaphore, #tpu.memory_space<semaphore_mem>> -> memref<!tpu.dma_semaphore, #tpu.memory_space<semaphore_mem>>
    tpu.wait_dma2 semaphore(%1012 : memref<!tpu.dma_semaphore, #tpu.memory_space<semaphore_mem>>) src(%1008 : memref<128xf32, #tpu.memory_space<any>>) dst(%1010 : memref<128xf32, #tpu.memory_space<vmem>>)
    %c62_i32_569 = arith.constant 62 : i32
    %c0_i32_570 = arith.constant 0 : i32
    %c0_i32_571 = arith.constant 0 : i32
    %1013 = tpu.memref_slice %arg2[%624, %c0_i32_571] : memref<16x128xf32, #tpu.memory_space<any>> -> memref<1x128xf32, #tpu.memory_space<any>>
    %1014 = tpu.memref_squeeze %1013 : memref<1x128xf32, #tpu.memory_space<any>> -> memref<128xf32, #tpu.memory_space<any>>
    %c0_i32_572 = arith.constant 0 : i32
    %1015 = tpu.memref_slice %arg6[%c62_i32_569, %c0_i32_572] : memref<64x128xf32, #tpu.memory_space<vmem>> -> memref<1x128xf32, #tpu.memory_space<vmem>>
    %1016 = tpu.memref_squeeze %1015 : memref<1x128xf32, #tpu.memory_space<vmem>> -> memref<128xf32, #tpu.memory_space<vmem>>
    %1017 = tpu.memref_slice %arg7[%c0_i32_570] : memref<1x!tpu.dma_semaphore, #tpu.memory_space<semaphore_mem>> -> memref<1x!tpu.dma_semaphore, #tpu.memory_space<semaphore_mem>>
    %1018 = tpu.memref_squeeze %1017 : memref<1x!tpu.dma_semaphore, #tpu.memory_space<semaphore_mem>> -> memref<!tpu.dma_semaphore, #tpu.memory_space<semaphore_mem>>
    tpu.wait_dma2 semaphore(%1018 : memref<!tpu.dma_semaphore, #tpu.memory_space<semaphore_mem>>) src(%1014 : memref<128xf32, #tpu.memory_space<any>>) dst(%1016 : memref<128xf32, #tpu.memory_space<vmem>>)
    %c63_i32_573 = arith.constant 63 : i32
    %c0_i32_574 = arith.constant 0 : i32
    %c0_i32_575 = arith.constant 0 : i32
    %1019 = tpu.memref_slice %arg2[%634, %c0_i32_575] : memref<16x128xf32, #tpu.memory_space<any>> -> memref<1x128xf32, #tpu.memory_space<any>>
    %1020 = tpu.memref_squeeze %1019 : memref<1x128xf32, #tpu.memory_space<any>> -> memref<128xf32, #tpu.memory_space<any>>
    %c0_i32_576 = arith.constant 0 : i32
    %1021 = tpu.memref_slice %arg6[%c63_i32_573, %c0_i32_576] : memref<64x128xf32, #tpu.memory_space<vmem>> -> memref<1x128xf32, #tpu.memory_space<vmem>>
    %1022 = tpu.memref_squeeze %1021 : memref<1x128xf32, #tpu.memory_space<vmem>> -> memref<128xf32, #tpu.memory_space<vmem>>
    %1023 = tpu.memref_slice %arg7[%c0_i32_574] : memref<1x!tpu.dma_semaphore, #tpu.memory_space<semaphore_mem>> -> memref<1x!tpu.dma_semaphore, #tpu.memory_space<semaphore_mem>>
    %1024 = tpu.memref_squeeze %1023 : memref<1x!tpu.dma_semaphore, #tpu.memory_space<semaphore_mem>> -> memref<!tpu.dma_semaphore, #tpu.memory_space<semaphore_mem>>
    tpu.wait_dma2 semaphore(%1024 : memref<!tpu.dma_semaphore, #tpu.memory_space<semaphore_mem>>) src(%1020 : memref<128xf32, #tpu.memory_space<any>>) dst(%1022 : memref<128xf32, #tpu.memory_space<vmem>>)
    %c0 = arith.constant 0 : index
    %c0_577 = arith.constant 0 : index
    %1025 = vector.load %arg6[%c0, %c0_577] : memref<64x128xf32, #tpu.memory_space<vmem>>, vector<64x128xf32>
    %c0_578 = arith.constant 0 : index
    %c0_579 = arith.constant 0 : index
    %1026 = vector.load %arg3[%c0_578, %c0_579] : memref<128x128xf32, #tpu.memory_space<vmem>>, vector<128x128xf32>
    %cst = arith.constant dense<0.000000e+00> : vector<64x128xf32>
    %1027 = tpu.matmul %1025, %1026, %cst {dimension_numbers = #tpu.dot_dimension_numbers<[1], [0], [0], [1], [0, 0, 1, 1], [], []>} : vector<64x128xf32>, vector<128x128xf32>, vector<64x128xf32> -> vector<64x128xf32>
    %c0_580 = arith.constant 0 : index
    %c0_581 = arith.constant 0 : index
    %1028 = vector.load %arg4[%c0_580, %c0_581] : memref<128x128xf32, #tpu.memory_space<vmem>>, vector<128x128xf32>
    %cst_582 = arith.constant 0.000000e+00 : f32
    %1029 = vector.broadcast %cst_582 : f32 to vector<8x128xf32>
    %1030 = vector.extract_strided_slice %1027 {offsets = [0, 0], sizes = [8, 128], strides = [1, 1]} : vector<64x128xf32> to vector<8x128xf32>
    %cst_583 = arith.constant dense<0.000000e+00> : vector<8x128xf32>
    %1031 = tpu.matmul %1029, %1028, %cst_583 {dimension_numbers = #tpu.dot_dimension_numbers<[1], [0], [0], [1], [0, 0, 1, 1], [], []>} : vector<8x128xf32>, vector<128x128xf32>, vector<8x128xf32> -> vector<8x128xf32>
    %1032 = arith.addf %1030, %1031 : vector<8x128xf32>
    %1033 = math.tanh %1032 : vector<8x128xf32>
    %1034 = vector.extract_strided_slice %1027 {offsets = [8, 0], sizes = [8, 128], strides = [1, 1]} : vector<64x128xf32> to vector<8x128xf32>
    %cst_584 = arith.constant dense<0.000000e+00> : vector<8x128xf32>
    %1035 = tpu.matmul %1033, %1028, %cst_584 {dimension_numbers = #tpu.dot_dimension_numbers<[1], [0], [0], [1], [0, 0, 1, 1], [], []>} : vector<8x128xf32>, vector<128x128xf32>, vector<8x128xf32> -> vector<8x128xf32>
    %1036 = arith.addf %1034, %1035 : vector<8x128xf32>
    %1037 = math.tanh %1036 : vector<8x128xf32>
    %1038 = vector.extract_strided_slice %1027 {offsets = [16, 0], sizes = [8, 128], strides = [1, 1]} : vector<64x128xf32> to vector<8x128xf32>
    %cst_585 = arith.constant dense<0.000000e+00> : vector<8x128xf32>
    %1039 = tpu.matmul %1037, %1028, %cst_585 {dimension_numbers = #tpu.dot_dimension_numbers<[1], [0], [0], [1], [0, 0, 1, 1], [], []>} : vector<8x128xf32>, vector<128x128xf32>, vector<8x128xf32> -> vector<8x128xf32>
    %1040 = arith.addf %1038, %1039 : vector<8x128xf32>
    %1041 = math.tanh %1040 : vector<8x128xf32>
    %1042 = vector.extract_strided_slice %1027 {offsets = [24, 0], sizes = [8, 128], strides = [1, 1]} : vector<64x128xf32> to vector<8x128xf32>
    %cst_586 = arith.constant dense<0.000000e+00> : vector<8x128xf32>
    %1043 = tpu.matmul %1041, %1028, %cst_586 {dimension_numbers = #tpu.dot_dimension_numbers<[1], [0], [0], [1], [0, 0, 1, 1], [], []>} : vector<8x128xf32>, vector<128x128xf32>, vector<8x128xf32> -> vector<8x128xf32>
    %1044 = arith.addf %1042, %1043 : vector<8x128xf32>
    %1045 = math.tanh %1044 : vector<8x128xf32>
    %1046 = vector.extract_strided_slice %1027 {offsets = [32, 0], sizes = [8, 128], strides = [1, 1]} : vector<64x128xf32> to vector<8x128xf32>
    %cst_587 = arith.constant dense<0.000000e+00> : vector<8x128xf32>
    %1047 = tpu.matmul %1045, %1028, %cst_587 {dimension_numbers = #tpu.dot_dimension_numbers<[1], [0], [0], [1], [0, 0, 1, 1], [], []>} : vector<8x128xf32>, vector<128x128xf32>, vector<8x128xf32> -> vector<8x128xf32>
    %1048 = arith.addf %1046, %1047 : vector<8x128xf32>
    %1049 = math.tanh %1048 : vector<8x128xf32>
    %1050 = vector.extract_strided_slice %1027 {offsets = [40, 0], sizes = [8, 128], strides = [1, 1]} : vector<64x128xf32> to vector<8x128xf32>
    %cst_588 = arith.constant dense<0.000000e+00> : vector<8x128xf32>
    %1051 = tpu.matmul %1049, %1028, %cst_588 {dimension_numbers = #tpu.dot_dimension_numbers<[1], [0], [0], [1], [0, 0, 1, 1], [], []>} : vector<8x128xf32>, vector<128x128xf32>, vector<8x128xf32> -> vector<8x128xf32>
    %1052 = arith.addf %1050, %1051 : vector<8x128xf32>
    %1053 = math.tanh %1052 : vector<8x128xf32>
    %1054 = vector.extract_strided_slice %1027 {offsets = [48, 0], sizes = [8, 128], strides = [1, 1]} : vector<64x128xf32> to vector<8x128xf32>
    %cst_589 = arith.constant dense<0.000000e+00> : vector<8x128xf32>
    %1055 = tpu.matmul %1053, %1028, %cst_589 {dimension_numbers = #tpu.dot_dimension_numbers<[1], [0], [0], [1], [0, 0, 1, 1], [], []>} : vector<8x128xf32>, vector<128x128xf32>, vector<8x128xf32> -> vector<8x128xf32>
    %1056 = arith.addf %1054, %1055 : vector<8x128xf32>
    %1057 = math.tanh %1056 : vector<8x128xf32>
    %1058 = vector.extract_strided_slice %1027 {offsets = [56, 0], sizes = [8, 128], strides = [1, 1]} : vector<64x128xf32> to vector<8x128xf32>
    %cst_590 = arith.constant dense<0.000000e+00> : vector<8x128xf32>
    %1059 = tpu.matmul %1057, %1028, %cst_590 {dimension_numbers = #tpu.dot_dimension_numbers<[1], [0], [0], [1], [0, 0, 1, 1], [], []>} : vector<8x128xf32>, vector<128x128xf32>, vector<8x128xf32> -> vector<8x128xf32>
    %1060 = arith.addf %1058, %1059 : vector<8x128xf32>
    %1061 = math.tanh %1060 : vector<8x128xf32>
    %c0_591 = arith.constant 0 : index
    %c0_592 = arith.constant 0 : index
    %1062 = vector.load %arg5[%c0_591, %c0_592] : memref<8x128xf32, #tpu.memory_space<vmem>>, vector<8x128xf32>
    tpu.vector_store %arg5[%c0_591, %c0_592], %1061 {strides = array<i32>} : memref<8x128xf32, #tpu.memory_space<vmem>>, vector<8x128xf32>,
    return
  }
  func.func @transform_1(%arg0: i32, %arg1: memref<64xi32, #tpu.memory_space<smem>>) -> (i32, i32) {
    %c0_i32 = arith.constant 0 : i32
    %c0_i32_0 = arith.constant 0 : i32
    %c0_i32_1 = arith.constant 0 : i32
    return %c0_i32, %c0_i32_0 : i32, i32
  }
  func.func @transform_2(%arg0: i32, %arg1: memref<64xi32, #tpu.memory_space<smem>>) -> (i32, i32) {
    %c0_i32 = arith.constant 0 : i32
    %c0_i32_0 = arith.constant 0 : i32
    %c0_i32_1 = arith.constant 0 : i32
    return %c0_i32, %c0_i32_0 : i32, i32
  }
  func.func @transform_3(%arg0: i32, %arg1: memref<64xi32, #tpu.memory_space<smem>>) -> (i32, i32) {
    %c0_i32 = arith.constant 0 : i32
    %c0_i32_0 = arith.constant 0 : i32
    return %arg0, %c0_i32 : i32, i32
  }
}

</mosaic_0001>

<bundles_post_ra>
// kernel: encoder_rnn_forward.1
= control target key start
LH: loop header
LB: loop body
LE: loop exit
PB: predicated region body
PF: predicated region fallthrough
CT: control target
= control target key end

     0   :  { %s6021_s0 = inlined_call_operand.vmem [shape: s32[64], index: 0, kind: input, shape index: {}]   ;;  %s6022_s1 = inlined_call_operand.vmem [shape: f32[16,128], index: 1, kind: input, shape index: {}]   ;;  %s6023_s2 = inlined_call_operand.vmem [shape: f32[128,128], index: 2, kind: input, shape index: {}]   ;;  %s6024_s3 = inlined_call_operand.vmem [shape: f32[128,128], index: 3, kind: input, shape index: {}]   ;;  %s6025_s4 = inlined_call_operand.vmem [shape: f32[8,128], index: 4, kind: output, shape index: {}]  }
   0x1   :  { %s9_s17 = sshll.u32 %s6021_s0, 4  ;;  %s10_s17 = int_to_ptr.vmem [resolvable:$true] %s9_s17 }
   0x2   :  { %s5509_s18 = scalar_lea.vmem %s10_s17, 16  ;;  %p5514_p1 = scmp.lt.s32.totalorder %s10_s17, %s10_s17 }
   0x3   :  { %p5510_p0 = scmp.ne.s32.totalorder %s10_s17, %s5509_s18  ;;  %p5515_p2 = scmp.lt.s32.totalorder %s5509_s18, %s5509_s18 }
   0x5   :  { %p5516_p3 = por %p5515_p2, %p5514_p1 }
   0x7   :  { %p5517_p4 = pnand %p5516_p3, %p5510_p0 }
   0x9   :  { %5520 = shalt.err (!%p5517_p4)  }
   0xa   :  { %s5525_s19 = smov [#allocation5]  }
   0xb   :  { %12 = dma.vmem_to_smem %s10_s17, 16, %s5525_s19, [#allocation4] }
   0xc   :  { %5521 = dma.done.wait [#allocation4], 16 }
   0xd   :  { %5522 = vsyncadd [#allocation4], 4294967280 }
   0xe   :  { %14 = sfence }
   0xf   :  { %s20_s20 = sld [smem:[#allocation5]] }
  0x15   :  { %s21_s23 = scalar_lea.vmem %s6022_s1, %s20_s20 }
  0x16   :  { %v39_v0 = vld [vmem:[%s21_s23] sm:$0x1] }
  0x17   :  { %40 = vst [vmem:[#allocation2] sm:$0x1] %v39_v0 }
  0x18   :  { %65 = vsyncadd [#allocation3], 16  ;;  %s4717_s0 = sld [smem:[#allocation5 + $0x1]] }
  0x1e   :  { %s68_s26 = scalar_lea.vmem %s6022_s1, %s4717_s0 }
  0x1f   :  { %v87_v1 = vld [vmem:[%s68_s26] sm:$0x1] }
  0x20   :  { %88 = vst [vmem:[#allocation2 + $0x1] sm:$0x1] %v87_v1 }
  0x21   :  { %113 = vsyncadd [#allocation3], 16  ;;  %s4718_s27 = sld [smem:[#allocation5 + $0x2]] }
  0x27   :  { %s116_s30 = scalar_lea.vmem %s6022_s1, %s4718_s27 }
  0x28   :  { %v135_v2 = vld [vmem:[%s116_s30] sm:$0x1] }
  0x29   :  { %136 = vst [vmem:[#allocation2 + $0x2] sm:$0x1] %v135_v2 }
  0x2a   :  { %161 = vsyncadd [#allocation3], 16  ;;  %s4719_s5 = sld [smem:[#allocation5 + $0x3]] }
  0x30   :  { %s164_s8 = scalar_lea.vmem %s6022_s1, %s4719_s5 }
  0x31   :  { %v183_v3 = vld [vmem:[%s164_s8] sm:$0x1] }
  0x32   :  { %184 = vst [vmem:[#allocation2 + $0x3] sm:$0x1] %v183_v3 }
  0x33   :  { %209 = vsyncadd [#allocation3], 16  ;;  %s4720_s9 = sld [smem:[#allocation5 + $0x4]] }
  0x39   :  { %s212_s12 = scalar_lea.vmem %s6022_s1, %s4720_s9 }
  0x3a   :  { %v231_v4 = vld [vmem:[%s212_s12] sm:$0x1] }
  0x3b   :  { %232 = vst [vmem:[#allocation2 + $0x4] sm:$0x1] %v231_v4 }
  0x3c   :  { %257 = vsyncadd [#allocation3], 16  ;;  %s4721_s13 = sld [smem:[#allocation5 + $0x5]] }
  0x42   :  { %s260_s16 = scalar_lea.vmem %s6022_s1, %s4721_s13 }
  0x43   :  { %v279_v5 = vld [vmem:[%s260_s16] sm:$0x1] }
  0x44   :  { %280 = vst [vmem:[#allocation2 + $0x5] sm:$0x1] %v279_v5 }
  0x45   :  { %305 = vsyncadd [#allocation3], 16  ;;  %s4722_s17 = sld [smem:[#allocation5 + $0x6]] }
  0x4b   :  { %s308_s20 = scalar_lea.vmem %s6022_s1, %s4722_s17 }
  0x4c   :  { %v327_v6 = vld [vmem:[%s308_s20] sm:$0x1] }
  0x4d   :  { %328 = vst [vmem:[#allocation2 + $0x6] sm:$0x1] %v327_v6 }
  0x4e   :  { %353 = vsyncadd [#allocation3], 16  ;;  %s4723_s21 = sld [smem:[#allocation5 + $0x7]] }
  0x54   :  { %s356_s0 = scalar_lea.vmem %s6022_s1, %s4723_s21 }
  0x55   :  { %v375_v7 = vld [vmem:[%s356_s0] sm:$0x1] }
  0x56   :  { %376 = vst [vmem:[#allocation2 + $0x7] sm:$0x1] %v375_v7 }
  0x57   :  { %401 = vsyncadd [#allocation3], 16  ;;  %s4724_s24 = sld [smem:[#allocation5 + $0x8]] }
  0x5d   :  { %s404_s27 = scalar_lea.vmem %s6022_s1, %s4724_s24 }
  0x5e   :  { %v423_v8 = vld [vmem:[%s404_s27] sm:$0x1] }
  0x5f   :  { %424 = vst [vmem:[#allocation2 + $0x8] sm:$0x1] %v423_v8 }
  0x60   :  { %449 = vsyncadd [#allocation3], 16  ;;  %s4725_s28 = sld [smem:[#allocation5 + $0x9]] }
  0x66   :  { %s452_s5 = scalar_lea.vmem %s6022_s1, %s4725_s28 }
  0x67   :  { %v471_v9 = vld [vmem:[%s452_s5] sm:$0x1] }
  0x68   :  { %472 = vst [vmem:[#allocation2 + $0x9] sm:$0x1] %v471_v9 }
  0x69   :  { %497 = vsyncadd [#allocation3], 16  ;;  %s4726_s6 = sld [smem:[#allocation5 + $0xa]] }
  0x6f   :  { %s500_s9 = scalar_lea.vmem %s6022_s1, %s4726_s6 }
  0x70   :  { %v519_v10 = vld [vmem:[%s500_s9] sm:$0x1] }
  0x71   :  { %520 = vst [vmem:[#allocation2 + $0xa] sm:$0x1] %v519_v10 }
  0x72   :  { %545 = vsyncadd [#allocation3], 16  ;;  %s4727_s10 = sld [smem:[#allocation5 + $0xb]] }
  0x78   :  { %s548_s13 = scalar_lea.vmem %s6022_s1, %s4727_s10 }
  0x79   :  { %v567_v11 = vld [vmem:[%s548_s13] sm:$0x1] }
  0x7a   :  { %568 = vst [vmem:[#allocation2 + $0xb] sm:$0x1] %v567_v11 }
  0x7b   :  { %593 = vsyncadd [#allocation3], 16  ;;  %s4728_s14 = sld [smem:[#allocation5 + $0xc]] }
  0x81   :  { %s596_s17 = scalar_lea.vmem %s6022_s1, %s4728_s14 }
  0x82   :  { %v615_v12 = vld [vmem:[%s596_s17] sm:$0x1] }
  0x83   :  { %616 = vst [vmem:[#allocation2 + $0xc] sm:$0x1] %v615_v12 }
  0x84   :  { %641 = vsyncadd [#allocation3], 16  ;;  %s4729_s18 = sld [smem:[#allocation5 + $0xd]] }
  0x8a   :  { %s644_s21 = scalar_lea.vmem %s6022_s1, %s4729_s18 }
  0x8b   :  { %v663_v13 = vld [vmem:[%s644_s21] sm:$0x1] }
  0x8c   :  { %664 = vst [vmem:[#allocation2 + $0xd] sm:$0x1] %v663_v13 }
  0x8d   :  { %689 = vsyncadd [#allocation3], 16  ;;  %s4730_s22 = sld [smem:[#allocation5 + $0xe]] }
  0x93   :  { %s692_s24 = scalar_lea.vmem %s6022_s1, %s4730_s22 }
  0x94   :  { %v711_v14 = vld [vmem:[%s692_s24] sm:$0x1] }
  0x95   :  { %712 = vst [vmem:[#allocation2 + $0xe] sm:$0x1] %v711_v14 }
  0x96   :  { %737 = vsyncadd [#allocation3], 16  ;;  %s4731_s25 = sld [smem:[#allocation5 + $0xf]] }
  0x9c   :  { %s740_s28 = scalar_lea.vmem %s6022_s1, %s4731_s25 }
  0x9d   :  { %v759_v15 = vld [vmem:[%s740_s28] sm:$0x1] }
  0x9e   :  { %760 = vst [vmem:[#allocation2 + $0xf] sm:$0x1] %v759_v15 }
  0x9f   :  { %785 = vsyncadd [#allocation3], 16  ;;  %s4732_s29 = sld [smem:[#allocation5 + $0x10]] }
  0xa5   :  { %s788_s6 = scalar_lea.vmem %s6022_s1, %s4732_s29 }
  0xa6   :  { %v807_v16 = vld [vmem:[%s788_s6] sm:$0x1] }
  0xa7   :  { %808 = vst [vmem:[#allocation2 + $0x10] sm:$0x1] %v807_v16 }
  0xa8   :  { %833 = vsyncadd [#allocation3], 16  ;;  %s4733_s7 = sld [smem:[#allocation5 + $0x11]] }
  0xae   :  { %s836_s10 = scalar_lea.vmem %s6022_s1, %s4733_s7 }
  0xaf   :  { %v855_v17 = vld [vmem:[%s836_s10] sm:$0x1] }
  0xb0   :  { %856 = vst [vmem:[#allocation2 + $0x11] sm:$0x1] %v855_v17 }
  0xb1   :  { %881 = vsyncadd [#allocation3], 16  ;;  %s4734_s11 = sld [smem:[#allocation5 + $0x12]] }
  0xb7   :  { %s884_s14 = scalar_lea.vmem %s6022_s1, %s4734_s11 }
  0xb8   :  { %v903_v18 = vld [vmem:[%s884_s14] sm:$0x1] }
  0xb9   :  { %904 = vst [vmem:[#allocation2 + $0x12] sm:$0x1] %v903_v18 }
  0xba   :  { %929 = vsyncadd [#allocation3], 16  ;;  %s4735_s15 = sld [smem:[#allocation5 + $0x13]] }
  0xc0   :  { %s932_s18 = scalar_lea.vmem %s6022_s1, %s4735_s15 }
  0xc1   :  { %v951_v19 = vld [vmem:[%s932_s18] sm:$0x1] }
  0xc2   :  { %952 = vst [vmem:[#allocation2 + $0x13] sm:$0x1] %v951_v19 }
  0xc3   :  { %977 = vsyncadd [#allocation3], 16  ;;  %s4736_s19 = sld [smem:[#allocation5 + $0x14]] }
  0xc9   :  { %s980_s22 = scalar_lea.vmem %s6022_s1, %s4736_s19 }
  0xca   :  { %v999_v20 = vld [vmem:[%s980_s22] sm:$0x1] }
  0xcb   :  { %1000 = vst [vmem:[#allocation2 + $0x14] sm:$0x1] %v999_v20 }
  0xcc   :  { %1025 = vsyncadd [#allocation3], 16  ;;  %s4737_s23 = sld [smem:[#allocation5 + $0x15]] }
  0xd2   :  { %s1028_s25 = scalar_lea.vmem %s6022_s1, %s4737_s23 }
  0xd3   :  { %v1047_v21 = vld [vmem:[%s1028_s25] sm:$0x1] }
  0xd4   :  { %1048 = vst [vmem:[#allocation2 + $0x15] sm:$0x1] %v1047_v21 }
  0xd5   :  { %1073 = vsyncadd [#allocation3], 16  ;;  %s4738_s26 = sld [smem:[#allocation5 + $0x16]] }
  0xdb   :  { %s1076_s29 = scalar_lea.vmem %s6022_s1, %s4738_s26 }
  0xdc   :  { %v1095_v22 = vld [vmem:[%s1076_s29] sm:$0x1] }
  0xdd   :  { %1096 = vst [vmem:[#allocation2 + $0x16] sm:$0x1] %v1095_v22 }
  0xde   :  { %1121 = vsyncadd [#allocation3], 16  ;;  %s4739_s30 = sld [smem:[#allocation5 + $0x17]] }
  0xe4   :  { %s1124_s7 = scalar_lea.vmem %s6022_s1, %s4739_s30 }
  0xe5   :  { %v1143_v23 = vld [vmem:[%s1124_s7] sm:$0x1] }
  0xe6   :  { %1144 = vst [vmem:[#allocation2 + $0x17] sm:$0x1] %v1143_v23 }
  0xe7   :  { %1169 = vsyncadd [#allocation3], 16  ;;  %s4740_s8 = sld [smem:[#allocation5 + $0x18]] }
  0xed   :  { %s1172_s11 = scalar_lea.vmem %s6022_s1, %s4740_s8 }
  0xee   :  { %v1191_v24 = vld [vmem:[%s1172_s11] sm:$0x1] }
  0xef   :  { %1192 = vst [vmem:[#allocation2 + $0x18] sm:$0x1] %v1191_v24 }
  0xf0   :  { %1217 = vsyncadd [#allocation3], 16  ;;  %s4741_s12 = sld [smem:[#allocation5 + $0x19]] }
  0xf6   :  { %s1220_s15 = scalar_lea.vmem %s6022_s1, %s4741_s12 }
  0xf7   :  { %v1239_v25 = vld [vmem:[%s1220_s15] sm:$0x1] }
  0xf8   :  { %1240 = vst [vmem:[#allocation2 + $0x19] sm:$0x1] %v1239_v25 }
  0xf9   :  { %1265 = vsyncadd [#allocation3], 16  ;;  %s4742_s16 = sld [smem:[#allocation5 + $0x1a]] }
  0xff   :  { %s1268_s19 = scalar_lea.vmem %s6022_s1, %s4742_s16 }
 0x100   :  { %v1287_v26 = vld [vmem:[%s1268_s19] sm:$0x1] }
 0x101   :  { %1288 = vst [vmem:[#allocation2 + $0x1a] sm:$0x1] %v1287_v26 }
 0x102   :  { %1313 = vsyncadd [#allocation3], 16  ;;  %s4743_s20 = sld [smem:[#allocation5 + $0x1b]] }
 0x108   :  { %s1316_s23 = scalar_lea.vmem %s6022_s1, %s4743_s20 }
 0x109   :  { %v1335_v27 = vld [vmem:[%s1316_s23] sm:$0x1] }
 0x10a   :  { %1336 = vst [vmem:[#allocation2 + $0x1b] sm:$0x1] %v1335_v27 }
 0x10b   :  { %1361 = vsyncadd [#allocation3], 16  ;;  %s4744_s0 = sld [smem:[#allocation5 + $0x1c]] }
 0x111   :  { %s1364_s26 = scalar_lea.vmem %s6022_s1, %s4744_s0 }
 0x112   :  { %v1383_v28 = vld [vmem:[%s1364_s26] sm:$0x1] }
 0x113   :  { %1384 = vst [vmem:[#allocation2 + $0x1c] sm:$0x1] %v1383_v28 }
 0x114   :  { %1409 = vsyncadd [#allocation3], 16  ;;  %s4745_s27 = sld [smem:[#allocation5 + $0x1d]] }
 0x11a   :  { %s1412_s30 = scalar_lea.vmem %s6022_s1, %s4745_s27 }
 0x11b   :  { %v1431_v29 = vld [vmem:[%s1412_s30] sm:$0x1] }
 0x11c   :  { %1432 = vst [vmem:[#allocation2 + $0x1d] sm:$0x1] %v1431_v29 }
 0x11d   :  { %1457 = vsyncadd [#allocation3], 16  ;;  %s4746_s5 = sld [smem:[#allocation5 + $0x1e]] }
 0x123   :  { %s1460_s8 = scalar_lea.vmem %s6022_s1, %s4746_s5 }
 0x124   :  { %v1479_v30 = vld [vmem:[%s1460_s8] sm:$0x1] }
 0x125   :  { %1480 = vst [vmem:[#allocation2 + $0x1e] sm:$0x1] %v1479_v30 }
 0x126   :  { %1505 = vsyncadd [#allocation3], 16  ;;  %s4747_s9 = sld [smem:[#allocation5 + $0x1f]] }
 0x12c   :  { %s1508_s12 = scalar_lea.vmem %s6022_s1, %s4747_s9 }
 0x12d   :  { %v1527_v31 = vld [vmem:[%s1508_s12] sm:$0x1] }
 0x12e   :  { %1528 = vst [vmem:[#allocation2 + $0x1f] sm:$0x1] %v1527_v31 }
 0x12f   :  { %1553 = vsyncadd [#allocation3], 16  ;;  %s4748_s13 = sld [smem:[#allocation5 + $0x20]] }
 0x135   :  { %s1556_s16 = scalar_lea.vmem %s6022_s1, %s4748_s13 }
 0x136   :  { %v1575_v32 = vld [vmem:[%s1556_s16] sm:$0x1] }
 0x137   :  { %1576 = vst [vmem:[#allocation2 + $0x20] sm:$0x1] %v1575_v32 }
 0x138   :  { %1601 = vsyncadd [#allocation3], 16  ;;  %s4749_s17 = sld [smem:[#allocation5 + $0x21]] }
 0x13e   :  { %s1604_s20 = scalar_lea.vmem %s6022_s1, %s4749_s17 }
 0x13f   :  { %v1623_v33 = vld [vmem:[%s1604_s20] sm:$0x1] }
 0x140   :  { %1624 = vst [vmem:[#allocation2 + $0x21] sm:$0x1] %v1623_v33 }
 0x141   :  { %1649 = vsyncadd [#allocation3], 16  ;;  %s4750_s21 = sld [smem:[#allocation5 + $0x22]] }
 0x147   :  { %s1652_s0 = scalar_lea.vmem %s6022_s1, %s4750_s21 }
 0x148   :  { %v1671_v34 = vld [vmem:[%s1652_s0] sm:$0x1] }
 0x149   :  { %1672 = vst [vmem:[#allocation2 + $0x22] sm:$0x1] %v1671_v34 }
 0x14a   :  { %1697 = vsyncadd [#allocation3], 16  ;;  %s4751_s24 = sld [smem:[#allocation5 + $0x23]] }
 0x150   :  { %s1700_s27 = scalar_lea.vmem %s6022_s1, %s4751_s24 }
 0x151   :  { %v1719_v35 = vld [vmem:[%s1700_s27] sm:$0x1] }
 0x152   :  { %1720 = vst [vmem:[#allocation2 + $0x23] sm:$0x1] %v1719_v35 }
 0x153   :  { %1745 = vsyncadd [#allocation3], 16  ;;  %s4752_s28 = sld [smem:[#allocation5 + $0x24]] }
 0x159   :  { %s1748_s5 = scalar_lea.vmem %s6022_s1, %s4752_s28 }
 0x15a   :  { %v1767_v36 = vld [vmem:[%s1748_s5] sm:$0x1] }
 0x15b   :  { %1768 = vst [vmem:[#allocation2 + $0x24] sm:$0x1] %v1767_v36 }
 0x15c   :  { %1793 = vsyncadd [#allocation3], 16  ;;  %s4753_s6 = sld [smem:[#allocation5 + $0x25]] }
 0x162   :  { %s1796_s9 = scalar_lea.vmem %s6022_s1, %s4753_s6 }
 0x163   :  { %v1815_v37 = vld [vmem:[%s1796_s9] sm:$0x1] }
 0x164   :  { %1816 = vst [vmem:[#allocation2 + $0x25] sm:$0x1] %v1815_v37 }
 0x165   :  { %1841 = vsyncadd [#allocation3], 16  ;;  %s4754_s10 = sld [smem:[#allocation5 + $0x26]] }
 0x16b   :  { %s1844_s13 = scalar_lea.vmem %s6022_s1, %s4754_s10 }
 0x16c   :  { %v1863_v38 = vld [vmem:[%s1844_s13] sm:$0x1] }
 0x16d   :  { %1864 = vst [vmem:[#allocation2 + $0x26] sm:$0x1] %v1863_v38 }
 0x16e   :  { %1889 = vsyncadd [#allocation3], 16  ;;  %s4755_s14 = sld [smem:[#allocation5 + $0x27]] }
 0x174   :  { %s1892_s17 = scalar_lea.vmem %s6022_s1, %s4755_s14 }
 0x175   :  { %v1911_v39 = vld [vmem:[%s1892_s17] sm:$0x1] }
 0x176   :  { %1912 = vst [vmem:[#allocation2 + $0x27] sm:$0x1] %v1911_v39 }
 0x177   :  { %1937 = vsyncadd [#allocation3], 16  ;;  %s4756_s18 = sld [smem:[#allocation5 + $0x28]] }
 0x17d   :  { %s1940_s21 = scalar_lea.vmem %s6022_s1, %s4756_s18 }
 0x17e   :  { %v1959_v40 = vld [vmem:[%s1940_s21] sm:$0x1] }
 0x17f   :  { %1960 = vst [vmem:[#allocation2 + $0x28] sm:$0x1] %v1959_v40 }
 0x180   :  { %1985 = vsyncadd [#allocation3], 16  ;;  %s4757_s22 = sld [smem:[#allocation5 + $0x29]] }
 0x186   :  { %s1988_s24 = scalar_lea.vmem %s6022_s1, %s4757_s22 }
 0x187   :  { %v2007_v41 = vld [vmem:[%s1988_s24] sm:$0x1] }
 0x188   :  { %2008 = vst [vmem:[#allocation2 + $0x29] sm:$0x1] %v2007_v41 }
 0x189   :  { %2033 = vsyncadd [#allocation3], 16  ;;  %s4758_s25 = sld [smem:[#allocation5 + $0x2a]] }
 0x18f   :  { %s2036_s28 = scalar_lea.vmem %s6022_s1, %s4758_s25 }
 0x190   :  { %v2055_v42 = vld [vmem:[%s2036_s28] sm:$0x1] }
 0x191   :  { %2056 = vst [vmem:[#allocation2 + $0x2a] sm:$0x1] %v2055_v42 }
 0x192   :  { %2081 = vsyncadd [#allocation3], 16  ;;  %s4759_s29 = sld [smem:[#allocation5 + $0x2b]] }
 0x198   :  { %s2084_s6 = scalar_lea.vmem %s6022_s1, %s4759_s29 }
 0x199   :  { %v2103_v43 = vld [vmem:[%s2084_s6] sm:$0x1] }
 0x19a   :  { %2104 = vst [vmem:[#allocation2 + $0x2b] sm:$0x1] %v2103_v43 }
 0x19b   :  { %2129 = vsyncadd [#allocation3], 16  ;;  %s4760_s7 = sld [smem:[#allocation5 + $0x2c]] }
 0x1a1   :  { %s2132_s10 = scalar_lea.vmem %s6022_s1, %s4760_s7 }
 0x1a2   :  { %v2151_v44 = vld [vmem:[%s2132_s10] sm:$0x1] }
 0x1a3   :  { %2152 = vst [vmem:[#allocation2 + $0x2c] sm:$0x1] %v2151_v44 }
 0x1a4   :  { %2177 = vsyncadd [#allocation3], 16  ;;  %s4761_s11 = sld [smem:[#allocation5 + $0x2d]] }
 0x1aa   :  { %s2180_s14 = scalar_lea.vmem %s6022_s1, %s4761_s11 }
 0x1ab   :  { %v2199_v45 = vld [vmem:[%s2180_s14] sm:$0x1] }
 0x1ac   :  { %2200 = vst [vmem:[#allocation2 + $0x2d] sm:$0x1] %v2199_v45 }
 0x1ad   :  { %2225 = vsyncadd [#allocation3], 16  ;;  %s4762_s15 = sld [smem:[#allocation5 + $0x2e]] }
 0x1b3   :  { %s2228_s18 = scalar_lea.vmem %s6022_s1, %s4762_s15 }
 0x1b4   :  { %v2247_v46 = vld [vmem:[%s2228_s18] sm:$0x1] }
 0x1b5   :  { %2248 = vst [vmem:[#allocation2 + $0x2e] sm:$0x1] %v2247_v46 }
 0x1b6   :  { %2273 = vsyncadd [#allocation3], 16  ;;  %s4763_s19 = sld [smem:[#allocation5 + $0x2f]] }
 0x1bc   :  { %s2276_s22 = scalar_lea.vmem %s6022_s1, %s4763_s19 }
 0x1bd   :  { %v2295_v47 = vld [vmem:[%s2276_s22] sm:$0x1] }
 0x1be   :  { %2296 = vst [vmem:[#allocation2 + $0x2f] sm:$0x1] %v2295_v47 }
 0x1bf   :  { %2321 = vsyncadd [#allocation3], 16  ;;  %s4764_s23 = sld [smem:[#allocation5 + $0x30]] }
 0x1c5   :  { %s2324_s25 = scalar_lea.vmem %s6022_s1, %s4764_s23 }
 0x1c6   :  { %v2343_v48 = vld [vmem:[%s2324_s25] sm:$0x1] }
 0x1c7   :  { %2344 = vst [vmem:[#allocation2 + $0x30] sm:$0x1] %v2343_v48 }
 0x1c8   :  { %2369 = vsyncadd [#allocation3], 16  ;;  %s4765_s26 = sld [smem:[#allocation5 + $0x31]] }
 0x1ce   :  { %s2372_s29 = scalar_lea.vmem %s6022_s1, %s4765_s26 }
 0x1cf   :  { %v2391_v49 = vld [vmem:[%s2372_s29] sm:$0x1] }
 0x1d0   :  { %2392 = vst [vmem:[#allocation2 + $0x31] sm:$0x1] %v2391_v49 }
 0x1d1   :  { %2417 = vsyncadd [#allocation3], 16  ;;  %s4766_s30 = sld [smem:[#allocation5 + $0x32]] }
 0x1d7   :  { %s2420_s7 = scalar_lea.vmem %s6022_s1, %s4766_s30 }
 0x1d8   :  { %v2439_v50 = vld [vmem:[%s2420_s7] sm:$0x1] }
 0x1d9   :  { %2440 = vst [vmem:[#allocation2 + $0x32] sm:$0x1] %v2439_v50 }
 0x1da   :  { %2465 = vsyncadd [#allocation3], 16  ;;  %s4767_s8 = sld [smem:[#allocation5 + $0x33]] }
 0x1e0   :  { %s2468_s11 = scalar_lea.vmem %s6022_s1, %s4767_s8 }
 0x1e1   :  { %v2487_v51 = vld [vmem:[%s2468_s11] sm:$0x1] }
 0x1e2   :  { %2488 = vst [vmem:[#allocation2 + $0x33] sm:$0x1] %v2487_v51 }
 0x1e3   :  { %2513 = vsyncadd [#allocation3], 16  ;;  %s4768_s12 = sld [smem:[#allocation5 + $0x34]] }
 0x1e9   :  { %s2516_s15 = scalar_lea.vmem %s6022_s1, %s4768_s12 }
 0x1ea   :  { %v2535_v52 = vld [vmem:[%s2516_s15] sm:$0x1] }
 0x1eb   :  { %2536 = vst [vmem:[#allocation2 + $0x34] sm:$0x1] %v2535_v52 }
 0x1ec   :  { %2561 = vsyncadd [#allocation3], 16  ;;  %s4769_s16 = sld [smem:[#allocation5 + $0x35]] }
 0x1f2   :  { %s2564_s19 = scalar_lea.vmem %s6022_s1, %s4769_s16 }
 0x1f3   :  { %v2583_v53 = vld [vmem:[%s2564_s19] sm:$0x1] }
 0x1f4   :  { %2584 = vst [vmem:[#allocation2 + $0x35] sm:$0x1] %v2583_v53 }
 0x1f5   :  { %2609 = vsyncadd [#allocation3], 16  ;;  %s4770_s20 = sld [smem:[#allocation5 + $0x36]] }
 0x1fb   :  { %s2612_s23 = scalar_lea.vmem %s6022_s1, %s4770_s20 }
 0x1fc   :  { %v2631_v54 = vld [vmem:[%s2612_s23] sm:$0x1] }
 0x1fd   :  { %2632 = vst [vmem:[#allocation2 + $0x36] sm:$0x1] %v2631_v54 }
 0x1fe   :  { %2657 = vsyncadd [#allocation3], 16  ;;  %s4771_s0 = sld [smem:[#allocation5 + $0x37]] }
 0x204   :  { %s2660_s26 = scalar_lea.vmem %s6022_s1, %s4771_s0 }
 0x205   :  { %v2679_v55 = vld [vmem:[%s2660_s26] sm:$0x1] }
 0x206   :  { %2680 = vst [vmem:[#allocation2 + $0x37] sm:$0x1] %v2679_v55 }
 0x207   :  { %2705 = vsyncadd [#allocation3], 16  ;;  %s4772_s27 = sld [smem:[#allocation5 + $0x38]] }
 0x20d   :  { %s2708_s30 = scalar_lea.vmem %s6022_s1, %s4772_s27 }
 0x20e   :  { %v2727_v56 = vld [vmem:[%s2708_s30] sm:$0x1] }
 0x20f   :  { %2728 = vst [vmem:[#allocation2 + $0x38] sm:$0x1] %v2727_v56 }
 0x210   :  { %2753 = vsyncadd [#allocation3], 16  ;;  %s4773_s5 = sld [smem:[#allocation5 + $0x39]] }
 0x216   :  { %s2756_s8 = scalar_lea.vmem %s6022_s1, %s4773_s5 }
 0x217   :  { %v2775_v57 = vld [vmem:[%s2756_s8] sm:$0x1] }
 0x218   :  { %2776 = vst [vmem:[#allocation2 + $0x39] sm:$0x1] %v2775_v57 }
 0x219   :  { %2801 = vsyncadd [#allocation3], 16  ;;  %s4774_s9 = sld [smem:[#allocation5 + $0x3a]] }
 0x21f   :  { %s2804_s12 = scalar_lea.vmem %s6022_s1, %s4774_s9 }
 0x220   :  { %v2823_v58 = vld [vmem:[%s2804_s12] sm:$0x1] }
 0x221   :  { %2824 = vst [vmem:[#allocation2 + $0x3a] sm:$0x1] %v2823_v58 }
 0x222   :  { %2849 = vsyncadd [#allocation3], 16  ;;  %s4775_s13 = sld [smem:[#allocation5 + $0x3b]] }
 0x228   :  { %s2852_s16 = scalar_lea.vmem %s6022_s1, %s4775_s13 }
 0x229   :  { %v2871_v59 = vld [vmem:[%s2852_s16] sm:$0x1] }
 0x22a   :  { %2872 = vst [vmem:[#allocation2 + $0x3b] sm:$0x1] %v2871_v59 }
 0x22b   :  { %2897 = vsyncadd [#allocation3], 16  ;;  %s4776_s17 = sld [smem:[#allocation5 + $0x3c]] }
 0x231   :  { %s2900_s20 = scalar_lea.vmem %s6022_s1, %s4776_s17 }
 0x232   :  { %v2919_v60 = vld [vmem:[%s2900_s20] sm:$0x1] }
 0x233   :  { %2920 = vst [vmem:[#allocation2 + $0x3c] sm:$0x1] %v2919_v60 }
 0x234   :  { %2945 = vsyncadd [#allocation3], 16  ;;  %s4777_s21 = sld [smem:[#allocation5 + $0x3d]] }
 0x23a   :  { %s2948_s0 = scalar_lea.vmem %s6022_s1, %s4777_s21 }
 0x23b   :  { %v2967_v61 = vld [vmem:[%s2948_s0] sm:$0x1] }
 0x23c   :  { %2968 = vst [vmem:[#allocation2 + $0x3d] sm:$0x1] %v2967_v61 }
 0x23d   :  { %2993 = vsyncadd [#allocation3], 16  ;;  %s4778_s24 = sld [smem:[#allocation5 + $0x3e]] }
 0x243   :  { %s2996_s27 = scalar_lea.vmem %s6022_s1, %s4778_s24 }
 0x244   :  { %v3015_v62 = vld [vmem:[%s2996_s27] sm:$0x1] }
 0x245   :  { %3016 = vst [vmem:[#allocation2 + $0x3e] sm:$0x1] %v3015_v62 }
 0x246   :  { %3041 = vsyncadd [#allocation3], 16  ;;  %s4779_s28 = sld [smem:[#allocation5 + $0x3f]] }
 0x24c   :  { %s3044_s5 = scalar_lea.vmem %s6022_s1, %s4779_s28 }
 0x24d   :  { %v3063_v63 = vld [vmem:[%s3044_s5] sm:$0x1] }
 0x24e   :  { %3064 = vst [vmem:[#allocation2 + $0x3f] sm:$0x1] %v3063_v63 }
 0x24f   :  { %3089 = vsyncadd [#allocation3], 16 }
 0x250   :  { %5523 = dma.done.wait [#allocation3], 1024 }
 0x251   :  { %5524 = vsyncadd [#allocation3], 4294966272  ;;  %v5526_v0 = vmov 0.0|0.0   ;;  %vm5527_vm0 = vmmov 0   ;;  %v5528_v1 = vmov 0.0   ;;  %v3226_v2 = vld [vmem:[%s6023_s2] sm:$0xff] }
 0x252   :  { %5297 = vmatprep.subr.bf16.mxu1 %v5526_v0  ;;  %5017 = vmatprep.mubr.msk.f32.mxu1 %vm5527_vm0, %v5528_v1  ;;  %v3227_v3 = vld [vmem:[%s6023_s2 + $0x8] sm:$0xff]  ;;  %v3347_v4 = vld [vmem:[%s6024_s3] sm:$0xff]  ;;  %v3228_v7 = vld [vmem:[%s6023_s2 + $0x10] sm:$0xff] }
 0x253   :  { %v5265_v5 = vpack.c.bf16 %v3227_v3, %v3226_v2  ;;  %v3348_v6 = vld [vmem:[%s6024_s3 + $0x8] sm:$0xff]  ;;  %v3229_v8 = vld [vmem:[%s6023_s2 + $0x18] sm:$0xff]  ;;  %v3349_v11 = vld [vmem:[%s6024_s3 + $0x10] sm:$0xff] }
 0x254   :  { %v5770_v9 = vpack.c.bf16 %v3348_v6, %v3347_v4  ;;  %v5269_v10 = vpack.c.bf16 %v3229_v8, %v3228_v7  ;;  %v3350_v12 = vld [vmem:[%s6024_s3 + $0x18] sm:$0xff]  ;;  %v3230_v13 = vld [vmem:[%s6023_s2 + $0x20] sm:$0xff]  ;;  %v3231_v14 = vld [vmem:[%s6023_s2 + $0x28] sm:$0xff] }
 0x255   :  { %5266 = vmatprep.subr.bf16.mxu0 %v5265_v5  ;;  %v5785_v15 = vpack.c.bf16 %v3350_v12, %v3349_v11  ;;  %v5273_v16 = vpack.c.bf16 %v3231_v14, %v3230_v13  ;;  %v3351_v17 = vld [vmem:[%s6024_s3 + $0x20] sm:$0xff]  ;;  %v3352_v18 = vld [vmem:[%s6024_s3 + $0x28] sm:$0xff]  ;;  %v3232_v19 = vld [vmem:[%s6023_s2 + $0x30] sm:$0xff] }
 0x256   :  { %5268 = vmatpush3.bf16.msra.mxu0 %v5265_v5  ;;  %5299 = vmatpush3.bf16.msra.mxu1 %v5770_v9  ;;  %v3233_v20 = vld [vmem:[%s6023_s2 + $0x38] sm:$0xff]  ;;  %v5801_v21 = vpack.c.bf16 %v3352_v18, %v3351_v17  ;;  %v3353_v23 = vld [vmem:[%s6024_s3 + $0x30] sm:$0xff]  ;;  %v3234_v25 = vld [vmem:[%s6023_s2 + $0x40] sm:$0xff] }
 0x257   :  { %5270 = vmatprep.subr.bf16.mxu0 %v5269_v10  ;;  %5300 = vmatprep.subr.bf16.mxu1 %v5526_v0  ;;  %v5277_v22 = vpack.c.bf16 %v3233_v20, %v3232_v19  ;;  %v3354_v24 = vld [vmem:[%s6024_s3 + $0x38] sm:$0xff]  ;;  %v3235_v26 = vld [vmem:[%s6023_s2 + $0x48] sm:$0xff]  ;;  %v3218_v27 = vld [vmem:[#allocation2] sm:$0xff] }
 0x258   :  { %4973 = vmatprep.mubr.f32.mxu0 %v3218_v27  ;;  %v5817_v28 = vpack.c.bf16 %v3354_v24, %v3353_v23  ;;  %v5281_v29 = vpack.c.bf16 %v3235_v26, %v3234_v25  ;;  %v3355_v30 = vld [vmem:[%s6024_s3 + $0x40] sm:$0xff]  ;;  %v3356_v31 = vld [vmem:[%s6024_s3 + $0x48] sm:$0xff]  ;;  %v3236_v32 = vld [vmem:[%s6023_s2 + $0x50] sm:$0xff] }
 0x259   :  { %v3237_v33 = vld [vmem:[%s6023_s2 + $0x58] sm:$0xff]  ;;  %v5833_v34 = vpack.c.bf16 %v3356_v31, %v3355_v30  ;;  %v3357_v36 = vld [vmem:[%s6024_s3 + $0x50] sm:$0xff]  ;;  %v3238_v38 = vld [vmem:[%s6023_s2 + $0x60] sm:$0xff] }
 0x25a   :  { %5272 = vmatpush3.bf16.msra.mxu0 %v5269_v10  ;;  %5302 = vmatpush3.bf16.msra.mxu1 %v5785_v15  ;;  %v5285_v35 = vpack.c.bf16 %v3237_v33, %v3236_v32  ;;  %v3358_v37 = vld [vmem:[%s6024_s3 + $0x58] sm:$0xff]  ;;  %v3239_v39 = vld [vmem:[%s6023_s2 + $0x68] sm:$0xff]  ;;  %v3359_v42 = vld [vmem:[%s6024_s3 + $0x60] sm:$0xff] }
 0x25b   :  { %5274 = vmatprep.subr.bf16.mxu0 %v5273_v16  ;;  %5303 = vmatprep.subr.bf16.mxu1 %v5526_v0  ;;  %v5849_v40 = vpack.c.bf16 %v3358_v37, %v3357_v36  ;;  %v5289_v41 = vpack.c.bf16 %v3239_v39, %v3238_v38  ;;  %v3360_v43 = vld [vmem:[%s6024_s3 + $0x68] sm:$0xff]  ;;  %v3240_v44 = vld [vmem:[%s6023_s2 + $0x70] sm:$0xff]  ;;  %v3241_v45 = vld [vmem:[%s6023_s2 + $0x78] sm:$0xff] }
 0x25c   :  { %v5865_v46 = vpack.c.bf16 %v3360_v43, %v3359_v42  ;;  %v5293_v47 = vpack.c.bf16 %v3241_v45, %v3240_v44  ;;  %v3361_v48 = vld [vmem:[%s6024_s3 + $0x70] sm:$0xff]  ;;  %v3362_v49 = vld [vmem:[%s6024_s3 + $0x78] sm:$0xff]  ;;  %v3219_v51 = vld [vmem:[#allocation2 + $0x8] sm:$0xff] }
 0x25d   :  { %v5875_v50 = vpack.c.bf16 %v3362_v49, %v3361_v48  ;;  %v3220_v52 = vld [vmem:[#allocation2 + $0x10] sm:$0xff]  ;;  %v3221_v53 = vld [vmem:[#allocation2 + $0x18] sm:$0xff]  ;;  %v3222_v54 = vld [vmem:[#allocation2 + $0x20] sm:$0xff] }
 0x25e   :  { %5276 = vmatpush3.bf16.msra.mxu0 %v5273_v16  ;;  %5305 = vmatpush3.bf16.msra.mxu1 %v5801_v21  ;;  %v3223_v55 = vld [vmem:[#allocation2 + $0x28] sm:$0xff]  ;;  %v3224_v56 = vld [vmem:[#allocation2 + $0x30] sm:$0xff]  ;;  %v3225_v57 = vld [vmem:[#allocation2 + $0x38] sm:$0xff] }
 0x25f   :  { %5278 = vmatprep.subr.bf16.mxu0 %v5277_v22  ;;  %5306 = vmatprep.subr.bf16.mxu1 %v5526_v0 }
 0x262   :  { %5280 = vmatpush3.bf16.msra.mxu0 %v5277_v22  ;;  %5308 = vmatpush3.bf16.msra.mxu1 %v5817_v28 }
 0x263   :  { %5282 = vmatprep.subr.bf16.mxu0 %v5281_v29  ;;  %5309 = vmatprep.subr.bf16.mxu1 %v5526_v0 }
 0x266   :  { %5284 = vmatpush3.bf16.msra.mxu0 %v5281_v29  ;;  %5311 = vmatpush3.bf16.msra.mxu1 %v5833_v34 }
 0x267   :  { %5286 = vmatprep.subr.bf16.mxu0 %v5285_v35  ;;  %5312 = vmatprep.subr.bf16.mxu1 %v5526_v0 }
 0x26a   :  { %5288 = vmatpush3.bf16.msra.mxu0 %v5285_v35  ;;  %5314 = vmatpush3.bf16.msra.mxu1 %v5849_v40 }
 0x26b   :  { %5290 = vmatprep.subr.bf16.mxu0 %v5289_v41  ;;  %5315 = vmatprep.subr.bf16.mxu1 %v5526_v0 }
 0x26e   :  { %5292 = vmatpush3.bf16.msra.mxu0 %v5289_v41  ;;  %5317 = vmatpush3.bf16.msra.mxu1 %v5865_v46 }
 0x26f   :  { %5294 = vmatprep.subr.bf16.mxu0 %v5293_v47  ;;  %5318 = vmatprep.subr.bf16.mxu1 %v5526_v0 }
 0x272   :  { %5296 = vmatpush3.bf16.msra.mxu0 %v5293_v47  ;;  %5320 = vmatpush3.bf16.msra.mxu1 %v5875_v50 }
 0x273   :  { %5321 = vmatprep.subr.bf16.mxu0 %v5526_v0  ;;  %5345 = vmatprep.subr.bf16.mxu1 %v5526_v0 }
 0x275   :  { %4974 = vmatmul.mubr.f32.vlgmr.msra.gmra.mrb[0].mxu0 %v3219_v51  ;;  %5018 = vmatmul.mubr.f32.vlgmr.msra.gmra.mrb[0].mxu1 %v5528_v1 }
 0x276   :  { %5323 = vmatpush3.bf16.msra.mxu0 %v5770_v9  ;;  %5347 = vmatpush3.bf16.msra.mxu1 %v5770_v9 }
 0x277   :  { %5324 = vmatprep.subr.bf16.mxu0 %v5526_v0  ;;  %5348 = vmatprep.subr.bf16.mxu1 %v5526_v0 }
 0x278   :  { %5087 = vmatprep.mubr.msk.f32.mxu1 %vm5527_vm0, %v5528_v1  ;;  %4976 = vmatprep.mubr.f32.mxu0 %v3220_v52 }
 0x279   :  { %4977 = vmatmul.mubr.f32.gmra.mrb[2].mxu0 %v3221_v53 }
 0x27a   :  { %5326 = vmatpush3.bf16.msra.mxu0 %v5785_v15  ;;  %5350 = vmatpush3.bf16.msra.mxu1 %v5785_v15 }
 0x27b   :  { %5327 = vmatprep.subr.bf16.mxu0 %v5526_v0  ;;  %5351 = vmatprep.subr.bf16.mxu1 %v5526_v0 }
 0x27c   :  { %4979 = vmatprep.mubr.f32.mxu0 %v3222_v54 }
 0x27d   :  { %4980 = vmatmul.mubr.f32.gmra.mrb[4].mxu0 %v3223_v55 }
 0x27e   :  { %5329 = vmatpush3.bf16.msra.mxu0 %v5801_v21  ;;  %5353 = vmatpush3.bf16.msra.mxu1 %v5801_v21 }
 0x27f   :  { %5330 = vmatprep.subr.bf16.mxu0 %v5526_v0  ;;  %5354 = vmatprep.subr.bf16.mxu1 %v5526_v0 }
 0x280   :  { %4982 = vmatprep.mubr.f32.mxu0 %v3224_v56 }
 0x281   :  { %4983 = vmatmul.mubr.f32.gmra.mrb[6].mxu0 %v3225_v57 }
 0x282   :  { %5332 = vmatpush3.bf16.msra.mxu0 %v5817_v28  ;;  %5356 = vmatpush3.bf16.msra.mxu1 %v5817_v28 }
 0x283   :  { %5333 = vmatprep.subr.bf16.mxu0 %v5526_v0  ;;  %5357 = vmatprep.subr.bf16.mxu1 %v5526_v0 }
 0x284   :  { %5052 = vmatprep.mubr.msk.f32.mxu0 %vm5527_vm0, %v5528_v1 }
 0x286   :  { %5335 = vmatpush3.bf16.msra.mxu0 %v5833_v34  ;;  %5359 = vmatpush3.bf16.msra.mxu1 %v5833_v34 }
 0x287   :  { %5336 = vmatprep.subr.bf16.mxu0 %v5526_v0  ;;  %5360 = vmatprep.subr.bf16.mxu1 %v5526_v0 }
 0x28a   :  { %5338 = vmatpush3.bf16.msra.mxu0 %v5849_v40  ;;  %5362 = vmatpush3.bf16.msra.mxu1 %v5849_v40 }
 0x28b   :  { %5339 = vmatprep.subr.bf16.mxu0 %v5526_v0  ;;  %5363 = vmatprep.subr.bf16.mxu1 %v5526_v0 }
 0x28e   :  { %5341 = vmatpush3.bf16.msra.mxu0 %v5865_v46  ;;  %5365 = vmatpush3.bf16.msra.mxu1 %v5865_v46 }
 0x28f   :  { %5342 = vmatprep.subr.bf16.mxu0 %v5526_v0  ;;  %5366 = vmatprep.subr.bf16.mxu1 %v5526_v0 }
 0x292   :  { %5344 = vmatpush3.bf16.msra.mxu0 %v5875_v50  ;;  %5368 = vmatpush3.bf16.msra.mxu1 %v5875_v50 }
 0x293   :  { %5369 = vmatprep.subr.bf16.mxu0 %v5526_v0  ;;  %5393 = vmatprep.subr.bf16.mxu1 %v5526_v0 }
 0x348   :  { %v4975_v58 = vpop.f32.mrb[0].mxu0  ;;  %v3429_v59 = vpop.f32.mrb[0].mxu1 }
 0x349   :  { %v3308_v60 = vpop.f32.mrb[1].mxu0  ;;  %v5019_v61 = vpop.f32.mrb[1].mxu1 }
 0x34a   :  { %v3433_v62 = vadd.f32 %v3429_v59, %v3308_v60 }
 0x34c   :  { %5493 = vtanh.f32 %v3433_v62  ;;  %v4978_v2 = vpop.f32.mrb[2].mxu0 }
 0x34d   :  { %v3318_v3 = vpop.f32.mrb[3].mxu0 }
 0x350   :  { %v5936_v4 = vpop.f32.mrb[4].mxu0 }
 0x351   :  { %v5938_v5 = vpop.f32.mrb[5].mxu0 }
 0x354   :  { %v5940_v6 = vpop.f32.mrb[6].mxu0 }
 0x355   :  { %v5942_v7 = vpop.f32.mrb[7].mxu0 }
 0x356   :  { %v5494_v63 = vpop.eup %5493 }
 0x357   :  { %5053 = vmatmul.mubr.f32.vlgmr.msra.gmra.mrb[8].mxu0 %v5494_v63 }
 0x358   :  { %5371 = vmatpush3.bf16.msra.mxu0 %v5770_v9  ;;  %5122 = vmatprep.mubr.msk.f32.mxu0 %vm5527_vm0, %v5528_v1 }
 0x359   :  { %5372 = vmatprep.subr.bf16.mxu0 %v5526_v0 }
 0x35c   :  { %5374 = vmatpush3.bf16.msra.mxu0 %v5785_v15 }
 0x35d   :  { %5375 = vmatprep.subr.bf16.mxu0 %v5526_v0 }
 0x360   :  { %5377 = vmatpush3.bf16.msra.mxu0 %v5801_v21 }
 0x361   :  { %5378 = vmatprep.subr.bf16.mxu0 %v5526_v0 }
 0x364   :  { %5380 = vmatpush3.bf16.msra.mxu0 %v5817_v28 }
 0x365   :  { %5381 = vmatprep.subr.bf16.mxu0 %v5526_v0 }
 0x368   :  { %5383 = vmatpush3.bf16.msra.mxu0 %v5833_v34 }
 0x369   :  { %5384 = vmatprep.subr.bf16.mxu0 %v5526_v0 }
 0x36c   :  { %5386 = vmatpush3.bf16.msra.mxu0 %v5849_v40 }
 0x36d   :  { %5387 = vmatprep.subr.bf16.mxu0 %v5526_v0 }
 0x370   :  { %5389 = vmatpush3.bf16.msra.mxu0 %v5865_v46 }
 0x371   :  { %5390 = vmatprep.subr.bf16.mxu0 %v5526_v0 }
 0x374   :  { %5392 = vmatpush3.bf16.msra.mxu0 %v5875_v50 }
 0x375   :  { %5417 = vmatprep.subr.bf16.mxu0 %v5526_v0 }
 0x42a   :  { %v3501_v8 = vpop.f32.mrb[8].mxu0 }
 0x42b   :  { %v3505_v10 = vadd.f32 %v4975_v58, %v3501_v8  ;;  %v5054_v11 = vpop.f32.mrb[9].mxu0 }
 0x42d   :  { %5495 = vtanh.f32 %v3505_v10 }
 0x437   :  { %v5496_v12 = vpop.eup %5495 }
 0x438   :  { %5088 = vmatmul.mubr.f32.vlgmr.msra.gmra.mrb[2].mxu1 %v5496_v12 }
 0x439   :  { %5395 = vmatpush3.bf16.msra.mxu1 %v5770_v9  ;;  %5157 = vmatprep.mubr.msk.f32.mxu1 %vm5527_vm0, %v5528_v1 }
 0x43a   :  { %5396 = vmatprep.subr.bf16.mxu1 %v5526_v0 }
 0x43d   :  { %5398 = vmatpush3.bf16.msra.mxu1 %v5785_v15 }
 0x43e   :  { %5399 = vmatprep.subr.bf16.mxu1 %v5526_v0 }
 0x441   :  { %5401 = vmatpush3.bf16.msra.mxu1 %v5801_v21 }
 0x442   :  { %5402 = vmatprep.subr.bf16.mxu1 %v5526_v0 }
 0x445   :  { %5404 = vmatpush3.bf16.msra.mxu1 %v5817_v28 }
 0x446   :  { %5405 = vmatprep.subr.bf16.mxu1 %v5526_v0 }
 0x449   :  { %5407 = vmatpush3.bf16.msra.mxu1 %v5833_v34 }
 0x44a   :  { %5408 = vmatprep.subr.bf16.mxu1 %v5526_v0 }
 0x44d   :  { %5410 = vmatpush3.bf16.msra.mxu1 %v5849_v40 }
 0x44e   :  { %5411 = vmatprep.subr.bf16.mxu1 %v5526_v0 }
 0x451   :  { %5413 = vmatpush3.bf16.msra.mxu1 %v5865_v46 }
 0x452   :  { %5414 = vmatprep.subr.bf16.mxu1 %v5526_v0 }
 0x455   :  { %5416 = vmatpush3.bf16.msra.mxu1 %v5875_v50 }
 0x456   :  { %5441 = vmatprep.subr.bf16.mxu1 %v5526_v0 }
 0x50b   :  { %v3573_v13 = vpop.f32.mrb[2].mxu1 }
 0x50c   :  { %v3577_v14 = vadd.f32 %v3573_v13, %v3318_v3  ;;  %v5089_v16 = vpop.f32.mrb[3].mxu1 }
 0x50e   :  { %5497 = vtanh.f32 %v3577_v14 }
 0x518   :  { %v5498_v17 = vpop.eup %5497 }
 0x519   :  { %5123 = vmatmul.mubr.f32.vlgmr.msra.gmra.mrb[10].mxu0 %v5498_v17 }
 0x51a   :  { %5419 = vmatpush3.bf16.msra.mxu0 %v5770_v9  ;;  %5192 = vmatprep.mubr.msk.f32.mxu0 %vm5527_vm0, %v5528_v1 }
 0x51b   :  { %5420 = vmatprep.subr.bf16.mxu0 %v5526_v0 }
 0x51e   :  { %5422 = vmatpush3.bf16.msra.mxu0 %v5785_v15 }
 0x51f   :  { %5423 = vmatprep.subr.bf16.mxu0 %v5526_v0 }
 0x522   :  { %5425 = vmatpush3.bf16.msra.mxu0 %v5801_v21 }
 0x523   :  { %5426 = vmatprep.subr.bf16.mxu0 %v5526_v0 }
 0x526   :  { %5428 = vmatpush3.bf16.msra.mxu0 %v5817_v28 }
 0x527   :  { %5429 = vmatprep.subr.bf16.mxu0 %v5526_v0 }
 0x52a   :  { %5431 = vmatpush3.bf16.msra.mxu0 %v5833_v34 }
 0x52b   :  { %5432 = vmatprep.subr.bf16.mxu0 %v5526_v0 }
 0x52e   :  { %5434 = vmatpush3.bf16.msra.mxu0 %v5849_v40 }
 0x52f   :  { %5435 = vmatprep.subr.bf16.mxu0 %v5526_v0 }
 0x532   :  { %5437 = vmatpush3.bf16.msra.mxu0 %v5865_v46 }
 0x533   :  { %5438 = vmatprep.subr.bf16.mxu0 %v5526_v0 }
 0x536   :  { %5440 = vmatpush3.bf16.msra.mxu0 %v5875_v50 }
 0x537   :  { %5465 = vmatprep.subr.bf16.mxu0 %v5526_v0 }
 0x5ec   :  { %v3645_v18 = vpop.f32.mrb[10].mxu0 }
 0x5ed   :  { %v3649_v19 = vadd.f32 %v4978_v2, %v3645_v18  ;;  %v5124_v20 = vpop.f32.mrb[11].mxu0 }
 0x5ef   :  { %5499 = vtanh.f32 %v3649_v19 }
 0x5f9   :  { %v5500_v22 = vpop.eup %5499 }
 0x5fa   :  { %5158 = vmatmul.mubr.f32.vlgmr.msra.gmra.mrb[4].mxu1 %v5500_v22 }
 0x5fb   :  { %5443 = vmatpush3.bf16.msra.mxu1 %v5770_v9  ;;  %5227 = vmatprep.mubr.msk.f32.mxu1 %vm5527_vm0, %v5528_v1 }
 0x5fc   :  { %5444 = vmatprep.subr.bf16.mxu1 %v5526_v0 }
 0x5ff   :  { %5446 = vmatpush3.bf16.msra.mxu1 %v5785_v15 }
 0x600   :  { %5447 = vmatprep.subr.bf16.mxu1 %v5526_v0 }
 0x603   :  { %5449 = vmatpush3.bf16.msra.mxu1 %v5801_v21 }
 0x604   :  { %5450 = vmatprep.subr.bf16.mxu1 %v5526_v0 }
 0x607   :  { %5452 = vmatpush3.bf16.msra.mxu1 %v5817_v28 }
 0x608   :  { %5453 = vmatprep.subr.bf16.mxu1 %v5526_v0 }
 0x60b   :  { %5455 = vmatpush3.bf16.msra.mxu1 %v5833_v34 }
 0x60c   :  { %5456 = vmatprep.subr.bf16.mxu1 %v5526_v0 }
 0x60f   :  { %5458 = vmatpush3.bf16.msra.mxu1 %v5849_v40 }
 0x610   :  { %5459 = vmatprep.subr.bf16.mxu1 %v5526_v0 }
 0x613   :  { %5461 = vmatpush3.bf16.msra.mxu1 %v5865_v46 }
 0x614   :  { %5462 = vmatprep.subr.bf16.mxu1 %v5526_v0 }
 0x617   :  { %5464 = vmatpush3.bf16.msra.mxu1 %v5875_v50 }
 0x6cd   :  { %v3717_v23 = vpop.f32.mrb[4].mxu1 }
 0x6ce   :  { %v3721_v24 = vadd.f32 %v3717_v23, %v5938_v5  ;;  %v5159_v25 = vpop.f32.mrb[5].mxu1 }
 0x6d0   :  { %5501 = vtanh.f32 %v3721_v24 }
 0x6da   :  { %v5502_v26 = vpop.eup %5501 }
 0x6db   :  { %5193 = vmatmul.mubr.f32.vlgmr.msra.gmra.mrb[12].mxu0 %v5502_v26 }
 0x6dc   :  { %5467 = vmatpush3.bf16.msra.mxu0 %v5770_v9  ;;  %5262 = vmatprep.mubr.msk.f32.mxu0 %vm5527_vm0, %v5528_v1 }
 0x6dd   :  { %5468 = vmatprep.subr.bf16.mxu0 %v5526_v0 }
 0x6e0   :  { %5470 = vmatpush3.bf16.msra.mxu0 %v5785_v15 }
 0x6e1   :  { %5471 = vmatprep.subr.bf16.mxu0 %v5526_v0 }
 0x6e4   :  { %5473 = vmatpush3.bf16.msra.mxu0 %v5801_v21 }
 0x6e5   :  { %5474 = vmatprep.subr.bf16.mxu0 %v5526_v0 }
 0x6e8   :  { %5476 = vmatpush3.bf16.msra.mxu0 %v5817_v28 }
 0x6e9   :  { %5477 = vmatprep.subr.bf16.mxu0 %v5526_v0 }
 0x6ec   :  { %5479 = vmatpush3.bf16.msra.mxu0 %v5833_v34 }
 0x6ed   :  { %5480 = vmatprep.subr.bf16.mxu0 %v5526_v0 }
 0x6f0   :  { %5482 = vmatpush3.bf16.msra.mxu0 %v5849_v40 }
 0x6f1   :  { %5483 = vmatprep.subr.bf16.mxu0 %v5526_v0 }
 0x6f4   :  { %5485 = vmatpush3.bf16.msra.mxu0 %v5865_v46 }
 0x6f5   :  { %5486 = vmatprep.subr.bf16.mxu0 %v5526_v0 }
 0x6f8   :  { %5488 = vmatpush3.bf16.msra.mxu0 %v5875_v50 }
 0x7ae   :  { %v3789_v1 = vpop.f32.mrb[12].mxu0 }
 0x7af   :  { %v3793_v9 = vadd.f32 %v5936_v4, %v3789_v1  ;;  %v5194_v15 = vpop.f32.mrb[13].mxu0 }
 0x7b1   :  { %5503 = vtanh.f32 %v3793_v9 }
 0x7bb   :  { %v5504_v21 = vpop.eup %5503 }
 0x7bc   :  { %5228 = vmatmul.mubr.f32.vlgmr.msra.gmra.mrb[6].mxu1 %v5504_v21 }
 0x88f   :  { %v3861_v27 = vpop.f32.mrb[6].mxu1 }
 0x890   :  { %v3865_v28 = vadd.f32 %v3861_v27, %v5942_v7  ;;  %v5229_v29 = vpop.f32.mrb[7].mxu1 }
 0x892   :  { %5505 = vtanh.f32 %v3865_v28 }
 0x89c   :  { %v5506_v30 = vpop.eup %5505 }
 0x89d   :  { %5263 = vmatmul.mubr.f32.vlgmr.msra.gmra.mrb[14].mxu0 %v5506_v30 }
 0x970   :  { %v3933_v31 = vpop.f32.mrb[14].mxu0 }
 0x971   :  { %v3937_v32 = vadd.f32 %v5940_v6, %v3933_v31  ;;  %v5264_v0 = vpop.f32.mrb[15].mxu0 }
 0x973   :  { %5507 = vtanh.f32 %v3937_v32 }
 0x97d   :  { %v5508_v33 = vpop.eup %5507 }
 0x97e   :  { %3939 = vst [vmem:[%s6025_s4] sm:$0xff] %v5508_v33 }
 0x97f   :  { %3944 = vsyncmov [#allocation3] }
 0x982   :  { %s3945_s13 = vpop.sfrf %3944 }
 0x983   :  { %p4780_p5 = scmp.ne.s32.totalorder %s3945_s13, 0 }
 0x985   :  { %3949 = shalt.err (%p4780_p5)  }

</bundles_post_ra>
